<compile_context>
chip_gen: v6e
topology: v6e:2x2x1
jax: 0.10.0
libtpu: 0.0.40
codegen_flags: <defaults>
</compile_context>

<pallas_src>
import jax
import jax.numpy as jnp
import numpy as np
from jax.experimental import pallas as pl
from jax.experimental.pallas import tpu as pltpu

KH = 5          # conv kernel height
H_STRIDE = 2    # conv stride along H
PAD_H = 1       # conv padding along H
LEAKY_SLOPE = 0.2
BN_EPS = 1e-5


def _conv_h_out(h):
    return (h + 2 * PAD_H - KH) // H_STRIDE + 1


def _leaky(y):
    return jnp.where(y >= 0.0, y, LEAKY_SLOPE * y)


# ---------------------------------------------------------------------------
# Fused kernel
# ---------------------------------------------------------------------------
def _make_fused_kernel(B, W, h_outs, chans):
    """Builds the fused forward kernel body (closure over static shapes).

    Ref order (all VMEM, full blocks):
      lhs1 (BW*h1, KH) f32, w1 (KH, C1) f32, b1 (1, C1) f32,
      wcat[1..L-1] (C_prev, KH*C) bf16,
      tsel[1..L-1] (BW*h, KH*BW*h_prev) f32 (constant 0/1 selection),
      gamma[1..L-1], beta[1..L-1] (1, C) f32,
      wcls (W*h_f, C_f) f32, bcls (1, 1) f32,
      feat_out (BW*h_f, C_f) f32, logit_out (B, 1) f32.
    """
    L = len(chans)
    h_f = h_outs[-1]
    rows_per_b = W * h_f

    def kernel(*refs):
        i = 0
        lhs1_ref = refs[i]; i += 1
        w1_ref = refs[i]; i += 1
        b1_ref = refs[i]; i += 1
        wcat_refs = refs[i:i + L - 1]; i += L - 1
        tsel_refs = refs[i:i + L - 1]; i += L - 1
        gamma_refs = refs[i:i + L - 1]; i += L - 1
        beta_refs = refs[i:i + L - 1]; i += L - 1
        wcls_ref = refs[i]; i += 1
        bcls_ref = refs[i]; i += 1
        feat_ref = refs[i]; i += 1
        logit_ref = refs[i]; i += 1

        # ---- layer 0: Conv(k=(5,1), s=(2,1), p=(1,0)), c_in = 1 -----------
        # im2col LHS is prepared by the wrapper; with a single input channel
        # the conv is 5 f32 VPU broadcast outer products (no tiny-K MXU op).
        x1 = lhs1_ref[...]                              # (BW*h1, KH) f32
        w1 = w1_ref[...]                                # (KH, C1)    f32
        y = x1[:, 0:1] * w1[0:1, :]
        for k in range(1, KH):
            y = y + x1[:, k:k + 1] * w1[k:k + 1, :]
        y = _leaky(y + b1_ref[...])                     # (BW*h1, C1) f32

        # ---- layers 1..L-1: two stacked MXU matmuls per layer -------------
        for li in range(L - 1):
            c_out = chans[li + 1][1]
            m_prev = y.shape[0]

            # (1) per-tap channel mixing, all taps in one dot (bf16 -> f32 acc)
            z = jnp.dot(y.astype(jnp.bfloat16), wcat_refs[li][...],
                        preferred_element_type=jnp.float32)   # (m_prev, KH*c_out)
            # restack taps along rows: (KH*m_prev, c_out)
            z_stack = jnp.concatenate(
                [z[:, k * c_out:(k + 1) * c_out] for k in range(KH)], axis=0)
            # (2) stride-2 tap gather + tap sum + H zero-padding as ONE
            #     constant 0/1 selection matmul (exact in f32).
            y = jnp.dot(tsel_refs[li][...], z_stack,
                        preferred_element_type=jnp.float32)   # (BW*h, c_out)

            # Training-mode BatchNorm2d: batch statistics over all B*h*W
            # positions, biased variance, two-pass (mean-centered) for
            # numerical robustness.  The conv bias is omitted: it cancels
            # exactly under the mean subtraction.
            inv_n = 1.0 / float(y.shape[0])
            mean = jnp.sum(y, axis=0, keepdims=True) * inv_n
            yc = y - mean
            var = jnp.sum(yc * yc, axis=0, keepdims=True) * inv_n
            scale = gamma_refs[li][...] * jax.lax.rsqrt(var + BN_EPS)
            y = _leaky(yc * scale + beta_refs[li][...])

        # ---- final features (lane-dense 2D store) --------------------------
        feat_ref[...] = y                               # (BW*h_f, C_f) f32

        # ---- fused classifier: multiply-reduce per sample ------------------
        wcls = wcls_ref[...]                            # (W*h_f, C_f) f32
        logits = []
        for b in range(B):
            yb = y[b * rows_per_b:(b + 1) * rows_per_b, :]
            s = jnp.sum(yb * wcls, axis=1, keepdims=True)        # (W*h_f, 1)
            logits.append(jnp.sum(s, axis=0, keepdims=True))     # (1, 1)
        logit_ref[...] = jnp.concatenate(logits, axis=0) + bcls_ref[...]

    return kernel


def _vmem_spec():
    return pl.BlockSpec(memory_space=pltpu.MemorySpace.VMEM)


def _make_tap_select(h_in, h_out, bw_count):
    """Constant 0/1 matrix T with  conv_out = T @ vstack_k(act @ W_k).

    T[bw*h_out + j, k*BW*h_in + bw*h_in + p] = 1  iff  p == 2*j + k - PAD_H
    is a valid input row; pad rows simply have no 1s (contribute zero).
    """
    m_in, m_out = bw_count * h_in, bw_count * h_out
    t = np.zeros((m_out, KH * m_in), np.float32)
    for bw in range(bw_count):
        for j in range(h_out):
            for k in range(KH):
                p = H_STRIDE * j + k - PAD_H
                if 0 <= p < h_in:
                    t[bw * h_out + j, k * m_in + bw * h_in + p] = 1.0
    return jnp.asarray(t)


# ---------------------------------------------------------------------------
# Wrapper (layout plumbing in plain JAX, all compute inside the kernel)
# ---------------------------------------------------------------------------
def conv2d_discriminator_forward(params, x):
    H, W = params["input_shape"]
    B = x.shape[0]
    BW = B * W
    convs = params["convs"]
    L = len(convs)

    chans, h_outs = [], []
    c_in, h = 1, H
    for w, _ in convs:
        c_out = w.shape[0]
        chans.append((c_in, c_out))
        h = _conv_h_out(h)
        h_outs.append(h)
        c_in = c_out
    h_f, c_f = h_outs[-1], chans[-1][1]
    m_sizes = [BW * hh for hh in h_outs]

    # --- layer-0 im2col LHS (pure layout plumbing) --------------------------
    xb = x.reshape(B, H, W).astype(jnp.float32)
    xpad = jnp.pad(xb, ((0, 0), (PAD_H, PAD_H), (0, 0)))            # (B, H+2, W)
    rows = (H_STRIDE * jnp.arange(h_outs[0])[:, None]
            + jnp.arange(KH)[None, :])                              # (h1, KH)
    taps = xpad[:, rows, :]                                         # (B, h1, KH, W)
    lhs1 = jnp.transpose(taps, (0, 3, 1, 2)).reshape(BW * h_outs[0], KH)

    # --- weights -------------------------------------------------------------
    w0, b0 = convs[0]
    w1 = jnp.transpose(w0[:, :, :, 0], (2, 1, 0)).reshape(
        KH * chans[0][0], chans[0][1]).astype(jnp.float32)
    b1 = b0.reshape(1, -1).astype(jnp.float32)

    wcats, tsels, gammas, betas = [], [], [], []
    for li in range(1, L):
        w, _ = convs[li]   # (c_out, c_in, KH, 1); conv bias cancels under BN
        wcat = jnp.transpose(w[:, :, :, 0], (1, 2, 0)).reshape(
            chans[li][0], KH * chans[li][1]).astype(jnp.bfloat16)
        wcats.append(wcat)
        tsels.append(_make_tap_select(h_outs[li - 1], h_outs[li], BW))
        g, bt = params["bns"][li]
        gammas.append(g.reshape(1, -1).astype(jnp.float32))
        betas.append(bt.reshape(1, -1).astype(jnp.float32))

    # classifier weight permuted from NCHW-flatten order (c, h, w) to (w*h, c)
    wl, bl = params["classifier"]
    wcls = jnp.transpose(wl.reshape(c_f, h_f, W), (2, 1, 0)).reshape(
        W * h_f, c_f).astype(jnp.float32)
    bcls = bl.reshape(1, 1).astype(jnp.float32)

    inputs = [lhs1, w1, b1, *wcats, *tsels, *gammas, *betas, wcls, bcls]

    # advisory cost estimate so XLA can schedule the surrounding layout ops
    flops = 2 * m_sizes[0] * KH * chans[0][1]
    for li in range(1, L):
        flops += 2 * m_sizes[li - 1] * chans[li][0] * KH * chans[li][1]
        flops += 2 * m_sizes[li] * KH * m_sizes[li - 1] * chans[li][1]
    flops += 2 * B * W * h_f * c_f
    transcendentals = sum(c for _, c in chans[1:])
    bytes_accessed = sum(int(a.size) * a.dtype.itemsize for a in inputs)
    bytes_accessed += BW * h_f * c_f * 4 + B * 4

    kernel = _make_fused_kernel(B, W, h_outs, chans)
    feat_k, logit = pl.pallas_call(
        kernel,
        out_shape=(jax.ShapeDtypeStruct((BW * h_f, c_f), jnp.float32),
                   jax.ShapeDtypeStruct((B, 1), jnp.float32)),
        in_specs=[_vmem_spec() for _ in inputs],
        out_specs=(_vmem_spec(), _vmem_spec()),
        cost_estimate=pl.CostEstimate(flops=int(flops),
                                      transcendentals=int(transcendentals),
                                      bytes_accessed=int(bytes_accessed)),
    )(*inputs)

    feat = jnp.transpose(feat_k.reshape(B, W, h_f, c_f), (0, 3, 2, 1))  # NCHW
    return feat, logit.reshape(-1)


# ---------------------------------------------------------------------------
# Parameter init (matches the PyTorch module's structure) + pure-JAX reference
# ---------------------------------------------------------------------------
def init_params(key, input_shape, hidden_dims):
    H, W = input_shape
    params = {"convs": [], "bns": [], "input_shape": input_shape}
    in_c, h = 1, H
    for idx, out_c in enumerate(hidden_dims):
        key, kw, kb = jax.random.split(key, 3)
        fan_in = in_c * KH
        w = jax.random.normal(kw, (out_c, in_c, KH, 1), jnp.float32) / jnp.sqrt(fan_in)
        b = 0.01 * jax.random.normal(kb, (out_c,), jnp.float32)
        params["convs"].append((w, b))
        if idx > 0:   # BatchNorm2d only for idx > 0; fresh init gamma=1, beta=0
            params["bns"].append((jnp.ones((out_c,), jnp.float32),
                                  jnp.zeros((out_c,), jnp.float32)))
        else:
            params["bns"].append(None)
        in_c = out_c
        h = _conv_h_out(h)
    flattened = in_c * h * W
    key, kw = jax.random.split(key)
    wl = jax.random.normal(kw, (1, flattened), jnp.float32) / jnp.sqrt(flattened)
    bl = jnp.zeros((1,), jnp.float32)
    params["classifier"] = (wl, bl)
    return params


def reference_forward(params, x):
    """Pure-JAX f32 reference (training-mode BatchNorm with batch stats)."""
    H, W = params["input_shape"]
    B = x.shape[0]
    h = x.reshape(B, 1, H, W).astype(jnp.float32)
    for idx, (w, b) in enumerate(params["convs"]):
        out = jax.lax.conv_general_dilated(
            h, w, window_strides=(H_STRIDE, 1),
            padding=((PAD_H, PAD_H), (0, 0)),
            dimension_numbers=("NCHW", "OIHW", "NCHW"))
        out = out + b.reshape(1, -1, 1, 1)
        if idx > 0:
            g, bt = params["bns"][idx]
            mean = jnp.mean(out, axis=(0, 2, 3), keepdims=True)
            var = jnp.mean((out - mean) ** 2, axis=(0, 2, 3), keepdims=True)
            out = (out - mean) * jax.lax.rsqrt(var + BN_EPS)
            out = out * g.reshape(1, -1, 1, 1) + bt.reshape(1, -1, 1, 1)
        h = jnp.where(out >= 0.0, out, LEAKY_SLOPE * out)
    wl, bl = params["classifier"]
    logit = h.reshape(B, -1) @ wl.T + bl
    return h, logit.reshape(-1)


if __name__ == "__main__":
    # Small shapes consistent with the module: input_shape=(64, 2),
    # default hidden_dims, batch=2.
    input_shape = (64, 2)
    hidden_dims = [32, 64, 128, 256]
    B = 2

    key = jax.random.PRNGKey(0)
    kp, kx = jax.random.split(key)
    params = init_params(kp, input_shape, hidden_dims)
    x = jax.random.normal(kx, (B, input_shape[0] * input_shape[1]), jnp.float32)

    feat, logit = conv2d_discriminator_forward(params, x)
    jax.block_until_ready((feat, logit))

    h_final = input_shape[0]
    for _ in hidden_dims:
        h_final = _conv_h_out(h_final)
    assert feat.shape == (B, hidden_dims[-1], h_final, input_shape[1])
    assert logit.shape == (B,)
    assert bool(jnp.all(jnp.isfinite(feat))) and bool(jnp.all(jnp.isfinite(logit)))

    # correctness vs. f32 reference (loose tolerance: conv matmuls use bf16 LHS)
    feat_ref, logit_ref = reference_forward(params, x)
    feat_err = float(jnp.max(jnp.abs(feat - feat_ref)))
    logit_err = float(jnp.max(jnp.abs(logit - logit_ref)))
    assert feat_err < 0.2, f"feat mismatch: max abs err {feat_err}"
    assert logit_err < 0.5, f"logit mismatch: max abs err {logit_err}"

    print("KERNEL_OK")
</pallas_src>

<mosaic_0001>
module attributes {stable_mosaic.version = 11 : i64} {
  func.func @kernel(%arg0: memref<124x5xf32, #tpu.memory_space<vmem>>, %arg1: memref<5x32xf32, #tpu.memory_space<vmem>>, %arg2: memref<1x32xf32, #tpu.memory_space<vmem>>, %arg3: memref<32x320xbf16, #tpu.memory_space<vmem>>, %arg4: memref<64x640xbf16, #tpu.memory_space<vmem>>, %arg5: memref<128x1280xbf16, #tpu.memory_space<vmem>>, %arg6: memref<60x620xf32, #tpu.memory_space<vmem>>, %arg7: memref<28x300xf32, #tpu.memory_space<vmem>>, %arg8: memref<12x140xf32, #tpu.memory_space<vmem>>, %arg9: memref<1x64xf32, #tpu.memory_space<vmem>>, %arg10: memref<1x128xf32, #tpu.memory_space<vmem>>, %arg11: memref<1x256xf32, #tpu.memory_space<vmem>>, %arg12: memref<1x64xf32, #tpu.memory_space<vmem>>, %arg13: memref<1x128xf32, #tpu.memory_space<vmem>>, %arg14: memref<1x256xf32, #tpu.memory_space<vmem>>, %arg15: memref<6x256xf32, #tpu.memory_space<vmem>>, %arg16: memref<1x1xf32, #tpu.memory_space<vmem>>, %arg17: memref<12x256xf32, #tpu.memory_space<vmem>>, %arg18: memref<2x1xf32, #tpu.memory_space<vmem>>) attributes {dimension_semantics = [], scalar_prefetch = 0 : i64, scratch_operands = 0 : i64, tpu.core_type = #tpu.core_type<tc>} {
    %c0 = arith.constant 0 : index
    %c0_0 = arith.constant 0 : index
    %0 = vector.load %arg0[%c0, %c0_0] : memref<124x5xf32, #tpu.memory_space<vmem>>, vector<124x5xf32>
    %c0_1 = arith.constant 0 : index
    %c0_2 = arith.constant 0 : index
    %1 = vector.load %arg1[%c0_1, %c0_2] : memref<5x32xf32, #tpu.memory_space<vmem>>, vector<5x32xf32>
    %2 = vector.extract_strided_slice %0 {offsets = [0, 0], sizes = [124, 1], strides = [1, 1]} : vector<124x5xf32> to vector<124x1xf32>
    %3 = vector.extract_strided_slice %1 {offsets = [0, 0], sizes = [1, 32], strides = [1, 1]} : vector<5x32xf32> to vector<1x32xf32>
    %4 = vector.broadcast %2 : vector<124x1xf32> to vector<124x32xf32>
    %5 = vector.broadcast %3 : vector<1x32xf32> to vector<124x32xf32>
    %6 = arith.mulf %4, %5 : vector<124x32xf32>
    %7 = vector.extract_strided_slice %0 {offsets = [0, 1], sizes = [124, 1], strides = [1, 1]} : vector<124x5xf32> to vector<124x1xf32>
    %8 = vector.extract_strided_slice %1 {offsets = [1, 0], sizes = [1, 32], strides = [1, 1]} : vector<5x32xf32> to vector<1x32xf32>
    %9 = vector.broadcast %7 : vector<124x1xf32> to vector<124x32xf32>
    %10 = vector.broadcast %8 : vector<1x32xf32> to vector<124x32xf32>
    %11 = arith.mulf %9, %10 : vector<124x32xf32>
    %12 = arith.addf %6, %11 : vector<124x32xf32>
    %13 = vector.extract_strided_slice %0 {offsets = [0, 2], sizes = [124, 1], strides = [1, 1]} : vector<124x5xf32> to vector<124x1xf32>
    %14 = vector.extract_strided_slice %1 {offsets = [2, 0], sizes = [1, 32], strides = [1, 1]} : vector<5x32xf32> to vector<1x32xf32>
    %15 = vector.broadcast %13 : vector<124x1xf32> to vector<124x32xf32>
    %16 = vector.broadcast %14 : vector<1x32xf32> to vector<124x32xf32>
    %17 = arith.mulf %15, %16 : vector<124x32xf32>
    %18 = arith.addf %12, %17 : vector<124x32xf32>
    %19 = vector.extract_strided_slice %0 {offsets = [0, 3], sizes = [124, 1], strides = [1, 1]} : vector<124x5xf32> to vector<124x1xf32>
    %20 = vector.extract_strided_slice %1 {offsets = [3, 0], sizes = [1, 32], strides = [1, 1]} : vector<5x32xf32> to vector<1x32xf32>
    %21 = vector.broadcast %19 : vector<124x1xf32> to vector<124x32xf32>
    %22 = vector.broadcast %20 : vector<1x32xf32> to vector<124x32xf32>
    %23 = arith.mulf %21, %22 : vector<124x32xf32>
    %24 = arith.addf %18, %23 : vector<124x32xf32>
    %25 = vector.extract_strided_slice %0 {offsets = [0, 4], sizes = [124, 1], strides = [1, 1]} : vector<124x5xf32> to vector<124x1xf32>
    %26 = vector.extract_strided_slice %1 {offsets = [4, 0], sizes = [1, 32], strides = [1, 1]} : vector<5x32xf32> to vector<1x32xf32>
    %27 = vector.broadcast %25 : vector<124x1xf32> to vector<124x32xf32>
    %28 = vector.broadcast %26 : vector<1x32xf32> to vector<124x32xf32>
    %29 = arith.mulf %27, %28 : vector<124x32xf32>
    %30 = arith.addf %24, %29 : vector<124x32xf32>
    %c0_3 = arith.constant 0 : index
    %c0_4 = arith.constant 0 : index
    %31 = vector.load %arg2[%c0_3, %c0_4] : memref<1x32xf32, #tpu.memory_space<vmem>>, vector<1x32xf32>
    %32 = vector.broadcast %31 : vector<1x32xf32> to vector<124x32xf32>
    %33 = arith.addf %30, %32 : vector<124x32xf32>
    %cst = arith.constant 0.000000e+00 : f32
    %34 = vector.broadcast %cst : f32 to vector<124x32xf32>
    %35 = arith.cmpf oge, %33, %34 : vector<124x32xf32>
    %cst_5 = arith.constant 2.000000e-01 : f32
    %36 = vector.broadcast %cst_5 : f32 to vector<124x32xf32>
    %37 = arith.mulf %36, %33 : vector<124x32xf32>
    %38 = arith.select %35, %33, %37 : vector<124x32xi1>, vector<124x32xf32>
    %39 = arith.truncf %38 : vector<124x32xf32> to vector<124x32xbf16>
    %c0_6 = arith.constant 0 : index
    %c0_7 = arith.constant 0 : index
    %40 = vector.load %arg3[%c0_6, %c0_7] : memref<32x320xbf16, #tpu.memory_space<vmem>>, vector<32x320xbf16>
    %cst_8 = arith.constant dense<0.000000e+00> : vector<124x320xf32>
    %41 = tpu.matmul %39, %40, %cst_8 {dimension_numbers = #tpu.dot_dimension_numbers<[1], [0], [0], [1], [0, 0, 1, 1], [], []>} : vector<124x32xbf16>, vector<32x320xbf16>, vector<124x320xf32> -> vector<124x320xf32>
    %42 = vector.extract_strided_slice %41 {offsets = [0, 0], sizes = [124, 64], strides = [1, 1]} : vector<124x320xf32> to vector<124x64xf32>
    %43 = vector.extract_strided_slice %41 {offsets = [0, 64], sizes = [124, 64], strides = [1, 1]} : vector<124x320xf32> to vector<124x64xf32>
    %44 = vector.extract_strided_slice %41 {offsets = [0, 128], sizes = [124, 64], strides = [1, 1]} : vector<124x320xf32> to vector<124x64xf32>
    %45 = vector.extract_strided_slice %41 {offsets = [0, 192], sizes = [124, 64], strides = [1, 1]} : vector<124x320xf32> to vector<124x64xf32>
    %46 = vector.extract_strided_slice %41 {offsets = [0, 256], sizes = [124, 64], strides = [1, 1]} : vector<124x320xf32> to vector<124x64xf32>
    %47 = tpu.concatenate %42, %43, %44, %45, %46 in 0 : vector<124x64xf32>, vector<124x64xf32>, vector<124x64xf32>, vector<124x64xf32>, vector<124x64xf32> -> vector<620x64xf32>
    %c0_9 = arith.constant 0 : index
    %c0_10 = arith.constant 0 : index
    %48 = vector.load %arg6[%c0_9, %c0_10] : memref<60x620xf32, #tpu.memory_space<vmem>>, vector<60x620xf32>
    %cst_11 = arith.constant dense<0.000000e+00> : vector<60x64xf32>
    %49 = tpu.matmul %48, %47, %cst_11 {dimension_numbers = #tpu.dot_dimension_numbers<[1], [0], [0], [1], [0, 0, 1, 1], [], []>} : vector<60x620xf32>, vector<620x64xf32>, vector<60x64xf32> -> vector<60x64xf32>
    %cst_12 = arith.constant dense<0.000000e+00> : vector<64xf32>
    %50 = vector.multi_reduction <add>, %49, %cst_12 [0] : vector<60x64xf32> to vector<64xf32>
    %51 = vector.shape_cast %50 : vector<64xf32> to vector<1x64xf32>
    %cst_13 = arith.constant 0.0166666675 : f32
    %52 = vector.broadcast %cst_13 : f32 to vector<1x64xf32>
    %53 = arith.mulf %51, %52 : vector<1x64xf32>
    %54 = vector.broadcast %53 : vector<1x64xf32> to vector<60x64xf32>
    %55 = arith.subf %49, %54 : vector<60x64xf32>
    %56 = arith.mulf %55, %55 : vector<60x64xf32>
    %cst_14 = arith.constant dense<0.000000e+00> : vector<64xf32>
    %57 = vector.multi_reduction <add>, %56, %cst_14 [0] : vector<60x64xf32> to vector<64xf32>
    %58 = vector.shape_cast %57 : vector<64xf32> to vector<1x64xf32>
    %cst_15 = arith.constant 0.0166666675 : f32
    %59 = vector.broadcast %cst_15 : f32 to vector<1x64xf32>
    %60 = arith.mulf %58, %59 : vector<1x64xf32>
    %c0_16 = arith.constant 0 : index
    %c0_17 = arith.constant 0 : index
    %61 = vector.load %arg9[%c0_16, %c0_17] : memref<1x64xf32, #tpu.memory_space<vmem>>, vector<1x64xf32>
    %cst_18 = arith.constant 9.99999974E-6 : f32
    %62 = vector.broadcast %cst_18 : f32 to vector<1x64xf32>
    %63 = arith.addf %60, %62 : vector<1x64xf32>
    %64 = math.rsqrt %63 : vector<1x64xf32>
    %65 = arith.mulf %61, %64 : vector<1x64xf32>
    %66 = vector.broadcast %65 : vector<1x64xf32> to vector<60x64xf32>
    %67 = arith.mulf %55, %66 : vector<60x64xf32>
    %c0_19 = arith.constant 0 : index
    %c0_20 = arith.constant 0 : index
    %68 = vector.load %arg12[%c0_19, %c0_20] : memref<1x64xf32, #tpu.memory_space<vmem>>, vector<1x64xf32>
    %69 = vector.broadcast %68 : vector<1x64xf32> to vector<60x64xf32>
    %70 = arith.addf %67, %69 : vector<60x64xf32>
    %cst_21 = arith.constant 0.000000e+00 : f32
    %71 = vector.broadcast %cst_21 : f32 to vector<60x64xf32>
    %72 = arith.cmpf oge, %70, %71 : vector<60x64xf32>
    %cst_22 = arith.constant 2.000000e-01 : f32
    %73 = vector.broadcast %cst_22 : f32 to vector<60x64xf32>
    %74 = arith.mulf %73, %70 : vector<60x64xf32>
    %75 = arith.select %72, %70, %74 : vector<60x64xi1>, vector<60x64xf32>
    %76 = arith.truncf %75 : vector<60x64xf32> to vector<60x64xbf16>
    %c0_23 = arith.constant 0 : index
    %c0_24 = arith.constant 0 : index
    %77 = vector.load %arg4[%c0_23, %c0_24] : memref<64x640xbf16, #tpu.memory_space<vmem>>, vector<64x640xbf16>
    %cst_25 = arith.constant dense<0.000000e+00> : vector<60x640xf32>
    %78 = tpu.matmul %76, %77, %cst_25 {dimension_numbers = #tpu.dot_dimension_numbers<[1], [0], [0], [1], [0, 0, 1, 1], [], []>} : vector<60x64xbf16>, vector<64x640xbf16>, vector<60x640xf32> -> vector<60x640xf32>
    %79 = vector.extract_strided_slice %78 {offsets = [0, 0], sizes = [60, 128], strides = [1, 1]} : vector<60x640xf32> to vector<60x128xf32>
    %80 = vector.extract_strided_slice %78 {offsets = [0, 128], sizes = [60, 128], strides = [1, 1]} : vector<60x640xf32> to vector<60x128xf32>
    %81 = vector.extract_strided_slice %78 {offsets = [0, 256], sizes = [60, 128], strides = [1, 1]} : vector<60x640xf32> to vector<60x128xf32>
    %82 = vector.extract_strided_slice %78 {offsets = [0, 384], sizes = [60, 128], strides = [1, 1]} : vector<60x640xf32> to vector<60x128xf32>
    %83 = vector.extract_strided_slice %78 {offsets = [0, 512], sizes = [60, 128], strides = [1, 1]} : vector<60x640xf32> to vector<60x128xf32>
    %84 = tpu.concatenate %79, %80, %81, %82, %83 in 0 : vector<60x128xf32>, vector<60x128xf32>, vector<60x128xf32>, vector<60x128xf32>, vector<60x128xf32> -> vector<300x128xf32>
    %c0_26 = arith.constant 0 : index
    %c0_27 = arith.constant 0 : index
    %85 = vector.load %arg7[%c0_26, %c0_27] : memref<28x300xf32, #tpu.memory_space<vmem>>, vector<28x300xf32>
    %cst_28 = arith.constant dense<0.000000e+00> : vector<28x128xf32>
    %86 = tpu.matmul %85, %84, %cst_28 {dimension_numbers = #tpu.dot_dimension_numbers<[1], [0], [0], [1], [0, 0, 1, 1], [], []>} : vector<28x300xf32>, vector<300x128xf32>, vector<28x128xf32> -> vector<28x128xf32>
    %cst_29 = arith.constant dense<0.000000e+00> : vector<128xf32>
    %87 = vector.multi_reduction <add>, %86, %cst_29 [0] : vector<28x128xf32> to vector<128xf32>
    %88 = vector.shape_cast %87 : vector<128xf32> to vector<1x128xf32>
    %cst_30 = arith.constant 0.0357142873 : f32
    %89 = vector.broadcast %cst_30 : f32 to vector<1x128xf32>
    %90 = arith.mulf %88, %89 : vector<1x128xf32>
    %91 = vector.broadcast %90 : vector<1x128xf32> to vector<28x128xf32>
    %92 = arith.subf %86, %91 : vector<28x128xf32>
    %93 = arith.mulf %92, %92 : vector<28x128xf32>
    %cst_31 = arith.constant dense<0.000000e+00> : vector<128xf32>
    %94 = vector.multi_reduction <add>, %93, %cst_31 [0] : vector<28x128xf32> to vector<128xf32>
    %95 = vector.shape_cast %94 : vector<128xf32> to vector<1x128xf32>
    %cst_32 = arith.constant 0.0357142873 : f32
    %96 = vector.broadcast %cst_32 : f32 to vector<1x128xf32>
    %97 = arith.mulf %95, %96 : vector<1x128xf32>
    %c0_33 = arith.constant 0 : index
    %c0_34 = arith.constant 0 : index
    %98 = vector.load %arg10[%c0_33, %c0_34] : memref<1x128xf32, #tpu.memory_space<vmem>>, vector<1x128xf32>
    %cst_35 = arith.constant 9.99999974E-6 : f32
    %99 = vector.broadcast %cst_35 : f32 to vector<1x128xf32>
    %100 = arith.addf %97, %99 : vector<1x128xf32>
    %101 = math.rsqrt %100 : vector<1x128xf32>
    %102 = arith.mulf %98, %101 : vector<1x128xf32>
    %103 = vector.broadcast %102 : vector<1x128xf32> to vector<28x128xf32>
    %104 = arith.mulf %92, %103 : vector<28x128xf32>
    %c0_36 = arith.constant 0 : index
    %c0_37 = arith.constant 0 : index
    %105 = vector.load %arg13[%c0_36, %c0_37] : memref<1x128xf32, #tpu.memory_space<vmem>>, vector<1x128xf32>
    %106 = vector.broadcast %105 : vector<1x128xf32> to vector<28x128xf32>
    %107 = arith.addf %104, %106 : vector<28x128xf32>
    %cst_38 = arith.constant 0.000000e+00 : f32
    %108 = vector.broadcast %cst_38 : f32 to vector<28x128xf32>
    %109 = arith.cmpf oge, %107, %108 : vector<28x128xf32>
    %cst_39 = arith.constant 2.000000e-01 : f32
    %110 = vector.broadcast %cst_39 : f32 to vector<28x128xf32>
    %111 = arith.mulf %110, %107 : vector<28x128xf32>
    %112 = arith.select %109, %107, %111 : vector<28x128xi1>, vector<28x128xf32>
    %113 = arith.truncf %112 : vector<28x128xf32> to vector<28x128xbf16>
    %c0_40 = arith.constant 0 : index
    %c0_41 = arith.constant 0 : index
    %114 = vector.load %arg5[%c0_40, %c0_41] : memref<128x1280xbf16, #tpu.memory_space<vmem>>, vector<128x1280xbf16>
    %cst_42 = arith.constant dense<0.000000e+00> : vector<28x1280xf32>
    %115 = tpu.matmul %113, %114, %cst_42 {dimension_numbers = #tpu.dot_dimension_numbers<[1], [0], [0], [1], [0, 0, 1, 1], [], []>} : vector<28x128xbf16>, vector<128x1280xbf16>, vector<28x1280xf32> -> vector<28x1280xf32>
    %116 = vector.extract_strided_slice %115 {offsets = [0, 0], sizes = [28, 256], strides = [1, 1]} : vector<28x1280xf32> to vector<28x256xf32>
    %117 = vector.extract_strided_slice %115 {offsets = [0, 256], sizes = [28, 256], strides = [1, 1]} : vector<28x1280xf32> to vector<28x256xf32>
    %118 = vector.extract_strided_slice %115 {offsets = [0, 512], sizes = [28, 256], strides = [1, 1]} : vector<28x1280xf32> to vector<28x256xf32>
    %119 = vector.extract_strided_slice %115 {offsets = [0, 768], sizes = [28, 256], strides = [1, 1]} : vector<28x1280xf32> to vector<28x256xf32>
    %120 = vector.extract_strided_slice %115 {offsets = [0, 1024], sizes = [28, 256], strides = [1, 1]} : vector<28x1280xf32> to vector<28x256xf32>
    %121 = tpu.concatenate %116, %117, %118, %119, %120 in 0 : vector<28x256xf32>, vector<28x256xf32>, vector<28x256xf32>, vector<28x256xf32>, vector<28x256xf32> -> vector<140x256xf32>
    %c0_43 = arith.constant 0 : index
    %c0_44 = arith.constant 0 : index
    %122 = vector.load %arg8[%c0_43, %c0_44] : memref<12x140xf32, #tpu.memory_space<vmem>>, vector<12x140xf32>
    %cst_45 = arith.constant dense<0.000000e+00> : vector<12x256xf32>
    %123 = tpu.matmul %122, %121, %cst_45 {dimension_numbers = #tpu.dot_dimension_numbers<[1], [0], [0], [1], [0, 0, 1, 1], [], []>} : vector<12x140xf32>, vector<140x256xf32>, vector<12x256xf32> -> vector<12x256xf32>
    %cst_46 = arith.constant dense<0.000000e+00> : vector<256xf32>
    %124 = vector.multi_reduction <add>, %123, %cst_46 [0] : vector<12x256xf32> to vector<256xf32>
    %125 = vector.shape_cast %124 : vector<256xf32> to vector<1x256xf32>
    %cst_47 = arith.constant 0.0833333358 : f32
    %126 = vector.broadcast %cst_47 : f32 to vector<1x256xf32>
    %127 = arith.mulf %125, %126 : vector<1x256xf32>
    %128 = vector.broadcast %127 : vector<1x256xf32> to vector<12x256xf32>
    %129 = arith.subf %123, %128 : vector<12x256xf32>
    %130 = arith.mulf %129, %129 : vector<12x256xf32>
    %cst_48 = arith.constant dense<0.000000e+00> : vector<256xf32>
    %131 = vector.multi_reduction <add>, %130, %cst_48 [0] : vector<12x256xf32> to vector<256xf32>
    %132 = vector.shape_cast %131 : vector<256xf32> to vector<1x256xf32>
    %cst_49 = arith.constant 0.0833333358 : f32
    %133 = vector.broadcast %cst_49 : f32 to vector<1x256xf32>
    %134 = arith.mulf %132, %133 : vector<1x256xf32>
    %c0_50 = arith.constant 0 : index
    %c0_51 = arith.constant 0 : index
    %135 = vector.load %arg11[%c0_50, %c0_51] : memref<1x256xf32, #tpu.memory_space<vmem>>, vector<1x256xf32>
    %cst_52 = arith.constant 9.99999974E-6 : f32
    %136 = vector.broadcast %cst_52 : f32 to vector<1x256xf32>
    %137 = arith.addf %134, %136 : vector<1x256xf32>
    %138 = math.rsqrt %137 : vector<1x256xf32>
    %139 = arith.mulf %135, %138 : vector<1x256xf32>
    %140 = vector.broadcast %139 : vector<1x256xf32> to vector<12x256xf32>
    %141 = arith.mulf %129, %140 : vector<12x256xf32>
    %c0_53 = arith.constant 0 : index
    %c0_54 = arith.constant 0 : index
    %142 = vector.load %arg14[%c0_53, %c0_54] : memref<1x256xf32, #tpu.memory_space<vmem>>, vector<1x256xf32>
    %143 = vector.broadcast %142 : vector<1x256xf32> to vector<12x256xf32>
    %144 = arith.addf %141, %143 : vector<12x256xf32>
    %cst_55 = arith.constant 0.000000e+00 : f32
    %145 = vector.broadcast %cst_55 : f32 to vector<12x256xf32>
    %146 = arith.cmpf oge, %144, %145 : vector<12x256xf32>
    %cst_56 = arith.constant 2.000000e-01 : f32
    %147 = vector.broadcast %cst_56 : f32 to vector<12x256xf32>
    %148 = arith.mulf %147, %144 : vector<12x256xf32>
    %149 = arith.select %146, %144, %148 : vector<12x256xi1>, vector<12x256xf32>
    %c0_57 = arith.constant 0 : index
    %c0_58 = arith.constant 0 : index
    %150 = vector.load %arg17[%c0_57, %c0_58] : memref<12x256xf32, #tpu.memory_space<vmem>>, vector<12x256xf32>
    tpu.vector_store %arg17[%c0_57, %c0_58], %149 {strides = array<i32>} : memref<12x256xf32, #tpu.memory_space<vmem>>, vector<12x256xf32>,
    %c0_59 = arith.constant 0 : index
    %c0_60 = arith.constant 0 : index
    %151 = vector.load %arg15[%c0_59, %c0_60] : memref<6x256xf32, #tpu.memory_space<vmem>>, vector<6x256xf32>
    %152 = vector.extract_strided_slice %149 {offsets = [0, 0], sizes = [6, 256], strides = [1, 1]} : vector<12x256xf32> to vector<6x256xf32>
    %153 = arith.mulf %152, %151 : vector<6x256xf32>
    %cst_61 = arith.constant dense<0.000000e+00> : vector<6xf32>
    %154 = vector.multi_reduction <add>, %153, %cst_61 [1] : vector<6x256xf32> to vector<6xf32>
    %155 = vector.shape_cast %154 : vector<6xf32> to vector<6x1xf32>
    %cst_62 = arith.constant dense<0.000000e+00> : vector<1xf32>
    %156 = vector.multi_reduction <add>, %155, %cst_62 [0] : vector<6x1xf32> to vector<1xf32>
    %157 = vector.shape_cast %156 : vector<1xf32> to vector<1x1xf32>
    %158 = vector.extract_strided_slice %149 {offsets = [6, 0], sizes = [6, 256], strides = [1, 1]} : vector<12x256xf32> to vector<6x256xf32>
    %159 = arith.mulf %158, %151 : vector<6x256xf32>
    %cst_63 = arith.constant dense<0.000000e+00> : vector<6xf32>
    %160 = vector.multi_reduction <add>, %159, %cst_63 [1] : vector<6x256xf32> to vector<6xf32>
    %161 = vector.shape_cast %160 : vector<6xf32> to vector<6x1xf32>
    %cst_64 = arith.constant dense<0.000000e+00> : vector<1xf32>
    %162 = vector.multi_reduction <add>, %161, %cst_64 [0] : vector<6x1xf32> to vector<1xf32>
    %163 = vector.shape_cast %162 : vector<1xf32> to vector<1x1xf32>
    %164 = tpu.concatenate %157, %163 in 0 : vector<1x1xf32>, vector<1x1xf32> -> vector<2x1xf32>
    %c0_65 = arith.constant 0 : index
    %c0_66 = arith.constant 0 : index
    %165 = vector.load %arg16[%c0_65, %c0_66] : memref<1x1xf32, #tpu.memory_space<vmem>>, vector<1x1xf32>
    %166 = vector.broadcast %165 : vector<1x1xf32> to vector<2x1xf32>
    %167 = arith.addf %164, %166 : vector<2x1xf32>
    %c0_67 = arith.constant 0 : index
    %c0_68 = arith.constant 0 : index
    %168 = vector.load %arg18[%c0_67, %c0_68] : memref<2x1xf32, #tpu.memory_space<vmem>>, vector<2x1xf32>
    tpu.vector_store %arg18[%c0_67, %c0_68], %167 {strides = array<i32>} : memref<2x1xf32, #tpu.memory_space<vmem>>, vector<2x1xf32>,
    return
  }
}

</mosaic_0001>

<bundles_post_ra>
// kernel: tpu_custom_call.1
= control target key start
LH: loop header
LB: loop body
LE: loop exit
PB: predicated region body
PF: predicated region fallthrough
CT: control target
= control target key end

     0   :  { %s5545_s0 = inlined_call_operand.vmem [shape: f32[124,5], index: 0, kind: input, shape index: {}]   ;;  %s5546_s1 = inlined_call_operand.hbm [shape: f32[5,32], index: 1, kind: input, shape index: {}]   ;;  %s5547_s2 = inlined_call_operand.vmem [shape: f32[1,32], index: 2, kind: input, shape index: {}]   ;;  %s5548_s3 = inlined_call_operand.vmem [shape: bf16[32,320], index: 3, kind: input, shape index: {}]   ;;  %s5549_s4 = inlined_call_operand.hbm [shape: bf16[64,640], index: 4, kind: input, shape index: {}]   ;;  %s5550_s5 = inlined_call_operand.hbm [shape: bf16[128,1280], index: 5, kind: input, shape index: {}]   ;;  %s5551_s6 = inlined_call_operand.hbm [shape: f32[60,620], index: 6, kind: input, shape index: {}]   ;;  %s5552_s7 = inlined_call_operand.vmem [shape: f32[28,300], index: 7, kind: input, shape index: {}]   ;;  %s5553_s8 = inlined_call_operand.hbm [shape: f32[12,140], index: 8, kind: input, shape index: {}]   ;;  %s5554_s9 = inlined_call_operand.hbm [shape: f32[1,64], index: 9, kind: input, shape index: {}]   ;;  %s5555_s10 = inlined_call_operand.hbm [shape: f32[1,128], index: 10, kind: input, shape index: {}]   ;;  %s5556_s11 = inlined_call_operand.hbm [shape: f32[1,256], index: 11, kind: input, shape index: {}]   ;;  %s5557_s12 = inlined_call_operand.hbm [shape: f32[1,64], index: 12, kind: input, shape index: {}]   ;;  %s5558_s13 = inlined_call_operand.hbm [shape: f32[1,128], index: 13, kind: input, shape index: {}]   ;;  %s5559_s14 = inlined_call_operand.vmem [shape: f32[1,256], index: 14, kind: input, shape index: {}]   ;;  %s5560_s15 = inlined_call_operand.vmem [shape: f32[6,256], index: 15, kind: input, shape index: {}]   ;;  %s5561_s16 = inlined_call_operand.<no memory space> [shape: f32[1,1], index: 16, kind: input, shape index: {}]   ;;  %s5562_s17 = inlined_call_operand.hbm [shape: f32[12,256], index: 17, kind: output, shape index: {0}]   ;;  %s5563_s18 = inlined_call_operand.vmem [shape: f32[2,1], index: 18, kind: output, shape index: {1}]  }
   0x1   :  { %5565 = sst [smem:[#allocation28_spill]] %s5545_s0  ;;  %v24_v0 = vstv %s5561_s16 }
   0x2   :  { %5566 = sst [smem:[#allocation29_spill]] %s5546_s1  ;;  %25 = vst [vmem:[#allocation2] sm:$0x1] %v24_v0 }
   0x3   :  { %5567 = sst [smem:[#allocation30_spill]] %s5547_s2 }
   0x4   :  { %26 = vsyncpa [#allocation4], 0 }
   0x5   :  { %27 = vsyncpa [#allocation7], 0 }
   0x6   :  { %28 = vsyncpa [#allocation10], 0 }
   0x7   :  { %29 = vsyncpa [#allocation13], 0 }
   0x8   :  { %30 = vsyncpa [#allocation16], 0 }
   0x9   :  { %31 = vsyncpa [#allocation19], 0 }
   0xa   :  { %32 = vsyncpa [#allocation5], 0  ;;  %s4472_s29 = smov [#allocation6]  }
   0xb   :  { %s54_s30 = sshll.u32 %s4472_s29, 4  ;;  %s55_s30 = int_to_ptr.vmem [resolvable:$true] %s54_s30 }
   0xc   :  { %s4246_s0 = scalar_lea.vmem %s55_s30, 2560  ;;  %p4251_p1 = scmp.lt.s32.totalorder %s55_s30, %s55_s30 }
   0xd   :  { %p4247_p0 = scmp.ne.s32.totalorder %s55_s30, %s4246_s0  ;;  %p4252_p2 = scmp.lt.s32.totalorder %s4246_s0, %s4246_s0 }
   0xf   :  { %p4253_p3 = por %p4252_p2, %p4251_p1 }
  0x11   :  { %p4254_p4 = pnand %p4253_p3, %p4247_p0 }
  0x13   :  { %4257 = shalt.err (!%p4254_p4)
}
  0x14   :  { %s4473_s19 = smov 320   ;;  %s4474_s16 = smov 20  }
  0x15   :  { %60 = dma.hbm_to_vmem [thread:$0]  %s5549_s4, 2560, %s55_s30, [#allocation7], %s4473_s19, %s4473_s19, %s4474_s16  }
  0x16   :  { %s4475_s21 = smov [#allocation9]   ;;  %s4476_s2 = smov [#allocation12]  }
  0x17   :  { %s78_s22 = sshll.u32 %s4475_s21, 4  ;;  %s105_s23 = sshll.u32 %s4476_s2, 4  ;;  %s79_s22 = int_to_ptr.vmem [resolvable:$true] %s78_s22  ;;  %s106_s23 = int_to_ptr.vmem [resolvable:$true] %s105_s23 }
  0x18   :  { %s4266_s24 = scalar_lea.vmem %s79_s22, 5120  ;;  %p4271_p6 = scmp.lt.s32.totalorder %s79_s22, %s79_s22 }
  0x19   :  { %p4267_p5 = scmp.ne.s32.totalorder %s79_s22, %s4266_s24  ;;  %p4272_p7 = scmp.lt.s32.totalorder %s4266_s24, %s4266_s24 }
  0x1b   :  { %p4273_p8 = por %p4272_p7, %p4271_p6 }
  0x1d   :  { %p4274_p9 = pnand %p4273_p8, %p4267_p5 }
  0x1f   :  { %4277 = shalt.err (!%p4274_p9)
}
  0x20   :  { %s4477_s25 = smov 640   ;;  %s4478_s26 = smov 40  }
  0x21   :  { %84 = dma.hbm_to_vmem [thread:$0]  %s5551_s6, 5120, %s79_s22, [#allocation10], %s4477_s25, %s4477_s25, %s4478_s26  }
  0x22   :  { %s4286_s4 = scalar_lea.vmem %s106_s23, 16  ;;  %s4290_s29 = scalar_lea.vmem %s106_s23, 32 }
  0x23   :  { %p4287_p10 = scmp.ne.s32.totalorder %s106_s23, %s4286_s4  ;;  %p4291_p11 = scmp.lt.s32.totalorder %s106_s23, %s106_s23 }
  0x24   :  { %p4292_p12 = scmp.lt.s32.totalorder %s4290_s29, %s4286_s4 }
  0x26   :  { %p4293_p13 = por %p4292_p12, %p4291_p11 }
  0x28   :  { %p4294_p0 = pnand %p4293_p13, %p4287_p10 }
  0x2a   :  { %4297 = shalt.err (!%p4294_p0)
}
  0x2b   :  { %108 = dma.hbm_to_vmem [thread:$0]  %s5554_s9, 16, %s106_s23, [#allocation13]  }
  0x2c   :  { %s4479_s19 = smov [#allocation15]   ;;  %s4480_s1 = smov [#allocation3]  }
  0x2d   :  { %s125_s16 = sshll.u32 %s4479_s19, 4  ;;  %s41_s20 = sshll.u32 %s4480_s1, 4  ;;  %s126_s16 = int_to_ptr.vmem [resolvable:$true] %s125_s16  ;;  %s42_s20 = int_to_ptr.vmem [resolvable:$true] %s41_s20 }
  0x2e   :  { %s4306_s21 = scalar_lea.vmem %s126_s16, 32  ;;  %p4311_p2 = scmp.lt.s32.totalorder %s126_s16, %s126_s16 }
  0x2f   :  { %p4307_p1 = scmp.ne.s32.totalorder %s126_s16, %s4306_s21  ;;  %p4312_p3 = scmp.lt.s32.totalorder %s4306_s21, %s4306_s21 }
  0x31   :  { %p4313_p4 = por %p4312_p3, %p4311_p2 }
  0x33   :  { %p4314_p5 = pnand %p4313_p4, %p4307_p1 }
  0x35   :  { %4317 = shalt.err (!%p4314_p5)
}
  0x36   :  { %128 = dma.hbm_to_vmem [thread:$0]  %s5556_s11, 32, %s126_s16, [#allocation16]  }
  0x37   :  { %s4326_s2 = scalar_lea.vmem %s42_s20, 128  ;;  %p4331_p7 = scmp.lt.s32.totalorder %s42_s20, %s42_s20 }
  0x38   :  { %p4327_p6 = scmp.ne.s32.totalorder %s42_s20, %s4326_s2  ;;  %p4332_p8 = scmp.lt.s32.totalorder %s4326_s2, %s4326_s2 }
  0x3a   :  { %p4333_p9 = por %p4332_p8, %p4331_p7 }
  0x3c   :  { %p4334_p10 = pnand %p4333_p9, %p4327_p6 }
  0x3e   :  { %4337 = shalt.err (!%p4334_p10)
}
  0x3f   :  { %s5568_s24 = sld [smem:[#allocation29_spill]]  ;;  %s4481_s27 = smov [#allocation8]  }
  0x40   :  { %s66_s28 = sshll.u32 %s4481_s27, 4  ;;  %s4482_s4 = smov [#allocation11]   ;;  %s67_s28 = int_to_ptr.vmem [resolvable:$true] %s66_s28 }
  0x41   :  { %s92_s29 = sshll.u32 %s4482_s4, 4  ;;  %s4346_s30 = scalar_lea.vmem %s67_s28, 10240  ;;  %s93_s29 = int_to_ptr.vmem [resolvable:$true] %s92_s29 }
  0x42   :  { %p4347_p11 = scmp.ne.s32.totalorder %s67_s28, %s4346_s30  ;;  %p4351_p12 = scmp.lt.s32.totalorder %s67_s28, %s67_s28 }
  0x43   :  { %p4352_p13 = scmp.lt.s32.totalorder %s4346_s30, %s4346_s30 }
  0x45   :  { %44 = dma.hbm_to_vmem [thread:$0]  %s5568_s24, 128, %s42_s20, [#allocation4]  }
  0x46   :  { %p4353_p0 = por %p4352_p13, %p4351_p12 }
  0x48   :  { %p4354_p1 = pnand %p4353_p0, %p4347_p11 }
  0x4a   :  { %4357 = shalt.err (!%p4354_p1)
}
  0x4b   :  { %72 = dma.hbm_to_vmem [thread:$0]  %s5550_s5, 10240, %s67_s28, [#allocation7], %s4477_s25, %s4477_s25, %s4478_s26  }
  0x4c   :  { %s4366_s19 = scalar_lea.vmem %s93_s29, 512  ;;  %p4371_p3 = scmp.lt.s32.totalorder %s93_s29, %s93_s29 }
  0x4d   :  { %p4367_p2 = scmp.ne.s32.totalorder %s93_s29, %s4366_s19  ;;  %p4372_p4 = scmp.lt.s32.totalorder %s4366_s19, %s4366_s19 }
  0x4f   :  { %p4373_p5 = por %p4372_p4, %p4371_p3 }
  0x51   :  { %p4374_p6 = pnand %p4373_p5, %p4367_p2 }
  0x53   :  { %4377 = shalt.err (!%p4374_p6)
}
  0x54   :  { %s4483_s16 = smov 256   ;;  %s4484_s1 = smov 16  }
  0x55   :  { %98 = dma.hbm_to_vmem [thread:$0]  %s5553_s8, 512, %s93_s29, [#allocation10], %s4483_s16, %s4483_s16, %s4484_s1  }
  0x56   :  { %s4485_s6 = smov [#allocation14]   ;;  %s4486_s5 = smov [#allocation17]  }
  0x57   :  { %s115_s22 = sshll.u32 %s4485_s6, 4  ;;  %s135_s25 = sshll.u32 %s4486_s5, 4  ;;  %s116_s22 = int_to_ptr.vmem [resolvable:$true] %s115_s22  ;;  %s136_s25 = int_to_ptr.vmem [resolvable:$true] %s135_s25 }
  0x58   :  { %s4386_s26 = scalar_lea.vmem %s116_s22, 16  ;;  %s4390_s2 = scalar_lea.vmem %s116_s22, 32 }
  0x59   :  { %p4387_p7 = scmp.ne.s32.totalorder %s116_s22, %s4386_s26  ;;  %p4391_p8 = scmp.lt.s32.totalorder %s116_s22, %s116_s22 }
  0x5a   :  { %p4392_p9 = scmp.lt.s32.totalorder %s4390_s2, %s4386_s26 }
  0x5c   :  { %p4393_p10 = por %p4392_p9, %p4391_p8 }
  0x5e   :  { %p4394_p11 = pnand %p4393_p10, %p4387_p7 }
  0x60   :  { %4397 = shalt.err (!%p4394_p11)
}
  0x61   :  { %118 = dma.hbm_to_vmem [thread:$0]  %s5555_s10, 16, %s116_s22, [#allocation13]  }
  0x62   :  { %s4406_s24 = scalar_lea.vmem %s136_s25, 16  ;;  %s4410_s8 = scalar_lea.vmem %s136_s25, 32 }
  0x63   :  { %p4407_p12 = scmp.ne.s32.totalorder %s136_s25, %s4406_s24  ;;  %p4411_p13 = scmp.lt.s32.totalorder %s136_s25, %s136_s25 }
  0x64   :  { %p4412_p0 = scmp.lt.s32.totalorder %s4410_s8, %s4406_s24 }
  0x66   :  { %p4413_p1 = por %p4412_p0, %p4411_p13 }
  0x68   :  { %p4414_p2 = pnand %p4413_p1, %p4407_p12 }
  0x6a   :  { %4417 = shalt.err (!%p4414_p2)
}
  0x6b   :  { %138 = dma.hbm_to_vmem [thread:$0]  %s5557_s12, 16, %s136_s25, [#allocation16]  }
  0x6c   :  { %s4487_s4 = smov [#allocation18]  }
  0x6d   :  { %s145_s29 = sshll.u32 %s4487_s4, 4  ;;  %s146_s29 = int_to_ptr.vmem [resolvable:$true] %s145_s29 }
  0x6e   :  { %s4426_s30 = scalar_lea.vmem %s146_s29, 16  ;;  %s4430_s11 = scalar_lea.vmem %s146_s29, 32 }
  0x6f   :  { %p4427_p3 = scmp.ne.s32.totalorder %s146_s29, %s4426_s30  ;;  %p4431_p4 = scmp.lt.s32.totalorder %s146_s29, %s146_s29 }
  0x70   :  { %p4432_p5 = scmp.lt.s32.totalorder %s4430_s11, %s4426_s30 }
  0x72   :  { %p4433_p6 = por %p4432_p5, %p4431_p4 }
  0x74   :  { %p4434_p7 = pnand %p4433_p6, %p4427_p3 }
  0x76   :  { %4437 = shalt.err (!%p4434_p7)
}
  0x77   :  { %148 = dma.hbm_to_vmem [thread:$0]  %s5558_s13, 16, %s146_s29, [#allocation19]  }
  0x78   :  { %4458 = dma.done.wait [#allocation4], 128  }
  0x79   :  { %4459 = vsyncadd [#allocation4], 4294967168 }
  0x7a   :  { %4460 = dma.done.wait [#allocation7], 12800  }
  0x7b   :  { %4461 = vsyncadd [#allocation7], 4294954496 }
  0x7c   :  { %4462 = dma.done.wait [#allocation10], 5632  }
  0x7d   :  { %4463 = vsyncadd [#allocation10], 4294961664 }
  0x7e   :  { %4464 = dma.done.wait [#allocation13], 32  }
  0x7f   :  { %4465 = vsyncadd [#allocation13], 4294967264 }
  0x80   :  { %4466 = dma.done.wait [#allocation16], 48  }
  0x81   :  { %4467 = vsyncadd [#allocation16], 4294967248 }
  0x82   :  { %4468 = dma.done.wait [#allocation19], 16  }
  0x83   :  { %4469 = vsyncadd [#allocation19], 4294967280  ;;  %v4488_v1 = vmov 1   ;;  %v4489_v2 = vmov 0   ;;  %s5569_s19 = sld [smem:[#allocation28_spill]]  ;;  %v4490_v6 = vmov 2   ;;  %v283_v44 = vlaneseq }
  0x84   :  { %4027 = vset.pattern.permute.xlu1 %v4488_v1  ;;  %4026 = vset.pattern.permute.xlu0 %v4489_v2  ;;  %v4491_v8 = vmov 3   ;;  %v4492_v10 = vmov 4   ;;  %v4074_v16 = vld [vmem:[%s5548_s3 + $0x1c] ss:$12 sps:$4 sm:$0xff]   ;;  %v4076_v17 = vld [vmem:[%s5548_s3 + $0x18] ss:$12 sps:$4 sm:$0xff]  }
  0x85   :  { %879 = vmatprep.mubr.bf16.mxu0 %v4489_v2  ;;  %v4077_v18 = vld [vmem:[%s5548_s3 + $0x20] ss:$12 sps:$4 sm:$0xff]   ;;  %859 = vmatprep.subr.bf16.mxu0 %v4074_v16  ;;  %v4078_v20 = vld [vmem:[%s5548_s3 + $0x4] ss:$12 sps:$4 sm:$0xff]   ;;  %v4081_v22 = vld [vmem:[%s5548_s3 + $0x8] ss:$12 sps:$4 sm:$0xff]  }
  0x86   :  { %860 = vmatpush1.bf16.msra.mxu0 %v4076_v17  ;;  %3908 = vmatprep.subr.bf16.mxu1 %v4077_v18  ;;  %v4080_v21 = vld [vmem:[%s5548_s3] ss:$12 sps:$4 sm:$0xff]   ;;  %v4796_v46 = vshrl.u32 %v283_v44, 7  ;;  %s5570_s12 = sld [smem:[#allocation30_spill]]  ;;  %vm822_vm3 = vcmask 261120   ;;  %s4493_s13 = smov 64  }
  0x87   :  { %3909 = vmatpush3.bf16.msra.mxu1 %v4077_v18  ;;  %861 = vmatprep.subr.bf16.mxu0 %v4078_v20  ;;  %v202_v53 = vld [vmem:[#allocation3] sm:$0x1f] }
  0x88   :  { %3910 = vmatprep.subr.bf16.mxu1 %v4081_v22  ;;  %v4802_v49 = vsub.s32 1, %v4796_v46  ;;  %v4805_v50 = vsub.s32 0, %v4796_v46  ;;  %v469_v51 = vsub.s32 2, %v4796_v46  ;;  %v569_v58 = vsub.s32 3, %v4796_v46 }
  0x89   :  { %v186_v3 = vld [vmem:[%s5569_s19] sm:$0xff]  ;;  %v187_v4 = vld [vmem:[%s5569_s19 + $0x8] sm:$0xff]  ;;  %v188_v5 = vld [vmem:[%s5569_s19 + $0x10] sm:$0xff] }
  0x8a   :  { %304 = vperm.xlu1 %4027, %v186_v3   ;;  %205 = vperm.xlu0 %4026, %v186_v3   ;;  %v189_v7 = vld [vmem:[%s5569_s19 + $0x18] sm:$0xff]  ;;  %v190_v9 = vld [vmem:[%s5569_s19 + $0x20] sm:$0xff]  ;;  %v4658_v11 = vld [vmem:[%s5569_s19 + $0x48] sm:$0xff]  ;;  %v4811_v55 = vrot.slane %v202_v53, %v4802_v49  ;;  %v4814_v56 = vrot.slane %v202_v53, %v4805_v50  ;;  %v4816_v57 = vrot.slane %v202_v53, %v469_v51 }
  0x8b   :  { %v4666_v12 = vld [vmem:[%s5569_s19 + $0x38] sm:$0xff]  ;;  %v4672_v13 = vld [vmem:[%s5569_s19 + $0x40] sm:$0xff]  ;;  %v4684_v14 = vld [vmem:[%s5569_s19 + $0x50] sm:$0xff]  ;;  %862 = vmatpush1.bf16.msra.mxu0 %v4080_v21  ;;  %3911 = vmatpush3.bf16.msra.mxu1 %v4081_v22 }
  0x8c   :  { %v191_v15 = vld [vmem:[%s5569_s19 + $0x28] sm:$0xff]  ;;  %v192_v19 = vld [vmem:[%s5569_s19 + $0x30] sm:$0xff]  ;;  %v4717_v23 = vld [vmem:[%s5569_s19 + $0x58] sm:$0xff] }
  0x8d   :  { %v4724_v24 = vld [vmem:[%s5569_s19 + $0x60] sm:$0xff]  ;;  %v4735_v25 = vld [vmem:[%s5569_s19 + $0x68] sm:$0xff]  ;;  %v4742_v26 = vld [vmem:[%s5569_s19 + $0x70] sm:$0xff] }
  0x8e   :  { %308 = vperm.xlu1 %4027, %v187_v4   ;;  %210 = vperm.xlu0 %4026, %v187_v4   ;;  %v4752_v27 = vld [vmem:[%s5569_s19 + $0x78] sm:$0xf] }
  0x92   :  { %4028 = vset.pattern.permute.xlu1 %v4490_v6  ;;  %215 = vperm.xlu0 %4026, %v188_v5  }
  0x93   :  { %408 = vperm.xlu1 %4028, %v187_v4  }
  0x96   :  { %4033 = vset.pattern.permute.xlu0 %v4488_v1 }
  0x97   :  { %4029 = vset.pattern.permute.xlu1 %v4491_v8  ;;  %316 = vperm.xlu0 %4033, %v189_v7  }
  0x98   :  { %504 = vperm.xlu1 %4029, %v186_v3  }
  0x9b   :  { %320 = vperm.xlu0 %4033, %v190_v9  }
  0x9c   :  { %4030 = vset.pattern.permute.xlu1 %v4492_v10 }
  0x9d   :  { %604 = vperm.xlu1 %4030, %v186_v3  }
  0x9f   :  { %340 = vperm.xlu0 %4033, %v4658_v11  }
  0xa1   :  { %608 = vperm.xlu1 %4030, %v187_v4  }
  0xa3   :  { %4049 = vset.pattern.permute.xlu0 %v4491_v8 }
  0xa4   :  { %508 = vperm.xlu0 %4049, %v187_v4   ;;  %v669_v4 = vsub.s32 4, %v4796_v46 }
  0xa5   :  { %4031 = vset.pattern.permute.xlu1 %v4489_v2 }
  0xa6   :  { %220 = vperm.xlu1 %4031, %v189_v7  }
  0xa8   :  { %512 = vperm.xlu0 %4049, %v188_v5  }
  0xaa   :  { %4032 = vset.pattern.permute.xlu1 %v4488_v1 }
  0xab   :  { %312 = vperm.xlu1 %4032, %v188_v5  }
  0xac   :  { %532 = vperm.xlu0 %4049, %v4666_v12  }
  0xaf   :  { %4034 = vset.pattern.permute.xlu1 %v4490_v6 }
  0xb0   :  { %412 = vperm.xlu1 %4034, %v188_v5   ;;  %536 = vperm.xlu0 %4049, %v4672_v13  }
  0xb4   :  { %416 = vperm.xlu1 %4034, %v189_v7   ;;  %4051 = vset.pattern.permute.xlu0 %v4492_v10 }
  0xb5   :  { %616 = vperm.xlu0 %4051, %v189_v7  }
  0xb8   :  { %4035 = vset.pattern.permute.xlu1 %v4491_v8 }
  0xb9   :  { %516 = vperm.xlu1 %4035, %v189_v7   ;;  %620 = vperm.xlu0 %4051, %v190_v9  }
  0xbd   :  { %4036 = vset.pattern.permute.xlu1 %v4492_v10  ;;  %640 = vperm.xlu0 %4051, %v4658_v11  }
  0xbe   :  { %612 = vperm.xlu1 %4036, %v188_v5   ;;  %v4829_v5 = vrot.slane %v202_v53, %v569_v58 }
  0xc1   :  { %644 = vperm.xlu0 %4051, %v4684_v14  }
  0xc2   :  { %4037 = vset.pattern.permute.xlu1 %v4489_v2 }
  0xc3   :  { %225 = vperm.xlu1 %4037, %v190_v9  }
  0xc5   :  { %4058 = vset.pattern.permute.xlu0 %v4490_v6 }
  0xc6   :  { %404 = vperm.xlu0 %4058, %v186_v3  }
  0xc7   :  { %230 = vperm.xlu1 %4037, %v191_v15  }
  0xca   :  { %424 = vperm.xlu0 %4058, %v191_v15  }
  0xcb   :  { %4038 = vset.pattern.permute.xlu1 %v4488_v1 }
  0xcc   :  { %324 = vperm.xlu1 %4038, %v191_v15  }
  0xce   :  { %428 = vperm.xlu0 %4058, %v192_v19  }
  0xd0   :  { %4039 = vset.pattern.permute.xlu1 %v4490_v6 }
  0xd1   :  { %420 = vperm.xlu1 %4039, %v190_v9  }
  0xd2   :  { %448 = vperm.xlu0 %4058, %v4717_v23  }
  0xd5   :  { %4040 = vset.pattern.permute.xlu1 %v4491_v8 }
  0xd6   :  { %520 = vperm.xlu1 %4040, %v190_v9   ;;  %452 = vperm.xlu0 %4058, %v4724_v24  }
  0xda   :  { %524 = vperm.xlu1 %4040, %v191_v15   ;;  %4062 = vset.pattern.permute.xlu0 %v4489_v2 }
  0xdb   :  { %240 = vperm.xlu0 %4062, %v4666_v12  }
  0xde   :  { %4041 = vset.pattern.permute.xlu1 %v4492_v10 }
  0xdf   :  { %624 = vperm.xlu1 %4041, %v191_v15   ;;  %245 = vperm.xlu0 %4062, %v4672_v13  }
  0xe3   :  { %4042 = vset.pattern.permute.xlu1 %v4489_v2  ;;  %270 = vperm.xlu0 %4062, %v4735_v25  }
  0xe4   :  { %235 = vperm.xlu1 %4042, %v192_v19  }
  0xe7   :  { %275 = vperm.xlu0 %4062, %v4742_v26  }
  0xe8   :  { %4043 = vset.pattern.permute.xlu1 %v4488_v1 }
  0xe9   :  { %328 = vperm.xlu1 %4043, %v192_v19  }
  0xeb   :  { %4066 = vset.pattern.permute.xlu0 %v4488_v1 }
  0xec   :  { %344 = vperm.xlu0 %4066, %v4684_v14  }
  0xed   :  { %332 = vperm.xlu1 %4043, %v4666_v12  }
  0xf0   :  { %364 = vperm.xlu0 %4066, %v4752_v27  }
  0xf1   :  { %4044 = vset.pattern.permute.xlu1 %v4490_v6 }
  0xf2   :  { %432 = vperm.xlu1 %4044, %v4666_v12  }
  0xf4   :  { %4069 = vset.pattern.permute.xlu0 %v4491_v8 }
  0xf5   :  { %556 = vperm.xlu0 %4069, %v4735_v25  }
  0xf6   :  { %4045 = vset.pattern.permute.xlu1 %v4491_v8 }
  0xf7   :  { %528 = vperm.xlu1 %4045, %v192_v19  }
  0xf9   :  { %560 = vperm.xlu0 %4069, %v4742_v26  }
  0xfb   :  { %4046 = vset.pattern.permute.xlu1 %v4492_v10 }
  0xfc   :  { %628 = vperm.xlu1 %4046, %v192_v19   ;;  %v4839_v19 = vrot.slane %v202_v53, %v669_v4 }
  0xfd   :  { %4073 = vset.pattern.permute.xlu0 %v4492_v10 }
  0xfe   :  { %664 = vperm.xlu0 %4073, %v4752_v27  }
 0x100   :  { %632 = vperm.xlu1 %4046, %v4666_v12  }
 0x104   :  { %4047 = vset.pattern.permute.xlu1 %v4489_v2 }
 0x105   :  { %250 = vperm.xlu1 %4047, %v4658_v11   ;;  %v4767_v28 = vpop.permute.xlu1 %304  ;;  %v4769_v29 = vpop.permute.xlu0 %205 }
 0x109   :  { %4048 = vset.pattern.permute.xlu1 %v4488_v1  ;;  %v309_v30 = vpop.permute.xlu1 %308  ;;  %v211_v31 = vpop.permute.xlu0 %210 }
 0x10a   :  { %336 = vperm.xlu1 %4048, %v4672_v13   ;;  %v372_v61 = vmul.f32 %v4811_v55, %v309_v30  ;;  %v288_v62 = vmul.f32 %v4814_v56, %v211_v31 }
 0x10d   :  { %v216_v32 = vpop.permute.xlu0 %215 }
 0x10e   :  { %4050 = vset.pattern.permute.xlu1 %v4490_v6  ;;  %v409_v33 = vpop.permute.xlu1 %408  ;;  %v289_v63 = vmul.f32 %v4814_v56, %v216_v32  ;;  %v371_v32 = vmul.f32 %v4811_v55, %v4767_v28 }
 0x10f   :  { %436 = vperm.xlu1 %4050, %v4672_v13   ;;  %v472_v3 = vmul.f32 %v4816_v57, %v409_v33  ;;  %v287_v33 = vmul.f32 %v4814_v56, %v4769_v29 }
 0x112   :  { %v317_v34 = vpop.permute.xlu0 %316 }
 0x113   :  { %440 = vperm.xlu1 %4050, %v4658_v11   ;;  %v4776_v35 = vpop.permute.xlu1 %504  ;;  %v374_v7 = vmul.f32 %v4811_v55, %v317_v34 }
 0x116   :  { %v4778_v36 = vpop.permute.xlu0 %320 }
 0x117   :  { %4052 = vset.pattern.permute.xlu1 %v4491_v8 }
 0x118   :  { %540 = vperm.xlu1 %4052, %v4658_v11   ;;  %v4782_v37 = vpop.permute.xlu1 %604 }
 0x11a   :  { %v4784_v38 = vpop.permute.xlu0 %340 }
 0x11c   :  { %4053 = vset.pattern.permute.xlu1 %v4492_v10  ;;  %v4787_v39 = vpop.permute.xlu1 %608 }
 0x11d   :  { %636 = vperm.xlu1 %4053, %v4672_v13   ;;  %v388_v13 = vadd.f32 %v372_v61, %v288_v62  ;;  %v671_v62 = vmul.f32 %v4839_v19, %v4782_v37  ;;  %v375_v37 = vmul.f32 %v4811_v55, %v4778_v36 }
 0x11f   :  { %v509_v40 = vpop.permute.xlu0 %508  ;;  %v488_v18 = vadd.f32 %v472_v3, %v388_v13 }
 0x120   :  { %v572_v15 = vmul.f32 %v4829_v5, %v509_v40 }
 0x121   :  { %4054 = vset.pattern.permute.xlu1 %v4489_v2  ;;  %v221_v41 = vpop.permute.xlu1 %220 }
 0x122   :  { %255 = vperm.xlu1 %4054, %v4684_v14   ;;  %v290_v9 = vmul.f32 %v4814_v56, %v221_v41  ;;  %v588_v34 = vadd.f32 %v572_v15, %v488_v18 }
 0x123   :  { %v513_v42 = vpop.permute.xlu0 %512 }
 0x124   :  { %v390_v20 = vadd.f32 %v374_v7, %v290_v9  ;;  %v573_v21 = vmul.f32 %v4829_v5, %v513_v42 }
 0x126   :  { %260 = vperm.xlu1 %4054, %v4717_v23   ;;  %v313_v43 = vpop.permute.xlu1 %312 }
 0x127   :  { %v4793_v45 = vpop.permute.xlu0 %532  ;;  %v373_v0 = vmul.f32 %v4811_v55, %v313_v43  ;;  %v672_v43 = vmul.f32 %v4839_v19, %v4787_v39  ;;  %v571_v39 = vmul.f32 %v4829_v5, %v4776_v35 }
 0x129   :  { %v389_v16 = vadd.f32 %v373_v0, %v289_v63  ;;  %v688_v53 = vadd.f32 %v672_v43, %v588_v34 }
 0x12a   :  { %4055 = vset.pattern.permute.xlu1 %v4488_v1 }
 0x12b   :  { %348 = vperm.xlu1 %4055, %v4717_v23   ;;  %v413_v47 = vpop.permute.xlu1 %412  ;;  %v4799_v48 = vpop.permute.xlu0 %536 }
 0x12c   :  { %v473_v11 = vmul.f32 %v4816_v57, %v413_v47 }
 0x12e   :  { %v489_v22 = vadd.f32 %v473_v11, %v389_v16 }
 0x12f   :  { %4056 = vset.pattern.permute.xlu1 %v4490_v6  ;;  %v417_v52 = vpop.permute.xlu1 %416 }
 0x130   :  { %444 = vperm.xlu1 %4056, %v4684_v14   ;;  %v617_v54 = vpop.permute.xlu0 %616  ;;  %v474_v17 = vmul.f32 %v4816_v57, %v417_v52  ;;  %v589_v51 = vadd.f32 %v573_v21, %v489_v22  ;;  %v387_v52 = vadd.f32 %v371_v32, %v287_v33 }
 0x131   :  { %v674_v44 = vmul.f32 %v4839_v19, %v617_v54 }
 0x132   :  { %v490_v40 = vadd.f32 %v474_v17, %v390_v20 }
 0x134   :  { %4057 = vset.pattern.permute.xlu1 %v4491_v8  ;;  %v517_v59 = vpop.permute.xlu1 %516  ;;  %v4820_v60 = vpop.permute.xlu0 %620 }
 0x135   :  { %544 = vperm.xlu1 %4057, %v4684_v14   ;;  %v574_v30 = vmul.f32 %v4829_v5, %v517_v59 }
 0x137   :  { %v590_v47 = vadd.f32 %v574_v30, %v490_v40 }
 0x138   :  { %v4834_v12 = vpop.permute.xlu0 %640 }
 0x139   :  { %548 = vperm.xlu1 %4057, %v4717_v23   ;;  %v613_v14 = vpop.permute.xlu1 %612  ;;  %v690_v54 = vadd.f32 %v674_v44, %v590_v47  ;;  %v675_v44 = vmul.f32 %v4839_v19, %v4820_v60 }
 0x13a   :  { %v673_v41 = vmul.f32 %v4839_v19, %v613_v14 }
 0x13c   :  { %v4843_v31 = vpop.permute.xlu0 %644  ;;  %v689_v58 = vadd.f32 %v673_v41, %v589_v51 }
 0x13d   :  { %4059 = vset.pattern.permute.xlu1 %v4492_v10 }
 0x13e   :  { %648 = vperm.xlu1 %4059, %v4717_v23   ;;  %v226_v42 = vpop.permute.xlu1 %225  ;;  %v4860_v23 = vld [vmem:[%s5570_s12] ss:$0 sm:$0xff] }
 0x13f   :  { %v711_v63 = vadd.f32 %v4860_v23, %v688_v53  ;;  %v712_v0 = vadd.f32 %v4860_v23, %v689_v58  ;;  %v713_v7 = vadd.f32 %v4860_v23, %v690_v54  ;;  %v291_v15 = vmul.f32 %v4814_v56, %v226_v42 }
 0x141   :  { %v405_v28 = vpop.permute.xlu0 %404  ;;  %v743_v11 = vmul.f32 0.2, %v711_v63  ;;  %v744_v35 = vmul.f32 0.2, %v712_v0  ;;  %vm728_vm0 = vcmp.ge.f32.partialorder %v712_v0, 0.0  ;;  %vm727_vm1 = vcmp.ge.f32.partialorder %v711_v63, 0.0 }
 0x142   :  { %v471_v29 = vmul.f32 %v4816_v57, %v405_v28  ;;  %4060 = vset.pattern.permute.xlu1 %v4489_v2  ;;  %v231_v59 = vpop.permute.xlu1 %230  ;;  %v745_v14 = vmul.f32 0.2, %v713_v7  ;;  %vm729_vm4 = vcmp.ge.f32.partialorder %v713_v7, 0.0  ;;  %v391_v32 = vadd.f32 %v375_v37, %v291_v15 }
 0x143   :  { %265 = vperm.xlu1 %4060, %v4724_v24   ;;  %v759_v21 = vsel %vm727_vm1, %v711_v63, %v743_v11  ;;  %v760_v22 = vsel %vm728_vm0, %v712_v0, %v744_v35  ;;  %v292_v47 = vmul.f32 %v4814_v56, %v231_v59  ;;  %vm1073_vm1 = vcmask 1043456  }
 0x144   :  { %v487_v61 = vadd.f32 %v471_v29, %v387_v52  ;;  %v761_v36 = vsel %vm729_vm4, %v713_v7, %v745_v14  ;;  %vm1647_vm4 = vcmask 519168  }
 0x145   :  { %v775_v40 = vpack.c.bf16 %v761_v36, %v760_v22  ;;  %v425_v41 = vpop.permute.xlu0 %424 }
 0x146   :  { %v587_v3 = vadd.f32 %v571_v39, %v487_v61  ;;  %v476_v52 = vmul.f32 %v4816_v57, %v425_v41 }
 0x147   :  { %4061 = vset.pattern.permute.xlu1 %v4488_v1  ;;  %v325_v4 = vpop.permute.xlu1 %324 }
 0x148   :  { %v687_v9 = vadd.f32 %v671_v62, %v587_v3  ;;  %352 = vperm.xlu1 %4061, %v4724_v24   ;;  %v376_v33 = vmul.f32 %v4811_v55, %v325_v4 }
 0x149   :  { %v429_v63 = vpop.permute.xlu0 %428 }
 0x14a   :  { %v710_v13 = vadd.f32 %v4860_v23, %v687_v9  ;;  %v392_v28 = vadd.f32 %v376_v33, %v292_v47 }
 0x14c   :  { %356 = vperm.xlu1 %4061, %v4735_v25   ;;  %v421_v16 = vpop.permute.xlu1 %420  ;;  %vm726_vm2 = vcmp.ge.f32.partialorder %v710_v13, 0.0  ;;  %v742_v17 = vmul.f32 0.2, %v710_v13  ;;  %v492_v39 = vadd.f32 %v476_v52, %v392_v28 }
 0x14d   :  { %v475_v18 = vmul.f32 %v4816_v57, %v421_v16  ;;  %v4901_v9 = vpop.permute.xlu0 %448 }
 0x14e   :  { %v758_v20 = vsel %vm726_vm2, %v710_v13, %v742_v17  ;;  %vm1290_vm2 = vcmask 883712  }
 0x14f   :  { %v774_v30 = vpack.c.bf16 %v759_v21, %v758_v20  ;;  %v491_v42 = vadd.f32 %v475_v18, %v391_v32  ;;  %v477_v18 = vmul.f32 %v4816_v57, %v429_v63 }
 0x150   :  { %4063 = vset.pattern.permute.xlu1 %v4490_v6 }
 0x151   :  { %456 = vperm.xlu1 %4063, %v4735_v25   ;;  %v521_v34 = vpop.permute.xlu1 %520  ;;  %3553 = vmatmul.mubr.msk.bf16.vlgmr.msra.gmra.mxu0 %vm822_vm3, %v774_v30  ;;  %v4909_v37 = vpop.permute.xlu0 %452 }
 0x152   :  { %v575_v43 = vmul.f32 %v4829_v5, %v521_v34  ;;  %3912 = vmatprep.mubr.msk.bf16.mxu1 %vm822_vm3, %v774_v30  ;;  %889 = vmatprep.mubr.bf16.mxu0 %v4489_v2  ;;  %v578_v34 = vmul.f32 %v4829_v5, %v4793_v45 }
 0x153   :  { %3913 = vmatmul.mubr.msk.bf16.vlgmr.msra.gmra.mxu1 %vm822_vm3, %v775_v40 }
 0x154   :  { %v591_v51 = vadd.f32 %v575_v43, %v491_v42 }
 0x155   :  { %4064 = vset.pattern.permute.xlu1 %v4491_v8  ;;  %v525_v53 = vpop.permute.xlu1 %524 }
 0x156   :  { %552 = vperm.xlu1 %4064, %v4724_v24   ;;  %v691_v58 = vadd.f32 %v675_v44, %v591_v51  ;;  %v576_v29 = vmul.f32 %v4829_v5, %v525_v53  ;;  %v241_v16 = vpop.permute.xlu0 %240 }
 0x157   :  { %v294_v21 = vmul.f32 %v4814_v56, %v241_v16 }
 0x158   :  { %v714_v59 = vadd.f32 %v4860_v23, %v691_v58  ;;  %v592_v54 = vadd.f32 %v576_v29, %v492_v39 }
 0x159   :  { %3554 = vmatmul.mubr.msk.bf16.gmra.mxu0 %vm822_vm3, %v775_v40 }
 0x15a   :  { %4065 = vset.pattern.permute.xlu1 %v4492_v10  ;;  %v625_v60 = vpop.permute.xlu1 %624  ;;  %899 = vmatprep.mubr.bf16.mxu0 %v4489_v2  ;;  %v746_v0 = vmul.f32 0.2, %v714_v59  ;;  %vm730_vm5 = vcmp.ge.f32.partialorder %v714_v59, 0.0 }
 0x15b   :  { %v676_v61 = vmul.f32 %v4839_v19, %v625_v60  ;;  %652 = vperm.xlu1 %4065, %v4724_v24  }
 0x15c   :  { %v762_v11 = vsel %vm730_vm5, %v714_v59, %v746_v0  ;;  %v380_v59 = vmul.f32 %v4811_v55, %v4784_v38 }
 0x15d   :  { %v692_v62 = vadd.f32 %v676_v61, %v592_v54 }
 0x15f   :  { %v715_v3 = vadd.f32 %v4860_v23, %v692_v62  ;;  %656 = vperm.xlu1 %4065, %v4735_v25   ;;  %v236_v4 = vpop.permute.xlu1 %235 }
 0x160   :  { %v293_v17 = vmul.f32 %v4814_v56, %v236_v4 }
 0x161   :  { %vm731_vm6 = vcmp.ge.f32.partialorder %v715_v3, 0.0  ;;  %v747_v7 = vmul.f32 0.2, %v715_v3 }
 0x163   :  { %4067 = vset.pattern.permute.xlu1 %v4489_v2  ;;  %v763_v35 = vsel %vm731_vm6, %v715_v3, %v747_v7 }
 0x164   :  { %280 = vperm.xlu1 %4067, %v4752_v27   ;;  %v329_v24 = vpop.permute.xlu1 %328  ;;  %v776_v13 = vpack.c.bf16 %v763_v35, %v762_v11  ;;  %v680_v35 = vmul.f32 %v4839_v19, %v4834_v12 }
 0x165   :  { %v377_v15 = vmul.f32 %v4811_v55, %v329_v24 }
 0x166   :  { %3555 = vmatmul.mubr.msk.bf16.gmra.mxu0 %vm822_vm3, %v776_v13  ;;  %3916 = vmatprep.mubr.msk.bf16.mxu1 %vm822_vm3, %v776_v13  ;;  %v579_v13 = vmul.f32 %v4829_v5, %v4799_v48 }
 0x167   :  { %909 = vmatprep.mubr.bf16.mxu0 %v4489_v2  ;;  %v393_v20 = vadd.f32 %v377_v15, %v293_v17 }
 0x168   :  { %4068 = vset.pattern.permute.xlu1 %v4488_v1  ;;  %v333_v25 = vpop.permute.xlu1 %332 }
 0x169   :  { %360 = vperm.xlu1 %4068, %v4742_v26   ;;  %v378_v1 = vmul.f32 %v4811_v55, %v333_v25  ;;  %v493_v36 = vadd.f32 %v477_v18, %v393_v20 }
 0x16b   :  { %v394_v32 = vadd.f32 %v378_v1, %v294_v21 }
 0x16d   :  { %4070 = vset.pattern.permute.xlu1 %v4490_v6  ;;  %v433_v14 = vpop.permute.xlu1 %432 }
 0x16e   :  { %460 = vperm.xlu1 %4070, %v4742_v26   ;;  %v478_v6 = vmul.f32 %v4816_v57, %v433_v14 }
 0x170   :  { %v494_v40 = vadd.f32 %v478_v6, %v394_v32 }
 0x172   :  { %464 = vperm.xlu1 %4070, %v4752_v27   ;;  %v529_v22 = vpop.permute.xlu1 %528  ;;  %v594_v51 = vadd.f32 %v578_v34, %v494_v40 }
 0x173   :  { %v577_v30 = vmul.f32 %v4829_v5, %v529_v22 }
 0x175   :  { %v593_v41 = vadd.f32 %v577_v30, %v493_v36 }
 0x176   :  { %4071 = vset.pattern.permute.xlu1 %v4491_v8 }
 0x177   :  { %564 = vperm.xlu1 %4071, %v4752_v27   ;;  %v629_v33 = vpop.permute.xlu1 %628 }
 0x178   :  { %v677_v42 = vmul.f32 %v4839_v19, %v629_v33 }
 0x17a   :  { %v693_v43 = vadd.f32 %v677_v42, %v593_v41 }
 0x17b   :  { %4072 = vset.pattern.permute.xlu1 %v4492_v10  ;;  %v633_v44 = vpop.permute.xlu1 %632 }
 0x17c   :  { %v716_v47 = vadd.f32 %v4860_v23, %v693_v43  ;;  %v678_v28 = vmul.f32 %v4839_v19, %v633_v44  ;;  %660 = vperm.xlu1 %4072, %v4742_v26   ;;  %v246_v26 = vpop.permute.xlu0 %245 }
 0x17d   :  { %v295_v63 = vmul.f32 %v4814_v56, %v246_v26 }
 0x17e   :  { %v694_v8 = vadd.f32 %v678_v28, %v594_v51  ;;  %v748_v27 = vmul.f32 0.2, %v716_v47  ;;  %vm732_vm7 = vcmp.ge.f32.partialorder %v716_v47, 0.0 }
 0x180   :  { %v717_v52 = vadd.f32 %v4860_v23, %v694_v8  ;;  %v251_v45 = vpop.permute.xlu1 %250  ;;  %v764_v58 = vsel %vm732_vm7, %v716_v47, %v748_v27  ;;  %v271_v21 = vpop.permute.xlu0 %270 }
 0x181   :  { %v296_v54 = vmul.f32 %v4814_v56, %v251_v45 }
 0x182   :  { %vm733_vm8 = vcmp.ge.f32.partialorder %v717_v52, 0.0  ;;  %v749_v53 = vmul.f32 0.2, %v717_v52 }
 0x183   :  { %v396_v4 = vadd.f32 %v380_v59, %v296_v54 }
 0x184   :  { %v765_v29 = vsel %vm733_vm8, %v717_v52, %v749_v53  ;;  %v4950_v33 = vpop.permute.xlu0 %275 }
 0x185   :  { %v337_v39 = vpop.permute.xlu1 %336  ;;  %v777_v10 = vpack.c.bf16 %v765_v29, %v764_v58  ;;  %v681_v58 = vmul.f32 %v4839_v19, %v4843_v31  ;;  %v482_v29 = vmul.f32 %v4816_v57, %v4901_v9 }
 0x186   :  { %v379_v62 = vmul.f32 %v4811_v55, %v337_v39 }
 0x187   :  { %3556 = vmatmul.mubr.msk.bf16.gmra.mxu0 %vm822_vm3, %v777_v10  ;;  %3917 = vmatmul.mubr.msk.bf16.gmra.mxu1 %vm822_vm3, %v777_v10 }
 0x188   :  { %919 = vmatprep.mubr.bf16.mxu0 %v4489_v2  ;;  %v395_v7 = vadd.f32 %v379_v62, %v295_v63  ;;  %v345_v41 = vpop.permute.xlu0 %344 }
 0x189   :  { %v381_v43 = vmul.f32 %v4811_v55, %v345_v41 }
 0x18a   :  { %v437_v60 = vpop.permute.xlu1 %436 }
 0x18b   :  { %v479_v3 = vmul.f32 %v4816_v57, %v437_v60 }
 0x18d   :  { %v495_v25 = vadd.f32 %v479_v3, %v395_v7 }
 0x18e   :  { %v441_v61 = vpop.permute.xlu1 %440 }
 0x18f   :  { %v480_v0 = vmul.f32 %v4816_v57, %v441_v61  ;;  %v595_v17 = vadd.f32 %v579_v13, %v495_v25 }
 0x191   :  { %v496_v24 = vadd.f32 %v480_v0, %v396_v4 }
 0x193   :  { %v541_v11 = vpop.permute.xlu1 %540 }
 0x194   :  { %v580_v38 = vmul.f32 %v4829_v5, %v541_v11 }
 0x196   :  { %v596_v14 = vadd.f32 %v580_v38, %v496_v24 }
 0x198   :  { %v696_v15 = vadd.f32 %v680_v35, %v596_v14  ;;  %v637_v16 = vpop.permute.xlu1 %636  ;;  %v365_v14 = vpop.permute.xlu0 %364 }
 0x199   :  { %v679_v18 = vmul.f32 %v4839_v19, %v637_v16  ;;  %v300_v16 = vmul.f32 %v4814_v56, %v271_v21 }
 0x19a   :  { %v719_v20 = vadd.f32 %v4860_v23, %v696_v15 }
 0x19b   :  { %v695_v1 = vadd.f32 %v679_v18, %v595_v17 }
 0x19c   :  { %v751_v22 = vmul.f32 0.2, %v719_v20  ;;  %vm735_vm9 = vcmp.ge.f32.partialorder %v719_v20, 0.0 }
 0x19d   :  { %v718_v12 = vadd.f32 %v4860_v23, %v695_v1  ;;  %v256_v6 = vpop.permute.xlu1 %255  ;;  %v483_v1 = vmul.f32 %v4816_v57, %v4909_v37 }
 0x19e   :  { %v767_v36 = vsel %vm735_vm9, %v719_v20, %v751_v22  ;;  %v297_v42 = vmul.f32 %v4814_v56, %v256_v6  ;;  %v557_v6 = vpop.permute.xlu0 %556 }
 0x19f   :  { %vm734_vm10 = vcmp.ge.f32.partialorder %v718_v12, 0.0  ;;  %v750_v30 = vmul.f32 0.2, %v718_v12 }
 0x1a0   :  { %v397_v51 = vadd.f32 %v381_v43, %v297_v42 }
 0x1a1   :  { %v261_v32 = vpop.permute.xlu1 %260  ;;  %v766_v48 = vsel %vm734_vm10, %v718_v12, %v750_v30 }
 0x1a2   :  { %v778_v34 = vpack.c.bf16 %v767_v36, %v766_v48  ;;  %v298_v45 = vmul.f32 %v4814_v56, %v261_v32 }
 0x1a4   :  { %3557 = vmatmul.mubr.msk.bf16.gmra.mxu0 %vm822_vm3, %v778_v34  ;;  %3920 = vmatprep.mubr.msk.bf16.mxu1 %vm822_vm3, %v778_v34  ;;  %v584_v34 = vmul.f32 %v4829_v5, %v557_v6 }
 0x1a5   :  { %929 = vmatprep.mubr.bf16.mxu0 %v4489_v2 }
 0x1a6   :  { %v349_v40 = vpop.permute.xlu1 %348 }
 0x1a7   :  { %v382_v28 = vmul.f32 %v4811_v55, %v349_v40 }
 0x1a9   :  { %v398_v39 = vadd.f32 %v382_v28, %v298_v45 }
 0x1ab   :  { %v445_v44 = vpop.permute.xlu1 %444  ;;  %v498_v59 = vadd.f32 %v482_v29, %v398_v39  ;;  %v561_v39 = vpop.permute.xlu0 %560 }
 0x1ac   :  { %v481_v47 = vmul.f32 %v4816_v57, %v445_v44 }
 0x1ae   :  { %v497_v27 = vadd.f32 %v481_v47, %v397_v51 }
 0x1b0   :  { %v545_v8 = vpop.permute.xlu1 %544 }
 0x1b1   :  { %v581_v52 = vmul.f32 %v4829_v5, %v545_v8 }
 0x1b3   :  { %v597_v53 = vadd.f32 %v581_v52, %v497_v27 }
 0x1b4   :  { %v549_v10 = vpop.permute.xlu1 %548 }
 0x1b5   :  { %v697_v60 = vadd.f32 %v681_v58, %v597_v53  ;;  %v582_v26 = vmul.f32 %v4829_v5, %v549_v10  ;;  %v386_v10 = vmul.f32 %v4811_v55, %v365_v14 }
 0x1b7   :  { %v720_v61 = vadd.f32 %v4860_v23, %v697_v60  ;;  %v598_v62 = vadd.f32 %v582_v26, %v498_v59 }
 0x1b9   :  { %v649_v54 = vpop.permute.xlu1 %648  ;;  %v752_v3 = vmul.f32 0.2, %v720_v61  ;;  %vm736_vm11 = vcmp.ge.f32.partialorder %v720_v61, 0.0 }
 0x1ba   :  { %v682_v63 = vmul.f32 %v4839_v19, %v649_v54 }
 0x1bb   :  { %v768_v7 = vsel %vm736_vm11, %v720_v61, %v752_v3  ;;  %v301_v61 = vmul.f32 %v4814_v56, %v4950_v33 }
 0x1bc   :  { %v698_v0 = vadd.f32 %v682_v63, %v598_v62  ;;  %v665_v63 = vpop.permute.xlu0 %664 }
 0x1be   :  { %v721_v4 = vadd.f32 %v4860_v23, %v698_v0  ;;  %v266_v31 = vpop.permute.xlu1 %265 }
 0x1bf   :  { %v299_v15 = vmul.f32 %v4814_v56, %v266_v31 }
 0x1c0   :  { %vm737_vm12 = vcmp.ge.f32.partialorder %v721_v4, 0.0  ;;  %v753_v9 = vmul.f32 0.2, %v721_v4 }
 0x1c2   :  { %v769_v11 = vsel %vm737_vm12, %v721_v4, %v753_v9 }
 0x1c3   :  { %v353_v35 = vpop.permute.xlu1 %352  ;;  %v779_v24 = vpack.c.bf16 %v769_v11, %v768_v7  ;;  %v686_v7 = vmul.f32 %v4839_v19, %v665_v63 }
 0x1c4   :  { %v383_v25 = vmul.f32 %v4811_v55, %v353_v35  ;;  %v585_v35 = vmul.f32 %v4829_v5, %v561_v39 }
 0x1c5   :  { %3558 = vmatmul.mubr.msk.bf16.gmra.mxu0 %vm822_vm3, %v779_v24  ;;  %3921 = vmatmul.mubr.msk.bf16.gmra.mxu1 %vm822_vm3, %v779_v24 }
 0x1c6   :  { %939 = vmatprep.mubr.bf16.mxu0 %v4489_v2  ;;  %v399_v17 = vadd.f32 %v383_v25, %v299_v15 }
 0x1c7   :  { %v357_v38 = vpop.permute.xlu1 %356 }
 0x1c8   :  { %v384_v18 = vmul.f32 %v4811_v55, %v357_v38  ;;  %v499_v32 = vadd.f32 %v483_v1, %v399_v17 }
 0x1ca   :  { %v400_v30 = vadd.f32 %v384_v18, %v300_v16 }
 0x1cc   :  { %v457_v13 = vpop.permute.xlu1 %456 }
 0x1cd   :  { %v484_v22 = vmul.f32 %v4816_v57, %v457_v13 }
 0x1cf   :  { %v500_v36 = vadd.f32 %v484_v22, %v400_v30 }
 0x1d1   :  { %v553_v20 = vpop.permute.xlu1 %552  ;;  %v600_v43 = vadd.f32 %v584_v34, %v500_v36 }
 0x1d2   :  { %v583_v12 = vmul.f32 %v4829_v5, %v553_v20 }
 0x1d4   :  { %v599_v40 = vadd.f32 %v583_v12, %v499_v32 }
 0x1d6   :  { %v653_v48 = vpop.permute.xlu1 %652 }
 0x1d7   :  { %v683_v21 = vmul.f32 %v4839_v19, %v653_v48 }
 0x1d9   :  { %v699_v41 = vadd.f32 %v683_v21, %v599_v40 }
 0x1da   :  { %v657_v42 = vpop.permute.xlu1 %656 }
 0x1db   :  { %v722_v44 = vadd.f32 %v4860_v23, %v699_v41  ;;  %v684_v37 = vmul.f32 %v4839_v19, %v657_v42 }
 0x1dd   :  { %v700_v47 = vadd.f32 %v684_v37, %v600_v43  ;;  %v754_v51 = vmul.f32 0.2, %v722_v44  ;;  %vm738_vm13 = vcmp.ge.f32.partialorder %v722_v44, 0.0 }
 0x1df   :  { %v723_v28 = vadd.f32 %v4860_v23, %v700_v47  ;;  %v281_v8 = vpop.permute.xlu1 %280  ;;  %v770_v52 = vsel %vm738_vm13, %v722_v44, %v754_v51  ;;  %vm2183_vm13 = vcmask 359424  }
 0x1e0   :  { %v302_v60 = vmul.f32 %v4814_v56, %v281_v8 }
 0x1e1   :  { %vm739_vm14 = vcmp.ge.f32.partialorder %v723_v28, 0.0  ;;  %v755_v27 = vmul.f32 0.2, %v723_v28 }
 0x1e2   :  { %v402_v0 = vadd.f32 %v386_v10, %v302_v60 }
 0x1e3   :  { %v771_v45 = vsel %vm739_vm14, %v723_v28, %v755_v27 }
 0x1e4   :  { %v361_v53 = vpop.permute.xlu1 %360  ;;  %v780_v58 = vpack.c.bf16 %v771_v45, %v770_v52 }
 0x1e5   :  { %v385_v59 = vmul.f32 %v4811_v55, %v361_v53 }
 0x1e6   :  { %3559 = vmatmul.mubr.msk.bf16.gmra.mxu0 %vm822_vm3, %v780_v58  ;;  %3924 = vmatprep.mubr.msk.bf16.mxu1 %vm822_vm3, %v780_v58 }
 0x1e7   :  { %949 = vmatprep.mubr.bf16.mxu0 %v4489_v2  ;;  %v401_v3 = vadd.f32 %v385_v59, %v301_v61 }
 0x1e9   :  { %v461_v29 = vpop.permute.xlu1 %460 }
 0x1ea   :  { %v485_v62 = vmul.f32 %v4816_v57, %v461_v29 }
 0x1ec   :  { %v501_v11 = vadd.f32 %v485_v62, %v401_v3 }
 0x1ed   :  { %v465_v26 = vpop.permute.xlu1 %464 }
 0x1ee   :  { %v486_v54 = vmul.f32 %v4816_v57, %v465_v26  ;;  %v601_v13 = vadd.f32 %v585_v35, %v501_v11 }
 0x1f0   :  { %v502_v31 = vadd.f32 %v486_v54, %v402_v0 }
 0x1f2   :  { %v565_v4 = vpop.permute.xlu1 %564 }
 0x1f3   :  { %v586_v9 = vmul.f32 %v4829_v5, %v565_v4 }
 0x1f5   :  { %v602_v55 = vadd.f32 %v586_v9, %v502_v31 }
 0x1f7   :  { %v702_v24 = vadd.f32 %v686_v7, %v602_v55  ;;  %v661_v38 = vpop.permute.xlu1 %660 }
 0x1f8   :  { %v685_v56 = vmul.f32 %v4839_v19, %v661_v38 }
 0x1f9   :  { %v725_v57 = vadd.f32 %v4860_v23, %v702_v24 }
 0x1fa   :  { %v701_v33 = vadd.f32 %v685_v56, %v601_v13 }
 0x1fb   :  { %v757_v25 = vmul.f32 0.2, %v725_v57  ;;  %vm741_vm15 = vcmp.ge.f32.partialorder %v725_v57, 0.0 }
 0x1fc   :  { %v724_v14 = vadd.f32 %v4860_v23, %v701_v33 }
 0x1fd   :  { %v773_v17 = vsel %vm741_vm15, %v725_v57, %v757_v25 }
 0x1fe   :  { %vm740_vm0 = vcmp.ge.f32.partialorder %v724_v14, 0.0  ;;  %v756_v15 = vmul.f32 0.2, %v724_v14 }
 0x200   :  { %v772_v16 = vsel %vm740_vm0, %v724_v14, %v756_v15 }
 0x201   :  { %v781_v18 = vpack.c.bf16 %v773_v17, %v772_v16 }
 0x203   :  { %3560 = vmatmul.mubr.msk.bf16.gmra.mxu0 %vm822_vm3, %v781_v18  ;;  %3925 = vmatmul.mubr.msk.bf16.gmra.mxu1 %vm822_vm3, %v781_v18  ;;  %vm1633_vm3 = vcmask 523264  }
 0x211   :  { %v5003_v5 = vpop.f32.mrf.mxu0 }
 0x212   :  { %v1074_v19 = vrot.slane %v5003_v5, 4 }
 0x213   :  { %v5006_v20 = vpop.f32.mrf.mxu1  ;;  %v883_v1 = vpop.f32.mrf.mxu0 }
 0x214   :  { %v1169_v22 = vrot.slane %v883_v1, 4  ;;  %1105 = vrot.lane.b32.xlu1 %v1074_v19, %s4493_s13  ;;  %3712 = vmatprep.subr.mxu1 %v883_v1 }
 0x215   :  { %v994_v23 = vpop.f32.mrf.mxu1  ;;  %v5011_v12 = vpop.f32.mrf.mxu0 }
 0x216   :  { %1200 = vrot.lane.b32.xlu0 %v1169_v22, %s4493_s13 }
 0x217   :  { %v5014_v6 = vpop.f32.mrf.mxu1  ;;  %v5016_v30 = vpop.f32.mrf.mxu0 }
 0x218   :  { %v1170_v32 = vrot.slane %v5016_v30, 4 }
 0x219   :  { %v997_v48 = vpop.f32.mrf.mxu1  ;;  %v5023_v34 = vpop.f32.mrf.mxu0 }
 0x21a   :  { %3768 = vmatprep.subr.mxu0 %v997_v48  ;;  %v1171_v36 = vsel %vm1073_vm1, %v1169_v22, %v1170_v32 }
 0x21b   :  { %1202 = vrot.lane.b32.xlu0 %v1171_v36, %s4493_s13  ;;  %v5025_v40 = vpop.f32.mrf.mxu0 }
 0x21d   :  { %v5027_v21 = vpop.f32.mrf.mxu0 }
 0x21f   :  { %v5029_v41 = vpop.f32.mrf.mxu0 }
 0x226   :  { %v5031_v42 = vpop.f32.mrf.mxu0 }
 0x228   :  { %v5033_v43 = vpop.f32.mrf.mxu0 }
 0x22a   :  { %v5035_v44 = vpop.f32.mrf.mxu0 }
 0x22c   :  { %v5037_v37 = vpop.f32.mrf.mxu0 }
 0x247   :  { %v5039_v47 = vpop.f32.mrf.mxu0 }
 0x249   :  { %v5041_v51 = vpop.f32.mrf.mxu0 }
 0x24b   :  { %v5043_v28 = vpop.f32.mrf.mxu0 }
 0x24c   :  { %v1087_v52 = vrot.slane %v5043_v28, 4 }
 0x24d   :  { %v5045_v8 = vpop.f32.mrf.mxu0 }
 0x264   :  { %v5047_v27 = vpop.f32.mrf.mxu0 }
 0x265   :  { %v1089_v45 = vrot.slane %v5047_v27, 4 }
 0x266   :  { %v5051_v53 = vpop.f32.mrf.mxu0 }
 0x267   :  { %v1090_v58 = vsel %vm1073_vm1, %v1087_v52, %v1089_v45 }
 0x268   :  { %1121 = vrot.lane.b32.xlu1 %v1090_v58, %s4493_s13  ;;  %v5055_v29 = vpop.f32.mrf.mxu0 }
 0x269   :  { %v1091_v39 = vrot.slane %v5055_v29, 4 }
 0x26a   :  { %v5060_v60 = vpop.f32.mrf.mxu0 }
 0x26b   :  { %v1092_v10 = vsel %vm1073_vm1, %v1089_v45, %v1091_v39  ;;  %v1085_v45 = vrot.slane %v5039_v47, 4 }
 0x26c   :  { %1123 = vrot.lane.b32.xlu1 %v1092_v10, %s4493_s13 }
 0x26d   :  { %v1088_v10 = vsel %vm1073_vm1, %v1085_v45, %v1087_v52 }
 0x285   :  { %v5062_v26 = vpop.f32.mrf.mxu0 }
 0x286   :  { %v1093_v59 = vrot.slane %v5062_v26, 4  ;;  %v1106_v15 = vpop.permute.xlu1 %1105 }
 0x287   :  { %v5065_v54 = vpop.f32.mrf.mxu0 }
 0x288   :  { %v1201_v61 = vpop.permute.xlu0 %1200  ;;  %v1094_v62 = vsel %vm1073_vm1, %v1091_v39, %v1093_v59 }
 0x289   :  { %1125 = vrot.lane.b32.xlu0 %v1094_v62, %s4493_s13  ;;  %v5069_v63 = vpop.f32.mrf.mxu0 }
 0x28a   :  { %v1095_v0 = vrot.slane %v5069_v63, 4 }
 0x28b   :  { %v5074_v31 = vpop.f32.mrf.mxu0 }
 0x28c   :  { %v1096_v3 = vsel %vm1073_vm1, %v1093_v59, %v1095_v0  ;;  %v1083_v59 = vrot.slane %v5035_v44, 4 }
 0x28d   :  { %1127 = vrot.lane.b32.xlu1 %v1096_v3, %s4493_s13  ;;  %v1203_v4 = vpop.permute.xlu0 %1202 }
 0x28e   :  { %3769 = vmatpush3.msra.mxu0 %v1203_v4  ;;  %v1086_v3 = vsel %vm1073_vm1, %v1083_v59, %v1085_v45  ;;  %v1081_v4 = vrot.slane %v5031_v42, 4  ;;  %v1178_v45 = vrot.slane %v5037_v37, 4 }
 0x28f   :  { %3770 = vmatprep.subr.mxu0 %v994_v23 }
 0x290   :  { %v1084_v52 = vsel %vm1073_vm1, %v1081_v4, %v1083_v59  ;;  %v1174_v59 = vrot.slane %v5029_v41, 4 }
 0x2a6   :  { %v5076_v9 = vpop.f32.mrf.mxu0 }
 0x2a7   :  { %v1097_v7 = vrot.slane %v5076_v9, 4 }
 0x2a8   :  { %v5079_v11 = vpop.f32.mrf.mxu0 }
 0x2a9   :  { %v1098_v35 = vsel %vm1073_vm1, %v1095_v0, %v1097_v7  ;;  %v1192_v58 = vrot.slane %v5079_v11, 4 }
 0x2aa   :  { %1129 = vrot.lane.b32.xlu0 %v1098_v35, %s4493_s13  ;;  %v5083_v55 = vpop.f32.mrf.mxu0  ;;  %v1079_v35 = vrot.slane %v5027_v21, 4 }
 0x2ab   :  { %v1099_v24 = vrot.slane %v5083_v55, 4 }
 0x2ac   :  { %v5088_v13 = vpop.f32.mrf.mxu0 }
 0x2ad   :  { %v1100_v38 = vsel %vm1073_vm1, %v1097_v7, %v1099_v24  ;;  %v1194_v17 = vrot.slane %v5088_v13, 4 }
 0x2ae   :  { %1131 = vrot.lane.b32.xlu1 %v1100_v38, %s4493_s13  ;;  %v1082_v38 = vsel %vm1073_vm1, %v1079_v35, %v1081_v4 }
 0x2af   :  { %v1195_v39 = vsel %vm1073_vm1, %v1192_v58, %v1194_v17 }
 0x2c3   :  { %v5090_v56 = vpop.f32.mrf.mxu0 }
 0x2c4   :  { %v1101_v57 = vrot.slane %v5090_v56, 4 }
 0x2c5   :  { %v5093_v33 = vpop.f32.mrf.mxu0 }
 0x2c6   :  { %v1196_v25 = vrot.slane %v5093_v33, 4  ;;  %v1102_v14 = vsel %vm1073_vm1, %v1099_v24, %v1101_v57  ;;  %v1188_v24 = vrot.slane %v5065_v54, 4 }
 0x2c7   :  { %1133 = vrot.lane.b32.xlu0 %v1102_v14, %s4493_s13  ;;  %v955_v16 = vpop.f32.mrf.mxu0  ;;  %v1251_v14 = vld [vmem:[#allocation9 + $0x8] sm:$0xff] }
 0x2c8   :  { %v1103_v18 = vrot.slane %v955_v16, 4  ;;  %v1248_v1 = vsel %vm1073_vm1, %v955_v16, %v1106_v15  ;;  %v1197_v48 = vsel %vm1073_vm1, %v1194_v17, %v1196_v25  ;;  %v1077_v15 = vrot.slane %v5023_v34, 4  ;;  %1382 = vmatprep.mubr.f32.mxu1 %v1251_v14 }
 0x2c9   :  { %v957_v22 = vpop.f32.mrf.mxu0  ;;  %3713 = vmatpush3.msra.mxu1 %v1248_v1  ;;  %v1184_v1 = vrot.slane %v5051_v53, 4 }
 0x2ca   :  { %v1249_v23 = vsel %vm1073_vm1, %v957_v22, %v1201_v61  ;;  %v1104_v36 = vsel %vm1073_vm1, %v1101_v57, %v1103_v18  ;;  %v1190_v61 = vrot.slane %v5074_v31, 4  ;;  %v1198_v62 = vrot.slane %v957_v22, 4 }
 0x2cb   :  { %1228 = vrot.lane.b32.xlu0 %v1197_v48, %s4493_s13  ;;  %1135 = vrot.lane.b32.xlu1 %v1104_v36, %s4493_s13  ;;  %v1080_v16 = vsel %vm1073_vm1, %v1077_v15, %v1079_v35  ;;  %v1075_v18 = vrot.slane %v5011_v12, 4  ;;  %v1182_v22 = vrot.slane %v5045_v8, 4  ;;  %v1180_v36 = vrot.slane %v5041_v51, 4 }
 0x2cc   :  { %3771 = vmatpush3.msra.mxu0 %v1249_v23  ;;  %v1193_v0 = vsel %vm1073_vm1, %v1190_v61, %v1192_v58  ;;  %v1199_v7 = vsel %vm1073_vm1, %v1196_v25, %v1198_v62  ;;  %v1191_v57 = vsel %vm1073_vm1, %v1188_v24, %v1190_v61  ;;  %v1186_v25 = vrot.slane %v5060_v60, 4 }
 0x2cd   :  { %v1078_v23 = vsel %vm1073_vm1, %v1075_v18, %v1077_v15  ;;  %v1076_v58 = vsel %vm1073_vm1, %v1074_v19, %v1075_v18  ;;  %v1185_v61 = vsel %vm1073_vm1, %v1182_v22, %v1184_v1  ;;  %v1172_v19 = vrot.slane %v5025_v40, 4  ;;  %v5166_v15 = vpop.f32.mrf.mxu1 }
 0x2ce   :  { %v1189_v17 = vsel %vm1073_vm1, %v1186_v25, %v1188_v24  ;;  %v1187_v48 = vsel %vm1073_vm1, %v1184_v1, %v1186_v25 }
 0x2cf   :  { %1226 = vrot.lane.b32.xlu0 %v1195_v39, %s4493_s13  ;;  %1119 = vrot.lane.b32.xlu1 %v1088_v10, %s4493_s13  ;;  %v1183_v39 = vsel %vm1073_vm1, %v1180_v36, %v1182_v22  ;;  %v1176_v10 = vrot.slane %v5033_v43, 4  ;;  %v1175_v4 = vsel %vm1073_vm1, %v1172_v19, %v1174_v59 }
 0x2d1   :  { %v1179_v62 = vsel %vm1073_vm1, %v1176_v10, %v1178_v45 }
 0x2d3   :  { %1224 = vrot.lane.b32.xlu0 %v1193_v0, %s4493_s13  ;;  %1117 = vrot.lane.b32.xlu1 %v1086_v3, %s4493_s13  ;;  %v1253_v0 = vld [vmem:[#allocation9 + $0x18] sm:$0xff]  ;;  %v1181_v3 = vsel %vm1073_vm1, %v1178_v45, %v1180_v36 }
 0x2d4   :  { %1487 = vmatprep.mubr.f32.mxu0 %v1253_v0  ;;  %v1252_v0 = vld [vmem:[#allocation9 + $0x10] sm:$0xff] }
 0x2d7   :  { %1115 = vrot.lane.b32.xlu1 %v1084_v52, %s4493_s13  ;;  %1230 = vrot.lane.b32.xlu0 %v1199_v7, %s4493_s13  ;;  %v1177_v52 = vsel %vm1073_vm1, %v1174_v59, %v1176_v10  ;;  %v1173_v7 = vsel %vm1073_vm1, %v1170_v32, %v1172_v19  ;;  %v1260_v10 = vld [vmem:[#allocation9 + $0x50] sm:$0xff]  ;;  %v1271_v19 = vld [vmem:[#allocation9 + $0xa8] sm:$0xff] }
 0x2da   :  { %v1122_v35 = vpop.permute.xlu1 %1121 }
 0x2db   :  { %1113 = vrot.lane.b32.xlu1 %v1082_v38, %s4493_s13  ;;  %1222 = vrot.lane.b32.xlu0 %v1191_v57, %s4493_s13 }
 0x2de   :  { %v1124_v24 = vpop.permute.xlu1 %1123 }
 0x2df   :  { %1111 = vrot.lane.b32.xlu1 %v1080_v16, %s4493_s13  ;;  %1220 = vrot.lane.b32.xlu0 %v1189_v17, %s4493_s13  ;;  %v5168_v17 = vpop.f32.mrf.mxu1 }
 0x2e1   :  { %v5170_v22 = vpop.f32.mrf.mxu1 }
 0x2e3   :  { %1109 = vrot.lane.b32.xlu1 %v1078_v23, %s4493_s13  ;;  %1218 = vrot.lane.b32.xlu0 %v1187_v48, %s4493_s13  ;;  %v5174_v48 = vpop.f32.mrf.mxu1 }
 0x2e5   :  { %v5177_v36 = vpop.f32.mrf.mxu1 }
 0x2e7   :  { %1107 = vrot.lane.b32.xlu1 %v1076_v58, %s4493_s13  ;;  %1214 = vrot.lane.b32.xlu0 %v1183_v39, %s4493_s13 }
 0x2eb   :  { %1216 = vrot.lane.b32.xlu1 %v1185_v61, %s4493_s13  ;;  %1210 = vrot.lane.b32.xlu0 %v1179_v62, %s4493_s13  ;;  %v1266_v61 = vld [vmem:[#allocation9 + $0x80] sm:$0xff] }
 0x2ef   :  { %1212 = vrot.lane.b32.xlu1 %v1181_v3, %s4493_s13  ;;  %1206 = vrot.lane.b32.xlu0 %v1175_v4, %s4493_s13  ;;  %v1276_v3 = vld [vmem:[#allocation9 + $0xd0] sm:$0xff]  ;;  %v1275_v4 = vld [vmem:[#allocation9 + $0xc8] sm:$0xff] }
 0x2f3   :  { %1208 = vrot.lane.b32.xlu1 %v1177_v52, %s4493_s13  ;;  %v1281_v52 = vld [vmem:[#allocation9 + $0xf8] sm:$0xff] }
 0x2f7   :  { %1204 = vrot.lane.b32.xlu1 %v1173_v7, %s4493_s13  ;;  %v1262_v7 = vld [vmem:[#allocation9 + $0x60] sm:$0xff] }
 0x2fb   :  { %v1126_v38 = vpop.permute.xlu0 %1125 }
 0x2ff   :  { %v1128_v57 = vpop.permute.xlu1 %1127 }
 0x31c   :  { %v1130_v14 = vpop.permute.xlu0 %1129 }
 0x320   :  { %v1132_v25 = vpop.permute.xlu1 %1131 }
 0x339   :  { %v1134_v16 = vpop.permute.xlu0 %1133 }
 0x33d   :  { %v1136_v18 = vpop.permute.xlu1 %1135  ;;  %v1229_v1 = vpop.permute.xlu0 %1228 }
 0x33e   :  { %3714 = vmatprep.subr.mxu1 %v1136_v18  ;;  %v1278_v18 = vld [vmem:[#allocation9 + $0xe0] sm:$0xff] }
 0x33f   :  { %3715 = vmatpush3.msra.mxu1 %v5090_v56  ;;  %v5181_v56 = vpop.f32.mrf.mxu1 }
 0x340   :  { %3716 = vmatprep.subr.mxu1 %v1134_v16  ;;  %v1272_v16 = vld [vmem:[#allocation9 + $0xb0] sm:$0xff] }
 0x341   :  { %v1120_v32 = vpop.permute.xlu1 %1119  ;;  %3717 = vmatpush3.msra.mxu1 %v5083_v55  ;;  %v1227_v23 = vpop.permute.xlu0 %1226 }
 0x342   :  { %3718 = vmatprep.subr.mxu1 %v1132_v25  ;;  %v1254_v25 = vld [vmem:[#allocation9 + $0x20] sm:$0xff] }
 0x343   :  { %3719 = vmatpush3.msra.mxu1 %v5076_v9  ;;  %v5186_v9 = vpop.f32.mrf.mxu1 }
 0x344   :  { %3720 = vmatprep.subr.mxu1 %v1130_v14  ;;  %v1285_v14 = vld [vmem:[#allocation9 + $0x118] sm:$0xf] }
 0x345   :  { %v1118_v45 = vpop.permute.xlu1 %1117  ;;  %3721 = vmatpush3.msra.mxu1 %v5069_v63  ;;  %v1225_v58 = vpop.permute.xlu0 %1224 }
 0x346   :  { %3722 = vmatprep.subr.mxu1 %v1128_v57  ;;  %v1267_v57 = vld [vmem:[#allocation9 + $0x88] sm:$0xff] }
 0x347   :  { %3723 = vmatpush3.msra.mxu1 %v5062_v26 }
 0x348   :  { %3724 = vmatprep.subr.mxu1 %v1126_v38  ;;  %v1268_v38 = vld [vmem:[#allocation9 + $0x90] sm:$0xff] }
 0x349   :  { %v1116_v55 = vpop.permute.xlu1 %1115  ;;  %3725 = vmatpush3.msra.mxu1 %v5055_v29  ;;  %v1231_v39 = vpop.permute.xlu0 %1230 }
 0x34a   :  { %3726 = vmatprep.subr.mxu1 %v1124_v24  ;;  %3772 = vmatprep.subr.mxu0 %v1231_v39  ;;  %v5192_v29 = vpop.f32.mrf.mxu1  ;;  %v1286_v24 = vld [vmem:[#allocation9 + $0x120] sm:$0xf]  ;;  %v4087_v39 = vld [vmem:[#allocation6 + $0x84] ss:$20 sps:$4 sm:$0xff]  }
 0x34b   :  { %3727 = vmatpush3.msra.mxu1 %v5047_v27  ;;  %3773 = vmatpush3.msra.mxu0 %v5093_v33 }
 0x34c   :  { %3728 = vmatprep.subr.mxu1 %v1122_v35  ;;  %3774 = vmatprep.subr.mxu0 %v1229_v1  ;;  %v1280_v35 = vld [vmem:[#allocation9 + $0xf0] sm:$0xff] }
 0x34d   :  { %v1114_v63 = vpop.permute.xlu1 %1113  ;;  %3729 = vmatpush3.msra.mxu1 %v5043_v28  ;;  %3775 = vmatpush3.msra.mxu0 %v5088_v13  ;;  %v1223_v26 = vpop.permute.xlu0 %1222  ;;  %v1264_v1 = vld [vmem:[#allocation9 + $0x70] sm:$0xff] }
 0x34e   :  { %3730 = vmatprep.subr.mxu1 %v1120_v32  ;;  %3776 = vmatprep.subr.mxu0 %v1227_v23  ;;  %v3926_v28 = vpop.f32.mrf.mxu1  ;;  %v1283_v32 = vld [vmem:[#allocation9 + $0x108] sm:$0xff]  ;;  %v1274_v23 = vld [vmem:[#allocation9 + $0xc0] sm:$0xff] }
 0x34f   :  { %3731 = vmatpush3.msra.mxu1 %v5039_v47  ;;  %3777 = vmatpush3.msra.mxu0 %v5079_v11 }
 0x350   :  { %3732 = vmatprep.subr.mxu1 %v1118_v45  ;;  %3778 = vmatprep.subr.mxu0 %v1225_v58  ;;  %v1284_v45 = vld [vmem:[#allocation9 + $0x110] sm:$0xff]  ;;  %v1287_v58 = vld [vmem:[#allocation9 + $0x128] sm:$0xf] }
 0x351   :  { %v1112_v27 = vpop.permute.xlu1 %1111  ;;  %3733 = vmatpush3.msra.mxu1 %v5035_v44  ;;  %3779 = vmatpush3.msra.mxu0 %v5074_v31  ;;  %v1221_v33 = vpop.permute.xlu0 %1220 }
 0x352   :  { %3734 = vmatprep.subr.mxu1 %v1116_v55  ;;  %3780 = vmatprep.subr.mxu0 %v1223_v26  ;;  %v1042_v44 = vpop.f32.mrf.mxu1  ;;  %v4084_v55 = vld [vmem:[#allocation6 + $0x7c] ss:$20 sps:$4 sm:$0xff]   ;;  %v4090_v26 = vld [vmem:[#allocation6 + $0x54] ss:$20 sps:$4 sm:$0xff]  }
 0x353   :  { %3735 = vmatpush3.msra.mxu1 %v5031_v42  ;;  %3781 = vmatpush3.msra.mxu0 %v5065_v54  ;;  %v1250_v42 = vld [vmem:[#allocation9] sm:$0xff]  ;;  %v1256_v54 = vld [vmem:[#allocation9 + $0x30] sm:$0xff] }
 0x354   :  { %3736 = vmatprep.subr.mxu1 %v1114_v63  ;;  %3782 = vmatprep.subr.mxu0 %v1221_v33  ;;  %v3927_v13 = vpop.f32.mrf.mxu1  ;;  %v4085_v63 = vld [vmem:[#allocation6 + $0x80] ss:$20 sps:$4 sm:$0xff]   ;;  %v4091_v33 = vld [vmem:[#allocation6 + $0x58] ss:$20 sps:$4 sm:$0xff]  }
 0x355   :  { %v1110_v47 = vpop.permute.xlu1 %1109  ;;  %3737 = vmatpush3.msra.mxu1 %v5027_v21  ;;  %3783 = vmatpush3.msra.mxu0 %v5060_v60  ;;  %v1219_v11 = vpop.permute.xlu0 %1218 }
 0x356   :  { %3738 = vmatprep.subr.mxu1 %v1112_v27  ;;  %3784 = vmatprep.subr.mxu0 %v1219_v11  ;;  %v4088_v27 = vld [vmem:[#allocation6 + $0x50] ss:$20 sps:$4 sm:$0xff]  }
 0x357   :  { %3739 = vmatpush3.msra.mxu1 %v5023_v34  ;;  %3785 = vmatpush3.msra.mxu0 %v5051_v53  ;;  %v1255_v34 = vld [vmem:[#allocation9 + $0x28] sm:$0xff]  ;;  %v1261_v53 = vld [vmem:[#allocation9 + $0x58] sm:$0xff] }
 0x358   :  { %3740 = vmatprep.subr.mxu1 %v1110_v47  ;;  %v4099_v47 = vld [vmem:[#allocation6 + $0x34] ss:$20 sps:$4 sm:$0xff]  }
 0x359   :  { %v1108_v31 = vpop.permute.xlu1 %1107  ;;  %3741 = vmatpush3.msra.mxu1 %v5011_v12  ;;  %v1215_v21 = vpop.permute.xlu0 %1214 }
 0x35a   :  { %3742 = vmatprep.subr.mxu1 %v1108_v31  ;;  %v1045_v12 = vpop.f32.mrf.mxu1  ;;  %v4097_v31 = vld [vmem:[#allocation6 + $0x30] ss:$20 sps:$4 sm:$0xff]  }
 0x35b   :  { %3743 = vmatpush3.msra.mxu1 %v5003_v5 }
 0x35c   :  { %1383 = vmatmul.mubr.f32.vlgmr.msra.gmra.mxu1 %v1250_v42  ;;  %3928 = vmatprep.subr.msk.mxu1 %vm1073_vm1, %v3927_v13 }
 0x35d   :  { %v1217_v60 = vpop.permute.xlu1 %1216  ;;  %3929 = vmatpush3.msk.msra.mxu1 %vm1073_vm1, %v3927_v13  ;;  %1387 = vmatprep.mubr.f32.mxu1 %v1256_v54  ;;  %v1211_v59 = vpop.permute.xlu0 %1210  ;;  %v4100_v54 = vld [vmem:[#allocation6] ss:$20 sps:$4 sm:$0xff]   ;;  %v4102_v13 = vld [vmem:[#allocation6 + $0x4] ss:$20 sps:$4 sm:$0xff]  }
 0x35e   :  { %3786 = vmatprep.subr.mxu0 %v1217_v60  ;;  %3930 = vmatprep.subr.mxu1 %v3926_v28  ;;  %v4105_v60 = vld [vmem:[#allocation6 + $0xc] ss:$20 sps:$4 sm:$0xff]  }
 0x35f   :  { %3787 = vmatpush3.msra.mxu0 %v5045_v8  ;;  %3931 = vmatpush3.msra.mxu1 %v3926_v28  ;;  %v4096_v28 = vld [vmem:[#allocation6 + $0x2c] ss:$20 sps:$4 sm:$0xff]  }
 0x360   :  { %1388 = vmatmul.mubr.f32.gmra.mxu1 %v1255_v34  ;;  %3788 = vmatprep.subr.mxu0 %v1215_v21  ;;  %v4103_v21 = vld [vmem:[#allocation6 + $0x8] ss:$20 sps:$4 sm:$0xff]  }
 0x361   :  { %3932 = vmatprep.subr.mxu1 %v1045_v12  ;;  %v1213_v5 = vpop.permute.xlu1 %1212  ;;  %3789 = vmatpush3.msra.mxu0 %v5041_v51  ;;  %v1265_v51 = vld [vmem:[#allocation9 + $0x78] sm:$0xff]  ;;  %v1207_v62 = vpop.permute.xlu0 %1206 }
 0x362   :  { %3933 = vmatpush3.msra.mxu1 %v1045_v12  ;;  %3790 = vmatprep.subr.mxu0 %v1213_v5 }
 0x363   :  { %3934 = vmatprep.subr.mxu1 %v1042_v44  ;;  %1392 = vmatprep.mubr.f32.mxu1 %v1261_v53 }
 0x364   :  { %3791 = vmatpush3.msra.mxu0 %v5037_v37  ;;  %3935 = vmatpush3.msra.mxu1 %v1042_v44  ;;  %v4094_v44 = vld [vmem:[#allocation6 + $0x28] ss:$20 sps:$4 sm:$0xff]  }
 0x365   :  { %1393 = vmatmul.mubr.f32.gmra.mxu1 %v1260_v10  ;;  %3792 = vmatprep.subr.mxu0 %v1211_v59  ;;  %v1209_v8 = vpop.permute.xlu1 %1208 }
 0x366   :  { %3936 = vmatprep.subr.mxu1 %v5186_v9  ;;  %3793 = vmatpush3.msra.mxu0 %v5033_v43  ;;  %v1270_v43 = vld [vmem:[#allocation9 + $0xa0] sm:$0xff] }
 0x367   :  { %3937 = vmatpush3.msra.mxu1 %v5186_v9  ;;  %3794 = vmatprep.subr.mxu0 %v1209_v8  ;;  %v4082_v9 = vld [vmem:[#allocation6 + $0x78] ss:$20 sps:$4 sm:$0xff]  }
 0x368   :  { %3938 = vmatprep.subr.mxu1 %v5177_v36  ;;  %1397 = vmatprep.mubr.f32.mxu1 %v1266_v61 }
 0x369   :  { %3795 = vmatpush3.msra.mxu0 %v5029_v41  ;;  %3939 = vmatpush3.msra.mxu1 %v5177_v36  ;;  %v1205_v37 = vpop.permute.xlu1 %1204  ;;  %v1258_v41 = vld [vmem:[#allocation9 + $0x40] sm:$0xff]  ;;  %v1288_v36 = vld [vmem:[#allocation9 + $0x130] sm:$0xf] }
 0x36a   :  { %1398 = vmatmul.mubr.f32.gmra.mxu1 %v1265_v51  ;;  %3796 = vmatprep.subr.mxu0 %v1207_v62 }
 0x36b   :  { %3940 = vmatprep.subr.mxu1 %v5192_v29  ;;  %3797 = vmatpush3.msra.mxu0 %v5025_v40  ;;  %v1257_v40 = vld [vmem:[#allocation9 + $0x38] sm:$0xff] }
 0x36c   :  { %3941 = vmatpush3.msra.mxu1 %v5192_v29  ;;  %3798 = vmatprep.subr.mxu0 %v1205_v37  ;;  %v4093_v29 = vld [vmem:[#allocation6 + $0x5c] ss:$20 sps:$4 sm:$0xff]  }
 0x36d   :  { %3942 = vmatprep.subr.mxu1 %v5181_v56  ;;  %1402 = vmatprep.mubr.f32.mxu1 %v1271_v19 }
 0x36e   :  { %3799 = vmatpush3.msra.mxu0 %v5016_v30  ;;  %3943 = vmatpush3.msra.mxu1 %v5181_v56  ;;  %v1263_v30 = vld [vmem:[#allocation9 + $0x68] sm:$0xff]  ;;  %v1289_v56 = vld [vmem:[#allocation9 + $0x138] sm:$0xf] }
 0x36f   :  { %1403 = vmatmul.mubr.f32.gmra.mxu1 %v1270_v43  ;;  %1488 = vmatmul.mubr.f32.vlgmr.msra.gmra.mxu0 %v1252_v0  ;;  %v5243_v43 = vld [vmem:[#allocation6 + $0x88] ss:$20 sps:$4 sm:$0xff]  }
 0x370   :  { %3944 = vmatprep.subr.mxu1 %v5170_v22  ;;  %1407 = vmatprep.mubr.f32.mxu1 %v1276_v3 }
 0x371   :  { %3945 = vmatpush3.msra.mxu1 %v5170_v22  ;;  %1492 = vmatprep.mubr.f32.mxu0 %v1258_v41  ;;  %v1269_v22 = vld [vmem:[#allocation9 + $0x98] sm:$0xff] }
 0x372   :  { %3946 = vmatprep.subr.mxu1 %v5166_v15  ;;  %1977 = vmatprep.subr.bf16.mxu0 %v4087_v39 }
 0x373   :  { %3947 = vmatpush3.msra.mxu1 %v5166_v15  ;;  %1493 = vmatmul.mubr.f32.gmra.mxu0 %v1257_v40  ;;  %v1273_v15 = vld [vmem:[#allocation9 + $0xb8] sm:$0xff] }
 0x374   :  { %1408 = vmatmul.mubr.f32.gmra.mxu1 %v1275_v4  ;;  %3948 = vmatprep.subr.mxu1 %v5174_v48 }
 0x375   :  { %3949 = vmatpush3.msra.mxu1 %v5174_v48  ;;  %1412 = vmatprep.mubr.f32.mxu1 %v1281_v52  ;;  %v1279_v48 = vld [vmem:[#allocation9 + $0xe8] sm:$0xff] }
 0x376   :  { %3950 = vmatprep.subr.mxu1 %v5168_v17  ;;  %1497 = vmatprep.mubr.f32.mxu0 %v1263_v30 }
 0x377   :  { %3951 = vmatpush3.msra.mxu1 %v5168_v17  ;;  %1498 = vmatmul.mubr.f32.gmra.mxu0 %v1262_v7  ;;  %v1259_v17 = vld [vmem:[#allocation9 + $0x48] sm:$0xff] }
 0x378   :  { %1413 = vmatmul.mubr.f32.gmra.mxu1 %v1280_v35  ;;  %3952 = vmatprep.subr.mxu1 %v5014_v6 }
 0x379   :  { %3953 = vmatpush3.msra.mxu1 %v5014_v6  ;;  %1417 = vmatprep.mubr.f32.mxu1 %v1286_v24  ;;  %v1277_v6 = vld [vmem:[#allocation9 + $0xd8] sm:$0xff] }
 0x37a   :  { %3954 = vmatprep.subr.mxu1 %v5006_v20  ;;  %1502 = vmatprep.mubr.f32.mxu0 %v1268_v38 }
 0x37b   :  { %3955 = vmatpush3.msra.mxu1 %v5006_v20  ;;  %1503 = vmatmul.mubr.f32.gmra.mxu0 %v1267_v57  ;;  %v1282_v20 = vld [vmem:[#allocation9 + $0x100] sm:$0xff] }
 0x37c   :  { %1418 = vmatmul.mubr.f32.gmra.mxu1 %v1285_v14  ;;  %1507 = vmatprep.mubr.f32.mxu0 %v1273_v15 }
 0x37d   :  { %3956 = vmatprep.mubr.msk.f32.mxu1 %vm1290_vm2, %v1254_v25  ;;  %1904 = vmatprep.subr.bf16.mxu1 %v4084_v55 }
 0x37e   :  { %1978 = vmatpush1.bf16.msra.mxu0 %v4085_v63 }
 0x37f   :  { %1508 = vmatmul.mubr.f32.gmra.mxu0 %v1272_v16  ;;  %1979 = vmatprep.subr.bf16.mxu0 %v4093_v29 }
 0x380   :  { %3957 = vmatmul.mubr.msk.f32.vlgmr.msra.gmra.mxu1 %vm1290_vm2, %v1259_v17  ;;  %1512 = vmatprep.mubr.f32.mxu0 %v1278_v18 }
 0x381   :  { %3959 = vmatprep.mubr.msk.f32.mxu1 %vm1290_vm2, %v1264_v1  ;;  %1905 = vmatpush1.bf16.msra.mxu1 %v4082_v9 }
 0x382   :  { %1906 = vmatprep.subr.bf16.mxu1 %v4090_v26  ;;  %1980 = vmatpush1.bf16.msra.mxu0 %v4091_v33 }
 0x383   :  { %1513 = vmatmul.mubr.f32.gmra.mxu0 %v1277_v6  ;;  %1981 = vmatprep.subr.bf16.mxu0 %v4099_v47 }
 0x384   :  { %3960 = vmatmul.mubr.msk.f32.gmra.mxu1 %vm1290_vm2, %v1269_v22  ;;  %1517 = vmatprep.mubr.f32.mxu0 %v1283_v32 }
 0x385   :  { %3962 = vmatprep.mubr.msk.f32.mxu1 %vm1290_vm2, %v1274_v23  ;;  %1907 = vmatpush1.bf16.msra.mxu1 %v4088_v27 }
 0x386   :  { %1908 = vmatprep.subr.bf16.mxu1 %v4096_v28  ;;  %1982 = vmatpush1.bf16.msra.mxu0 %v4097_v31 }
 0x387   :  { %1518 = vmatmul.mubr.f32.gmra.mxu0 %v1282_v20  ;;  %1983 = vmatprep.subr.bf16.mxu0 %v4105_v60 }
 0x388   :  { %3963 = vmatmul.mubr.msk.f32.gmra.mxu1 %vm1290_vm2, %v1279_v48  ;;  %1522 = vmatprep.mubr.f32.mxu0 %v1288_v36 }
 0x389   :  { %3965 = vmatprep.mubr.msk.f32.mxu1 %vm1290_vm2, %v1284_v45  ;;  %1909 = vmatpush1.bf16.msra.mxu1 %v4094_v44 }
 0x38a   :  { %1910 = vmatprep.subr.bf16.mxu1 %v4102_v13  ;;  %1984 = vmatpush1.bf16.msra.mxu0 %v4103_v21 }
 0x38b   :  { %1523 = vmatmul.mubr.f32.gmra.mxu0 %v1287_v58 }
 0x38c   :  { %3966 = vmatmul.mubr.msk.f32.gmra.mxu1 %vm1290_vm2, %v1289_v56  ;;  %2001 = vmatprep.mubr.bf16.mxu0 %v4489_v2 }
 0x38d   :  { %1928 = vmatprep.mubr.bf16.mxu1 %v4489_v2  ;;  %1911 = vmatpush1.bf16.msra.mxu1 %v4100_v54 }
 0x38e   :  { %3968 = vmatprep.subr.bf16.mxu1 %v5243_v43 }
 0x41c   :  { %v3744_v11 = vpop.f32.mrf.mxu1 }
 0x41e   :  { %v3745_v42 = vpop.f32.mrf.mxu1 }
 0x41f   :  { %v3746_v14 = vadd.f32 %v3745_v42, %v3744_v11 }
 0x420   :  { %v3747_v34 = vpop.f32.mrf.mxu1 }
 0x422   :  { %v3748_v12 = vpop.f32.mrf.mxu1 }
 0x423   :  { %v3749_v15 = vadd.f32 %v3748_v12, %v3747_v34 }
 0x425   :  { %v3750_v53 = vpop.f32.mrf.mxu1 }
 0x427   :  { %v3751_v5 = vpop.f32.mrf.mxu1 }
 0x428   :  { %v3752_v23 = vadd.f32 %v3751_v5, %v3750_v53 }
 0x42a   :  { %v3753_v10 = vpop.f32.mrf.mxu1 }
 0x42c   :  { %v3754_v59 = vpop.f32.mrf.mxu1 }
 0x42d   :  { %v3755_v20 = vadd.f32 %v3754_v59, %v3753_v10 }
 0x42f   :  { %v3756_v8 = vpop.f32.mrf.mxu1  ;;  %v3800_v61 = vpop.f32.mrf.mxu0 }
 0x431   :  { %v3757_v51 = vpop.f32.mrf.mxu1  ;;  %v3801_v62 = vpop.f32.mrf.mxu0 }
 0x432   :  { %v3802_v35 = vadd.f32 %v3801_v62, %v3800_v61  ;;  %v3758_v33 = vadd.f32 %v3757_v51, %v3756_v8 }
 0x433   :  { %v3803_v37 = vpop.f32.mrf.mxu0 }
 0x434   :  { %v3759_v19 = vpop.f32.mrf.mxu1  ;;  %v1490_v22 = vadd.f32 %v3802_v35, %v3746_v14 }
 0x435   :  { %v3804_v0 = vpop.f32.mrf.mxu0 }
 0x436   :  { %v3760_v3 = vpop.f32.mrf.mxu1  ;;  %v3805_v24 = vadd.f32 %v3804_v0, %v3803_v37 }
 0x437   :  { %v3806_v41 = vpop.f32.mrf.mxu0  ;;  %v3761_v26 = vadd.f32 %v3760_v3, %v3759_v19 }
 0x438   :  { %v3762_v40 = vpop.f32.mrf.mxu1  ;;  %v1495_v1 = vadd.f32 %v3805_v24, %v3749_v15 }
 0x439   :  { %v3807_v4 = vpop.f32.mrf.mxu0 }
 0x43a   :  { %v3763_v52 = vpop.f32.mrf.mxu1  ;;  %v3808_v17 = vadd.f32 %v3807_v4, %v3806_v41 }
 0x43b   :  { %v3809_v30 = vpop.f32.mrf.mxu0  ;;  %v3764_v34 = vadd.f32 %v3763_v52, %v3762_v40 }
 0x43c   :  { %v3765_v7 = vpop.f32.mrf.mxu1  ;;  %v1500_v63 = vadd.f32 %v3808_v17, %v3752_v23 }
 0x43d   :  { %v3810_v38 = vpop.f32.mrf.mxu0 }
 0x43e   :  { %v3766_v57 = vpop.f32.mrf.mxu1  ;;  %v3811_v18 = vadd.f32 %v3810_v38, %v3809_v30 }
 0x43f   :  { %v3812_v25 = vpop.f32.mrf.mxu0  ;;  %v3767_v3 = vadd.f32 %v3766_v57, %v3765_v7 }
 0x440   :  { %v3958_v16 = vpop.f32.mrf.mxu1  ;;  %v1505_v39 = vadd.f32 %v3811_v18, %v3755_v20 }
 0x441   :  { %v3813_v6 = vpop.f32.mrf.mxu0  ;;  %v1600_v48 = vadd.f32 %v3958_v16, %v1495_v1 }
 0x442   :  { %v1594_v32 = vpop.f32.mrf.mxu1  ;;  %v3814_v56 = vadd.f32 %v3813_v6, %v3812_v25 }
 0x443   :  { %v1595_v36 = vadd.f32 %v1594_v32, %v1490_v22  ;;  %v3815_v45 = vpop.f32.mrf.mxu0  ;;  %v1635_v28 = vsel %vm1633_vm3, %v1600_v48, 0.0 }
 0x444   :  { %v3961_v58 = vpop.f32.mrf.mxu1  ;;  %v1510_v60 = vadd.f32 %v3814_v56, %v3758_v33 }
 0x445   :  { %v1634_v55 = vsel %vm1633_vm3, %v1595_v36, 0.0  ;;  %v3816_v9 = vpop.f32.mrf.mxu0  ;;  %v1610_v47 = vadd.f32 %v3961_v58, %v1505_v39 }
 0x446   :  { %v3817_v29 = vadd.f32 %v3816_v9, %v3815_v45  ;;  %v1604_v27 = vpop.f32.mrf.mxu1  ;;  %v1636_v31 = vadd.f32 %v1635_v28, %v1634_v55 }
 0x447   :  { %v1605_v11 = vadd.f32 %v1604_v27, %v1500_v63  ;;  %v3818_v44 = vpop.f32.mrf.mxu0  ;;  %v1639_v10 = vsel %vm1633_vm3, %v1610_v47, 0.0 }
 0x448   :  { %v1515_v42 = vadd.f32 %v3817_v29, %v3761_v26  ;;  %v3964_v54 = vpop.f32.mrf.mxu1 }
 0x449   :  { %v1637_v13 = vsel %vm1633_vm3, %v1605_v11, 0.0  ;;  %v3819_v21 = vpop.f32.mrf.mxu0 }
 0x44a   :  { %v1638_v12 = vadd.f32 %v1637_v13, %v1636_v31  ;;  %v3820_v53 = vadd.f32 %v3819_v21, %v3818_v44  ;;  %v1614_v5 = vpop.f32.mrf.mxu1  ;;  %v1620_v59 = vadd.f32 %v3964_v54, %v1515_v42 }
 0x44b   :  { %v1615_v8 = vadd.f32 %v1614_v5, %v1510_v60  ;;  %v3821_v61 = vpop.f32.mrf.mxu0 }
 0x44c   :  { %v1640_v51 = vadd.f32 %v1639_v10, %v1638_v12  ;;  %v3967_v62 = vpop.f32.mrf.mxu1  ;;  %v1520_v37 = vadd.f32 %v3820_v53, %v3764_v34  ;;  %v1643_v40 = vsel %vm1633_vm3, %v1620_v59, 0.0 }
 0x44d   :  { %v1641_v19 = vsel %vm1633_vm3, %v1615_v8, 0.0  ;;  %v3822_v0 = vpop.f32.mrf.mxu0 }
 0x44e   :  { %v1642_v41 = vadd.f32 %v1641_v19, %v1640_v51  ;;  %v3823_v4 = vadd.f32 %v3822_v0, %v3821_v61  ;;  %v1624_v30 = vpop.f32.mrf.mxu1 }
 0x44f   :  { %v1625_v52 = vadd.f32 %v1624_v30, %v1520_v37 }
 0x450   :  { %v1525_v35 = vadd.f32 %v3823_v4, %v3767_v3  ;;  %v1644_v24 = vadd.f32 %v1643_v40, %v1642_v41  ;;  %v1695_v3 = vld [vmem:[#allocation12] sm:$0x1]  ;;  %v3578_v40 = vld [vmem:[#allocation17] ss:$0 sm:$0xff] }
 0x451   :  { %v1645_v38 = vsel %vm1633_vm3, %v1625_v52, 0.0 }
 0x452   :  { %v1630_v14 = vadd.f32 %v3967_v62, %v1525_v35  ;;  %v1646_v15 = vadd.f32 %v1645_v38, %v1644_v24 }
 0x454   :  { %v1648_v25 = vsel %vm1647_vm4, %v1630_v14, 0.0 }
 0x455   :  { %v1649_v16 = vadd.f32 %v1648_v25, %v1646_v15 }
 0x457   :  { %v1650_v17 = vrot.slane %v1649_v16, 4 }
 0x459   :  { %v1651_v18 = vadd.f32 %v1650_v17, %v1649_v16 }
 0x45b   :  { %v1652_v1 = vrot.slane %v1651_v18, 2 }
 0x45d   :  { %v1653_v7 = vadd.f32 %v1652_v1, %v1651_v18 }
 0x45f   :  { %v1654_v57 = vrot.slane %v1653_v7, 1 }
 0x461   :  { %v1655_v6 = vadd.f32 %v1654_v57, %v1653_v7 }
 0x463   :  { %v1656_v22 = vmul.f32 0.016666668, %v1655_v6 }
 0x465   :  { %v1657_v32 = vsub.f32 %v1595_v36, %v1656_v22  ;;  %v1658_v23 = vsub.f32 %v1600_v48, %v1656_v22  ;;  %v1659_v20 = vsub.f32 %v1605_v11, %v1656_v22  ;;  %v1660_v45 = vsub.f32 %v1610_v47, %v1656_v22 }
 0x466   :  { %v1661_v58 = vsub.f32 %v1615_v8, %v1656_v22  ;;  %v5254_v9 = vsub.f32 %v1620_v59, %v1656_v22  ;;  %v1663_v33 = vsub.f32 %v1625_v52, %v1656_v22  ;;  %v1664_v48 = vsub.f32 %v1630_v14, %v1656_v22 }
 0x467   :  { %v1665_v56 = vmul.f32 %v1657_v32, %v1657_v32  ;;  %v1666_v55 = vmul.f32 %v1658_v23, %v1658_v23  ;;  %v1667_v39 = vmul.f32 %v1659_v20, %v1659_v20  ;;  %v1668_v63 = vmul.f32 %v1660_v45, %v1660_v45 }
 0x468   :  { %v1669_v28 = vmul.f32 %v1661_v58, %v1661_v58  ;;  %v1670_v47 = vmul.f32 %v5254_v9, %v5254_v9  ;;  %v1671_v42 = vmul.f32 %v1663_v33, %v1663_v33  ;;  %v1672_v21 = vmul.f32 %v1664_v48, %v1664_v48 }
 0x469   :  { %v1673_v26 = vsel %vm1633_vm3, %v1665_v56, 0.0  ;;  %v1674_v29 = vsel %vm1633_vm3, %v1666_v55, 0.0  ;;  %v1676_v44 = vsel %vm1633_vm3, %v1667_v39, 0.0  ;;  %v1678_v11 = vsel %vm1633_vm3, %v1668_v63, 0.0 }
 0x46a   :  { %v1675_v27 = vadd.f32 %v1674_v29, %v1673_v26  ;;  %v1680_v54 = vsel %vm1633_vm3, %v1669_v28, 0.0  ;;  %v1682_v60 = vsel %vm1633_vm3, %v1670_v47, 0.0  ;;  %v1684_v12 = vsel %vm1633_vm3, %v1671_v42, 0.0 }
 0x46b   :  { %v1686_v5 = vsel %vm1647_vm4, %v1672_v21, 0.0  ;;  %v2173_v21 = vld [vmem:[%s5552_s7 + $0x10] sm:$0xff] }
 0x46c   :  { %v1677_v36 = vadd.f32 %v1676_v44, %v1675_v27 }
 0x46e   :  { %v1679_v31 = vadd.f32 %v1678_v11, %v1677_v36  ;;  %v4108_v36 = vld [vmem:[#allocation6 + $0x38] ss:$20 sps:$4 sm:$0xff]  }
 0x470   :  { %v1681_v13 = vadd.f32 %v1680_v54, %v1679_v31  ;;  %v4109_v31 = vld [vmem:[#allocation6 + $0x10] ss:$20 sps:$4 sm:$0xff]  }
 0x472   :  { %v1683_v34 = vadd.f32 %v1682_v60, %v1681_v13  ;;  %v2172_v13 = vld [vmem:[%s5552_s7 + $0x8] sm:$0xff] }
 0x474   :  { %v1685_v53 = vadd.f32 %v1684_v12, %v1683_v34 }
 0x476   :  { %v1687_v10 = vadd.f32 %v1686_v5, %v1685_v53 }
 0x478   :  { %v1688_v59 = vrot.slane %v1687_v10, 4 }
 0x47a   :  { %v1689_v8 = vadd.f32 %v1688_v59, %v1687_v10 }
 0x47c   :  { %v1690_v61 = vrot.slane %v1689_v8, 2 }
 0x47e   :  { %v1691_v51 = vadd.f32 %v1690_v61, %v1689_v8 }
 0x480   :  { %v1692_v62 = vrot.slane %v1691_v51, 1 }
 0x482   :  { %v1693_v37 = vadd.f32 %v1692_v62, %v1691_v51 }
 0x484   :  { %v1694_v19 = vmul.f32 0.016666668, %v1693_v37 }
 0x486   :  { %v1696_v0 = vadd.f32 1e-05, %v1694_v19 }
 0x488   :  { %4230 = vrsqrt.f32 %v1696_v0 }
 0x495   :  { %v4231_v41 = vpop.eup %4230 }
 0x496   :  { %v1698_v4 = vmul.f32 %v4231_v41, %v1695_v3 }
 0x498   :  { %v1703_v30 = vrot.slane %v1698_v4, %v4805_v50 }
 0x49a   :  { %v1705_v52 = vmul.f32 %v1703_v30, %v1657_v32  ;;  %v1706_v35 = vmul.f32 %v1703_v30, %v1658_v23  ;;  %v1711_v24 = vmul.f32 %v1703_v30, %v1663_v33  ;;  %v1712_v38 = vmul.f32 %v1703_v30, %v1664_v48  ;;  %v4107_v23 = vld [vmem:[#allocation6 + $0x60] ss:$20 sps:$4 sm:$0xff]  }
 0x49b   :  { %v1707_v14 = vmul.f32 %v1703_v30, %v1659_v20  ;;  %v1708_v15 = vmul.f32 %v1703_v30, %v1660_v45  ;;  %v1709_v32 = vmul.f32 %v1703_v30, %v1661_v58  ;;  %v1710_v63 = vmul.f32 %v1703_v30, %v5254_v9 }
 0x49c   :  { %v1726_v25 = vadd.f32 %v3578_v40, %v1711_v24  ;;  %v1720_v16 = vadd.f32 %v3578_v40, %v1705_v52  ;;  %v1721_v17 = vadd.f32 %v3578_v40, %v1706_v35  ;;  %v1727_v1 = vadd.f32 %v3578_v40, %v1712_v38 }
 0x49d   :  { %v1722_v57 = vadd.f32 %v3578_v40, %v1707_v14  ;;  %v1723_v6 = vadd.f32 %v3578_v40, %v1708_v15  ;;  %v1724_v44 = vadd.f32 %v3578_v40, %v1709_v32  ;;  %v1725_v9 = vadd.f32 %v3578_v40, %v1710_v63 }
 0x49e   :  { %vm1728_vm5 = vcmp.ge.f32.partialorder %v1720_v16, 0.0  ;;  %vm1729_vm6 = vcmp.ge.f32.partialorder %v1721_v17, 0.0  ;;  %v1736_v18 = vmul.f32 0.2, %v1720_v16  ;;  %v1737_v7 = vmul.f32 0.2, %v1721_v17 }
 0x49f   :  { %v1742_v22 = vmul.f32 0.2, %v1726_v25  ;;  %vm1734_vm7 = vcmp.ge.f32.partialorder %v1726_v25, 0.0  ;;  %vm1735_vm8 = vcmp.ge.f32.partialorder %v1727_v1, 0.0  ;;  %v1738_v20 = vmul.f32 0.2, %v1722_v57 }
 0x4a0   :  { %v1744_v56 = vsel %vm1728_vm5, %v1720_v16, %v1736_v18  ;;  %v1745_v55 = vsel %vm1729_vm6, %v1721_v17, %v1737_v7  ;;  %v1739_v45 = vmul.f32 0.2, %v1723_v6  ;;  %v1743_v26 = vmul.f32 0.2, %v1727_v1 }
 0x4a1   :  { %v1752_v39 = vpack.c.bf16 %v1745_v55, %v1744_v56  ;;  %vm1730_vm9 = vcmp.ge.f32.partialorder %v1722_v57, 0.0  ;;  %vm1731_vm10 = vcmp.ge.f32.partialorder %v1723_v6, 0.0  ;;  %v1750_v29 = vsel %vm1734_vm7, %v1726_v25, %v1742_v22 }
 0x4a2   :  { %v1751_v58 = vsel %vm1735_vm8, %v1727_v1, %v1743_v26  ;;  %v1746_v33 = vsel %vm1730_vm9, %v1722_v57, %v1738_v20  ;;  %v1747_v28 = vsel %vm1731_vm10, %v1723_v6, %v1739_v45  ;;  %v1740_v47 = vmul.f32 0.2, %v1724_v44 }
 0x4a3   :  { %3599 = vmatmul.mubr.msk.bf16.vlgmr.msra.gmra.mxu1 %vm1633_vm3, %v1752_v39  ;;  %3603 = vmatmul.mubr.msk.bf16.vlgmr.msra.gmra.mxu0 %vm1633_vm3, %v1752_v39  ;;  %v1755_v27 = vpack.c.bf16 %v1751_v58, %v1750_v29  ;;  %v1753_v48 = vpack.c.bf16 %v1747_v28, %v1746_v33  ;;  %v1741_v11 = vmul.f32 0.2, %v1725_v9  ;;  %vm1732_vm11 = vcmp.ge.f32.partialorder %v1724_v44, 0.0 }
 0x4a4   :  { %1938 = vmatprep.mubr.bf16.mxu1 %v4489_v2  ;;  %2011 = vmatprep.mubr.bf16.mxu0 %v4489_v2  ;;  %vm1733_vm12 = vcmp.ge.f32.partialorder %v1725_v9, 0.0  ;;  %vm3483_vm8 = vcmask 1047558   ;;  %vm3460_vm9 = vcmask 1045504  }
 0x4a5   :  { %3969 = vmatpush3.bf16.msra.mxu1 %v5243_v43  ;;  %v1748_v43 = vsel %vm1732_vm11, %v1724_v44, %v1740_v47  ;;  %v1749_v42 = vsel %vm1733_vm12, %v1725_v9, %v1741_v11 }
 0x4a6   :  { %3970 = vmatprep.subr.bf16.mxu1 %v4107_v23  ;;  %v1754_v54 = vpack.c.bf16 %v1749_v42, %v1748_v43 }
 0x4a9   :  { %3971 = vmatpush3.bf16.msra.mxu1 %v4107_v23 }
 0x4aa   :  { %3972 = vmatprep.subr.bf16.mxu1 %v4108_v36 }
 0x4ab   :  { %3600 = vmatmul.mubr.msk.bf16.gmra.mxu1 %vm1633_vm3, %v1753_v48  ;;  %3604 = vmatmul.mubr.msk.bf16.gmra.mxu0 %vm1633_vm3, %v1753_v48 }
 0x4ac   :  { %1948 = vmatprep.mubr.bf16.mxu1 %v4489_v2  ;;  %2021 = vmatprep.mubr.bf16.mxu0 %v4489_v2 }
 0x4ad   :  { %3973 = vmatpush3.bf16.msra.mxu1 %v4108_v36 }
 0x4ae   :  { %3974 = vmatprep.subr.bf16.mxu1 %v4109_v31 }
 0x4b1   :  { %3975 = vmatpush3.bf16.msra.mxu1 %v4109_v31 }
 0x4b3   :  { %3601 = vmatmul.mubr.msk.bf16.gmra.mxu1 %vm1633_vm3, %v1754_v54  ;;  %3605 = vmatmul.mubr.msk.bf16.gmra.mxu0 %vm1633_vm3, %v1754_v54 }
 0x4b4   :  { %1958 = vmatprep.mubr.bf16.mxu1 %v4489_v2  ;;  %2031 = vmatprep.mubr.bf16.mxu0 %v4489_v2 }
 0x4bb   :  { %3602 = vmatmul.mubr.msk.bf16.gmra.mxu1 %vm1633_vm3, %v1755_v27  ;;  %3606 = vmatmul.mubr.msk.bf16.gmra.mxu0 %vm1633_vm3, %v1755_v27 }
 0x4bc   :  { %3976 = vmatprep.mubr.msk.bf16.mxu1 %vm1633_vm3, %v1752_v39  ;;  %2263 = vmatprep.mubr.f32.mxu0 %v2172_v13 }
 0x4c3   :  { %3977 = vmatmul.mubr.msk.bf16.vlgmr.msra.gmra.mxu1 %vm1633_vm3, %v1753_v48 }
 0x4c4   :  { %3980 = vmatprep.mubr.msk.bf16.mxu1 %vm1633_vm3, %v1754_v54 }
 0x4cb   :  { %3981 = vmatmul.mubr.msk.bf16.gmra.mxu1 %vm1633_vm3, %v1755_v27  ;;  %vm3251_vm3 = vcmask 97280  }
 0x4cc   :  { %3996 = vmatprep.mubr.msk.f32.mxu1 %vm2183_vm13, %v2173_v21 }
 0x563   :  { %v5294_v60 = vpop.f32.mrf.mxu1  ;;  %v2003_v34 = vpop.f32.mrf.mxu0 }
 0x565   :  { %v5296_v12 = vpop.f32.mrf.mxu1  ;;  %v5298_v53 = vpop.f32.mrf.mxu0 }
 0x567   :  { %v5300_v5 = vpop.f32.mrf.mxu1  ;;  %v5302_v10 = vpop.f32.mrf.mxu0 }
 0x569   :  { %v5304_v59 = vpop.f32.mrf.mxu1  ;;  %v5306_v8 = vpop.f32.mrf.mxu0 }
 0x56b   :  { %v5308_v61 = vpop.f32.mrf.mxu1  ;;  %v5310_v51 = vpop.f32.mrf.mxu0 }
 0x56d   :  { %v5312_v62 = vpop.f32.mrf.mxu1  ;;  %v5314_v37 = vpop.f32.mrf.mxu0 }
 0x56e   :  { %v2118_v43 = vrot.slane %v5312_v62, 4  ;;  %v2149_v54 = vrot.slane %v5314_v37, 4 }
 0x56f   :  { %v5316_v19 = vpop.f32.mrf.mxu1  ;;  %v5318_v0 = vpop.f32.mrf.mxu0 }
 0x571   :  { %v5320_v3 = vpop.f32.mrf.mxu1  ;;  %v5322_v41 = vpop.f32.mrf.mxu0 }
 0x572   :  { %v2120_v48 = vrot.slane %v5320_v3, 4  ;;  %v2151_v11 = vrot.slane %v5322_v41, 4  ;;  %v2147_v41 = vrot.slane %v5306_v8, 4 }
 0x573   :  { %v5324_v4 = vpop.f32.mrf.mxu1  ;;  %v5326_v30 = vpop.f32.mrf.mxu0 }
 0x574   :  { %v2121_v3 = vsel %vm1073_vm1, %v2118_v43, %v2120_v48  ;;  %v2152_v62 = vsel %vm1073_vm1, %v2149_v54, %v2151_v11 }
 0x575   :  { %v1952_v40 = vpop.f32.mrf.mxu1  ;;  %v2025_v52 = vpop.f32.mrf.mxu0 }
 0x576   :  { %v2122_v33 = vrot.slane %v1952_v40, 4  ;;  %v2153_v44 = vrot.slane %v2025_v52, 4  ;;  %v2115_v40 = vrot.slane %v5296_v12, 4  ;;  %v2146_v52 = vrot.slane %v5298_v53, 4  ;;  %v2176_v12 = vld [vmem:[%s5552_s7 + $0x28] sm:$0xff]  ;;  %v2179_v53 = vld [vmem:[%s5552_s7 + $0x40] sm:$0xff] }
 0x577   :  { %v5328_v35 = vpop.f32.mrf.mxu1  ;;  %v5330_v24 = vpop.f32.mrf.mxu0 }
 0x578   :  { %v2123_v42 = vsel %vm1073_vm1, %v2120_v48, %v2122_v33  ;;  %v2154_v21 = vsel %vm1073_vm1, %v2151_v11, %v2153_v44  ;;  %v4154_v48 = vld [vmem:[#allocation8 + $0x4] ss:$40 sps:$4 sm:$0xff]  }
 0x579   :  { %v1956_v38 = vpop.f32.mrf.mxu1  ;;  %v2029_v14 = vpop.f32.mrf.mxu0  ;;  %v4157_v11 = vld [vmem:[#allocation8 + $0xc] ss:$40 sps:$4 sm:$0xff]  }
 0x57a   :  { %v2124_v63 = vrot.slane %v1956_v38, 4  ;;  %v2155_v29 = vrot.slane %v2029_v14, 4  ;;  %v2148_v38 = vsel %vm1073_vm1, %v2146_v52, %v2147_v41 }
 0x57b   :  { %v5332_v15 = vpop.f32.mrf.mxu1  ;;  %v5334_v25 = vpop.f32.mrf.mxu0 }
 0x57c   :  { %v2125_v47 = vsel %vm1073_vm1, %v2122_v33, %v2124_v63  ;;  %v2156_v31 = vsel %vm1073_vm1, %v2153_v44, %v2155_v29  ;;  %v4148_v33 = vld [vmem:[#allocation8 + $0x54] ss:$40 sps:$4 sm:$0xff]   ;;  %v4146_v44 = vld [vmem:[#allocation8 + $0x50] ss:$40 sps:$4 sm:$0xff]  }
 0x57d   :  { %v1962_v16 = vpop.f32.mrf.mxu1  ;;  %v2035_v17 = vpop.f32.mrf.mxu0 }
 0x57e   :  { %v2126_v23 = vrot.slane %v1962_v16, 4  ;;  %v2157_v20 = vrot.slane %v2035_v17, 4  ;;  %v2182_v17 = vld [vmem:[%s5552_s7 + $0x58] sm:$0xf] }
 0x57f   :  { %v5336_v18 = vpop.f32.mrf.mxu1  ;;  %v5338_v7 = vpop.f32.mrf.mxu0 }
 0x580   :  { %v2127_v28 = vsel %vm1073_vm1, %v2124_v63, %v2126_v23  ;;  %v2158_v36 = vsel %vm1073_vm1, %v2155_v29, %v2157_v20  ;;  %v2169_v14 = vsel %vm1073_vm1, %v5336_v18, %v2115_v40  ;;  %v2170_v16 = vsel %vm1073_vm1, %v5338_v7, %v2146_v52  ;;  %v4116_v18 = vld [vmem:[#allocation8 + $0x1e0] ss:$40 sps:$4 sm:$0xff]   ;;  %v4124_v7 = vld [vmem:[#allocation8 + $0x194] ss:$40 sps:$4 sm:$0xff]  }
 0x581   :  { %v1966_v1 = vpop.f32.mrf.mxu1  ;;  %v2039_v22 = vpop.f32.mrf.mxu0  ;;  %v4137_v63 = vld [vmem:[#allocation8 + $0xf8] ss:$40 sps:$4 sm:$0xff]   ;;  %v4145_v29 = vld [vmem:[#allocation8 + $0xac] ss:$40 sps:$4 sm:$0xff]  }
 0x582   :  { %v2128_v55 = vrot.slane %v1966_v1, 4  ;;  %v2159_v39 = vrot.slane %v2039_v22, 4  ;;  %v4119_v1 = vld [vmem:[#allocation8 + $0x1e8] ss:$40 sps:$4 sm:$0xff]   ;;  %v4125_v22 = vld [vmem:[#allocation8 + $0x198] ss:$40 sps:$4 sm:$0xff]  }
 0x583   :  { %v5340_v57 = vpop.f32.mrf.mxu1 }
 0x584   :  { %v2129_v26 = vsel %vm1073_vm1, %v2126_v23, %v2128_v55  ;;  %v2160_v27 = vsel %vm1073_vm1, %v2157_v20, %v2159_v39  ;;  %v4133_v55 = vld [vmem:[#allocation8 + $0x14c] ss:$40 sps:$4 sm:$0xff]   ;;  %v4128_v39 = vld [vmem:[#allocation8 + $0x140] ss:$40 sps:$4 sm:$0xff]   ;;  %v4139_v20 = vld [vmem:[#allocation8 + $0xfc] ss:$40 sps:$4 sm:$0xff]  }
 0x585   :  { %v2076_v6 = vpop.f32.mrf.mxu1  ;;  %v4136_v23 = vld [vmem:[#allocation8 + $0xf4] ss:$40 sps:$4 sm:$0xff]  }
 0x587   :  { %v3979_v56 = vpop.f32.mrf.mxu1 }
 0x589   :  { %v2079_v32 = vpop.f32.mrf.mxu1 }
 0x58a   :  { %3854 = vmatprep.subr.mxu0 %v2079_v32  ;;  %v4131_v32 = vld [vmem:[#allocation8 + $0x148] ss:$40 sps:$4 sm:$0xff]  }
 0x58b   :  { %v3982_v45 = vpop.f32.mrf.mxu1  ;;  %3855 = vmatpush3.msra.mxu0 %v2003_v34  ;;  %v2116_v34 = vrot.slane %v5304_v59, 4  ;;  %v2150_v59 = vsel %vm1073_vm1, %v2147_v41, %v2149_v54 }
 0x58c   :  { %3856 = vmatprep.subr.mxu0 %v2076_v6  ;;  %v4122_v6 = vld [vmem:[#allocation8 + $0x190] ss:$40 sps:$4 sm:$0xff]  }
 0x58d   :  { %v2092_v58 = vpop.f32.mrf.mxu1  ;;  %3857 = vmatpush3.msra.mxu0 %v2129_v26  ;;  %v2119_v37 = vsel %vm1073_vm1, %v2116_v34, %v2118_v43  ;;  %v2117_v8 = vsel %vm1073_vm1, %v2115_v40, %v2116_v34  ;;  %v4142_v26 = vld [vmem:[#allocation8 + $0xa4] ss:$40 sps:$4 sm:$0xff]  }
 0x58e   :  { %3858 = vmatprep.subr.mxu0 %v2160_v27  ;;  %v4143_v27 = vld [vmem:[#allocation8 + $0xa8] ss:$40 sps:$4 sm:$0xff]   ;;  %v4163_v43 = vld [vmem:[#allocation8 + $0x24c] ss:$40 sps:$4 sm:$0xff]  }
 0x58f   :  { %v3983_v9 = vpop.f32.mrf.mxu1  ;;  %3859 = vmatpush3.msra.mxu0 %v2127_v28  ;;  %v4151_v28 = vld [vmem:[#allocation8 + $0x5c] ss:$40 sps:$4 sm:$0xff]  }
 0x590   :  { %3860 = vmatprep.subr.mxu0 %v2158_v36  ;;  %3984 = vmatprep.subr.msk.mxu1 %vm1073_vm1, %v3983_v9  ;;  %v4152_v36 = vld [vmem:[#allocation8] ss:$40 sps:$4 sm:$0xff]  }
 0x591   :  { %3861 = vmatpush3.msra.mxu0 %v2125_v47  ;;  %3985 = vmatpush3.msk.msra.mxu1 %vm1073_vm1, %v3983_v9  ;;  %v2095_v13 = vpop.f32.mrf.mxu1  ;;  %v4149_v9 = vld [vmem:[#allocation8 + $0x58] ss:$40 sps:$4 sm:$0xff]   ;;  %v4155_v47 = vld [vmem:[#allocation8 + $0x8] ss:$40 sps:$4 sm:$0xff]  }
 0x592   :  { %3862 = vmatprep.subr.mxu0 %v2156_v31  ;;  %3986 = vmatprep.subr.mxu1 %v3982_v45  ;;  %v4160_v31 = vld [vmem:[#allocation8 + $0x244] ss:$40 sps:$4 sm:$0xff]  }
 0x593   :  { %3863 = vmatpush3.msra.mxu0 %v2123_v42  ;;  %3987 = vmatpush3.msra.mxu1 %v3982_v45  ;;  %v4134_v45 = vld [vmem:[#allocation8 + $0xf0] ss:$40 sps:$4 sm:$0xff]  }
 0x594   :  { %3864 = vmatprep.subr.mxu0 %v2154_v21  ;;  %3988 = vmatprep.subr.mxu1 %v2095_v13 }
 0x595   :  { %3865 = vmatpush3.msra.mxu0 %v2121_v3  ;;  %3989 = vmatpush3.msra.mxu1 %v2095_v13 }
 0x596   :  { %3866 = vmatprep.subr.mxu0 %v2152_v62  ;;  %3990 = vmatprep.subr.mxu1 %v2092_v58 }
 0x597   :  { %3867 = vmatpush3.msra.mxu0 %v2119_v37  ;;  %3991 = vmatpush3.msra.mxu1 %v2092_v58  ;;  %v4140_v58 = vld [vmem:[#allocation8 + $0xa0] ss:$40 sps:$4 sm:$0xff]  }
 0x598   :  { %3868 = vmatprep.subr.mxu0 %v2150_v59  ;;  %3992 = vmatprep.subr.mxu1 %v3979_v56 }
 0x599   :  { %3869 = vmatpush3.msra.mxu0 %v2117_v8  ;;  %3993 = vmatpush3.msra.mxu1 %v3979_v56  ;;  %v4130_v56 = vld [vmem:[#allocation8 + $0x144] ss:$40 sps:$4 sm:$0xff]  }
 0x59a   :  { %3870 = vmatprep.subr.mxu0 %v2148_v38  ;;  %3994 = vmatprep.subr.mxu1 %v5340_v57 }
 0x59b   :  { %3871 = vmatpush3.msra.mxu0 %v2169_v14  ;;  %3995 = vmatpush3.msra.mxu1 %v5340_v57  ;;  %v4127_v57 = vld [vmem:[#allocation8 + $0x19c] ss:$40 sps:$4 sm:$0xff]  }
 0x59c   :  { %3872 = vmatprep.subr.mxu0 %v2170_v16  ;;  %3997 = vmatmul.mubr.msk.f32.vlgmr.msra.gmra.mxu1 %vm2183_vm13, %v2176_v12 }
 0x59d   :  { %3873 = vmatpush3.msra.mxu0 %v5332_v15  ;;  %3999 = vmatprep.mubr.msk.f32.mxu1 %vm2183_vm13, %v2179_v53  ;;  %v4118_v15 = vld [vmem:[#allocation8 + $0x1e4] ss:$40 sps:$4 sm:$0xff]  }
 0x59e   :  { %3874 = vmatprep.subr.mxu0 %v5334_v25  ;;  %v4121_v25 = vld [vmem:[#allocation8 + $0x1ec] ss:$40 sps:$4 sm:$0xff]  }
 0x59f   :  { %3875 = vmatpush3.msra.mxu0 %v5328_v35  ;;  %v2171_v35 = vld [vmem:[%s5552_s7] sm:$0xff] }
 0x5a0   :  { %3876 = vmatprep.subr.mxu0 %v5330_v24  ;;  %4000 = vmatmul.mubr.msk.f32.gmra.mxu1 %vm2183_vm13, %v2182_v17  ;;  %v4113_v24 = vld [vmem:[#allocation8 + $0x238] ss:$40 sps:$4 sm:$0xff]  }
 0x5a1   :  { %3877 = vmatpush3.msra.mxu0 %v5324_v4  ;;  %3003 = vmatprep.mubr.bf16.mxu1 %v4489_v2  ;;  %v2175_v4 = vld [vmem:[%s5552_s7 + $0x20] sm:$0xff] }
 0x5a2   :  { %3878 = vmatprep.subr.mxu0 %v5326_v30  ;;  %v4110_v30 = vld [vmem:[#allocation8 + $0x230] ss:$40 sps:$4 sm:$0xff]  }
 0x5a3   :  { %3879 = vmatpush3.msra.mxu0 %v5316_v19  ;;  %v4112_v19 = vld [vmem:[#allocation8 + $0x234] ss:$40 sps:$4 sm:$0xff]  }
 0x5a4   :  { %3880 = vmatprep.subr.mxu0 %v5318_v0  ;;  %v4115_v0 = vld [vmem:[#allocation8 + $0x23c] ss:$40 sps:$4 sm:$0xff]  }
 0x5a5   :  { %3881 = vmatpush3.msra.mxu0 %v5308_v61  ;;  %v2174_v61 = vld [vmem:[%s5552_s7 + $0x18] sm:$0xff]  ;;  %2971 = vmatprep.subr.bf16.mxu1 %v4115_v0 }
 0x5a6   :  { %3882 = vmatprep.subr.mxu0 %v5310_v51  ;;  %v2180_v51 = vld [vmem:[%s5552_s7 + $0x48] sm:$0xf]  ;;  %2972 = vmatpush1.bf16.msra.mxu1 %v4113_v24 }
 0x5a7   :  { %3883 = vmatpush3.msra.mxu0 %v5300_v5  ;;  %v2178_v5 = vld [vmem:[%s5552_s7 + $0x38] sm:$0xff]  ;;  %2973 = vmatprep.subr.bf16.mxu1 %v4121_v25 }
 0x5a8   :  { %3884 = vmatprep.subr.mxu0 %v5302_v10  ;;  %v2177_v10 = vld [vmem:[%s5552_s7 + $0x30] sm:$0xff] }
 0x5a9   :  { %3885 = vmatpush3.msra.mxu0 %v5294_v60  ;;  %v2181_v60 = vld [vmem:[%s5552_s7 + $0x50] sm:$0xf] }
 0x5aa   :  { %2264 = vmatmul.mubr.f32.vlgmr.msra.gmra.mxu0 %v2171_v35  ;;  %2918 = vmatprep.subr.bf16.mxu0 %v4112_v19 }
 0x5ab   :  { %2268 = vmatprep.mubr.f32.mxu0 %v2175_v4  ;;  %2919 = vmatpush1.bf16.msra.mxu0 %v4110_v30 }
 0x5ac   :  { %2920 = vmatprep.subr.bf16.mxu0 %v4118_v15  ;;  %2974 = vmatpush1.bf16.msra.mxu1 %v4119_v1 }
 0x5ad   :  { %2975 = vmatprep.subr.bf16.mxu1 %v4127_v57 }
 0x5ae   :  { %2269 = vmatmul.mubr.f32.gmra.mxu0 %v2174_v61 }
 0x5af   :  { %2273 = vmatprep.mubr.f32.mxu0 %v2178_v5  ;;  %2921 = vmatpush1.bf16.msra.mxu0 %v4116_v18 }
 0x5b0   :  { %2922 = vmatprep.subr.bf16.mxu0 %v4124_v7  ;;  %2976 = vmatpush1.bf16.msra.mxu1 %v4125_v22 }
 0x5b1   :  { %2977 = vmatprep.subr.bf16.mxu1 %v4133_v55 }
 0x5b2   :  { %2274 = vmatmul.mubr.f32.gmra.mxu0 %v2177_v10 }
 0x5b3   :  { %2278 = vmatprep.mubr.f32.mxu0 %v2181_v60  ;;  %2923 = vmatpush1.bf16.msra.mxu0 %v4122_v6 }
 0x5b4   :  { %2924 = vmatprep.subr.bf16.mxu0 %v4130_v56  ;;  %2978 = vmatpush1.bf16.msra.mxu1 %v4131_v32 }
 0x5b5   :  { %2979 = vmatprep.subr.bf16.mxu1 %v4139_v20 }
 0x5b6   :  { %2279 = vmatmul.mubr.f32.gmra.mxu0 %v2180_v51 }
 0x5b7   :  { %2950 = vmatprep.mubr.bf16.mxu0 %v4489_v2  ;;  %2925 = vmatpush1.bf16.msra.mxu0 %v4128_v39 }
 0x5b8   :  { %2926 = vmatprep.subr.bf16.mxu0 %v4136_v23  ;;  %2980 = vmatpush1.bf16.msra.mxu1 %v4137_v63 }
 0x5b9   :  { %2981 = vmatprep.subr.bf16.mxu1 %v4145_v29 }
 0x5bb   :  { %2927 = vmatpush1.bf16.msra.mxu0 %v4134_v45 }
 0x5bc   :  { %2928 = vmatprep.subr.bf16.mxu0 %v4142_v26  ;;  %2982 = vmatpush1.bf16.msra.mxu1 %v4143_v27 }
 0x5bd   :  { %2983 = vmatprep.subr.bf16.mxu1 %v4151_v28  ;;  %v2399_v28 = vld [vmem:[#allocation14] sm:$0x1] }
 0x5bf   :  { %2929 = vmatpush1.bf16.msra.mxu0 %v4140_v58 }
 0x5c0   :  { %2930 = vmatprep.subr.bf16.mxu0 %v4148_v33  ;;  %2984 = vmatpush1.bf16.msra.mxu1 %v4149_v9 }
 0x5c1   :  { %2985 = vmatprep.subr.bf16.mxu1 %v4157_v11 }
 0x5c3   :  { %2931 = vmatpush1.bf16.msra.mxu0 %v4146_v44 }
 0x5c4   :  { %2932 = vmatprep.subr.bf16.mxu0 %v4154_v48  ;;  %2986 = vmatpush1.bf16.msra.mxu1 %v4155_v47  ;;  %v3616_v48 = vld [vmem:[#allocation18] ss:$0 sm:$0xff] }
 0x5c5   :  { %3077 = vmatprep.subr.bf16.mxu1 %v4163_v43 }
 0x5c7   :  { %2933 = vmatpush1.bf16.msra.mxu0 %v4152_v36 }
 0x5c8   :  { %3024 = vmatprep.subr.bf16.mxu0 %v4160_v31 }
 0x65c   :  { %v3998_v54 = vpop.f32.mrf.mxu1 }
 0x65e   :  { %v2350_v34 = vpop.f32.mrf.mxu1 }
 0x660   :  { %v4001_v41 = vpop.f32.mrf.mxu1 }
 0x662   :  { %v2360_v8 = vpop.f32.mrf.mxu1 }
 0x66a   :  { %v3886_v42 = vpop.f32.mrf.mxu0 }
 0x66c   :  { %v3887_v13 = vpop.f32.mrf.mxu0 }
 0x66d   :  { %v3888_v37 = vadd.f32 %v3887_v13, %v3886_v42 }
 0x66e   :  { %v3889_v21 = vpop.f32.mrf.mxu0 }
 0x66f   :  { %v2351_v14 = vadd.f32 %v3888_v37, %v2350_v34 }
 0x670   :  { %v3890_v3 = vpop.f32.mrf.mxu0 }
 0x671   :  { %v3891_v62 = vadd.f32 %v3890_v3, %v3889_v21 }
 0x672   :  { %v3892_v40 = vpop.f32.mrf.mxu0 }
 0x673   :  { %v2356_v38 = vadd.f32 %v3998_v54, %v3891_v62  ;;  %v4161_v62 = vld [vmem:[#allocation8 + $0x248] ss:$40 sps:$4 sm:$0xff]  }
 0x674   :  { %v3893_v52 = vpop.f32.mrf.mxu0 }
 0x675   :  { %v3894_v59 = vadd.f32 %v3893_v52, %v3892_v40  ;;  %v2369_v35 = vadd.f32 %v2356_v38, %v2351_v14 }
 0x676   :  { %v3895_v12 = vpop.f32.mrf.mxu0 }
 0x677   :  { %v2361_v16 = vadd.f32 %v3894_v59, %v2360_v8  ;;  %v4166_v59 = vld [vmem:[#allocation8 + $0x1f4] ss:$40 sps:$4 sm:$0xff]  }
 0x678   :  { %v3896_v53 = vpop.f32.mrf.mxu0  ;;  %v4169_v8 = vld [vmem:[#allocation8 + $0x1fc] ss:$40 sps:$4 sm:$0xff]  }
 0x679   :  { %v3897_v17 = vadd.f32 %v3896_v53, %v3895_v12  ;;  %v2370_v61 = vadd.f32 %v2369_v35, %v2361_v16  ;;  %v4167_v53 = vld [vmem:[#allocation8 + $0x1f8] ss:$40 sps:$4 sm:$0xff]  }
 0x67b   :  { %v2366_v4 = vadd.f32 %v4001_v41, %v3897_v17  ;;  %v4158_v41 = vld [vmem:[#allocation8 + $0x240] ss:$40 sps:$4 sm:$0xff]   ;;  %v4175_v17 = vld [vmem:[#allocation8 + $0x1ac] ss:$40 sps:$4 sm:$0xff]  }
 0x67d   :  { %v2371_v5 = vsel %vm1073_vm1, %v2366_v4, 0.0 }
 0x67e   :  { %v2372_v10 = vadd.f32 %v2371_v5, %v2370_v61  ;;  %v4170_v61 = vld [vmem:[#allocation8 + $0x1a0] ss:$40 sps:$4 sm:$0xff]  }
 0x67f   :  { %v4173_v5 = vld [vmem:[#allocation8 + $0x1a8] ss:$40 sps:$4 sm:$0xff]  }
 0x680   :  { %v2373_v60 = vrot.slane %v2372_v10, 4 }
 0x682   :  { %v2374_v51 = vadd.f32 %v2373_v60, %v2372_v10  ;;  %v4178_v60 = vld [vmem:[#allocation8 + $0x154] ss:$40 sps:$4 sm:$0xff]  }
 0x684   :  { %v2375_v19 = vrot.slane %v2374_v51, 2 }
 0x686   :  { %v2376_v0 = vadd.f32 %v2375_v19, %v2374_v51  ;;  %v4181_v51 = vld [vmem:[#allocation8 + $0x15c] ss:$40 sps:$4 sm:$0xff]   ;;  %v4176_v19 = vld [vmem:[#allocation8 + $0x150] ss:$40 sps:$4 sm:$0xff]  }
 0x688   :  { %v2377_v30 = vrot.slane %v2376_v0, 1 }
 0x68a   :  { %v2378_v24 = vadd.f32 %v2377_v30, %v2376_v0  ;;  %v4179_v0 = vld [vmem:[#allocation8 + $0x158] ss:$40 sps:$4 sm:$0xff]   ;;  %v4184_v30 = vld [vmem:[#allocation8 + $0x104] ss:$40 sps:$4 sm:$0xff]  }
 0x68c   :  { %v2379_v15 = vmul.f32 0.035714287, %v2378_v24  ;;  %v4187_v24 = vld [vmem:[#allocation8 + $0x10c] ss:$40 sps:$4 sm:$0xff]  }
 0x68e   :  { %v2380_v25 = vsub.f32 %v2351_v14, %v2379_v15  ;;  %v2381_v18 = vsub.f32 %v2356_v38, %v2379_v15  ;;  %v2382_v1 = vsub.f32 %v2361_v16, %v2379_v15  ;;  %v2383_v7 = vsub.f32 %v2366_v4, %v2379_v15  ;;  %v4164_v14 = vld [vmem:[#allocation8 + $0x1f0] ss:$40 sps:$4 sm:$0xff]   ;;  %v4172_v16 = vld [vmem:[#allocation8 + $0x1a4] ss:$40 sps:$4 sm:$0xff]   ;;  %v4182_v15 = vld [vmem:[#allocation8 + $0x100] ss:$40 sps:$4 sm:$0xff]  }
 0x690   :  { %v2384_v57 = vmul.f32 %v2380_v25, %v2380_v25  ;;  %v2385_v6 = vmul.f32 %v2381_v18, %v2381_v18  ;;  %v2387_v22 = vmul.f32 %v2383_v7, %v2383_v7  ;;  %v2386_v56 = vmul.f32 %v2382_v1, %v2382_v1 }
 0x692   :  { %v2388_v55 = vadd.f32 %v2385_v6, %v2384_v57  ;;  %v2390_v32 = vsel %vm1073_vm1, %v2387_v22, 0.0  ;;  %v4191_v57 = vld [vmem:[#allocation8 + $0xb8] ss:$40 sps:$4 sm:$0xff]   ;;  %v4196_v6 = vld [vmem:[#allocation8 + $0x64] ss:$40 sps:$4 sm:$0xff]  }
 0x693   :  { %v4199_v22 = vld [vmem:[#allocation8 + $0x6c] ss:$40 sps:$4 sm:$0xff]  }
 0x694   :  { %v2389_v39 = vadd.f32 %v2388_v55, %v2386_v56  ;;  %v4194_v56 = vld [vmem:[#allocation8 + $0x60] ss:$40 sps:$4 sm:$0xff]  }
 0x695   :  { %v4197_v55 = vld [vmem:[#allocation8 + $0x68] ss:$40 sps:$4 sm:$0xff]  }
 0x696   :  { %v2391_v23 = vadd.f32 %v2390_v32, %v2389_v39  ;;  %v4202_v39 = vld [vmem:[#allocation8 + $0x14] ss:$40 sps:$4 sm:$0xff]  }
 0x697   :  { %v4205_v32 = vld [vmem:[#allocation8 + $0x1c] ss:$40 sps:$4 sm:$0xff]  }
 0x698   :  { %v2392_v20 = vrot.slane %v2391_v23, 4 }
 0x69a   :  { %v2393_v45 = vadd.f32 %v2392_v20, %v2391_v23  ;;  %v4200_v23 = vld [vmem:[#allocation8 + $0x10] ss:$40 sps:$4 sm:$0xff]  }
 0x69b   :  { %v4203_v20 = vld [vmem:[#allocation8 + $0x18] ss:$40 sps:$4 sm:$0xff]  }
 0x69c   :  { %v2394_v63 = vrot.slane %v2393_v45, 2 }
 0x69e   :  { %v2395_v26 = vadd.f32 %v2394_v63, %v2393_v45  ;;  %v4208_v45 = vld [vmem:[#allocation8 + $0x254] ss:$40 sps:$4 sm:$0xff]   ;;  %v4206_v63 = vld [vmem:[#allocation8 + $0x250] ss:$40 sps:$4 sm:$0xff]  }
 0x6a0   :  { %v2396_v29 = vrot.slane %v2395_v26, 1 }
 0x6a2   :  { %v2397_v58 = vadd.f32 %v2396_v29, %v2395_v26  ;;  %v4211_v26 = vld [vmem:[#allocation8 + $0x204] ss:$40 sps:$4 sm:$0xff]   ;;  %v4209_v29 = vld [vmem:[#allocation8 + $0x200] ss:$40 sps:$4 sm:$0xff]  }
 0x6a4   :  { %v2398_v27 = vmul.f32 0.035714287, %v2397_v58  ;;  %v4214_v58 = vld [vmem:[#allocation8 + $0x1b4] ss:$40 sps:$4 sm:$0xff]  }
 0x6a6   :  { %v2400_v33 = vadd.f32 1e-05, %v2398_v27  ;;  %v4212_v27 = vld [vmem:[#allocation8 + $0x1b0] ss:$40 sps:$4 sm:$0xff]  }
 0x6a8   :  { %4232 = vrsqrt.f32 %v2400_v33  ;;  %v4217_v33 = vld [vmem:[#allocation8 + $0x164] ss:$40 sps:$4 sm:$0xff]  }
 0x6b5   :  { %v4233_v44 = vpop.eup %4232 }
 0x6b6   :  { %v2402_v9 = vmul.f32 %v4233_v44, %v2399_v28  ;;  %v4215_v28 = vld [vmem:[#allocation8 + $0x160] ss:$40 sps:$4 sm:$0xff]   ;;  %v4220_v44 = vld [vmem:[#allocation8 + $0x114] ss:$40 sps:$4 sm:$0xff]  }
 0x6b8   :  { %v2407_v36 = vrot.slane %v2402_v9, %v4805_v50  ;;  %v4218_v9 = vld [vmem:[#allocation8 + $0x110] ss:$40 sps:$4 sm:$0xff]  }
 0x6ba   :  { %v2409_v47 = vmul.f32 %v2407_v36, %v2380_v25  ;;  %v2410_v11 = vmul.f32 %v2407_v36, %v2381_v18  ;;  %v2411_v31 = vmul.f32 %v2407_v36, %v2382_v1  ;;  %v2412_v43 = vmul.f32 %v2407_v36, %v2383_v7  ;;  %v4185_v25 = vld [vmem:[#allocation8 + $0x108] ss:$40 sps:$4 sm:$0xff]   ;;  %v4190_v18 = vld [vmem:[#allocation8 + $0xb4] ss:$40 sps:$4 sm:$0xff]   ;;  %v4223_v36 = vld [vmem:[#allocation8 + $0xc4] ss:$40 sps:$4 sm:$0xff]  }
 0x6bb   :  { %v4193_v1 = vld [vmem:[#allocation8 + $0xbc] ss:$40 sps:$4 sm:$0xff]   ;;  %v4188_v7 = vld [vmem:[#allocation8 + $0xb0] ss:$40 sps:$4 sm:$0xff]  }
 0x6bc   :  { %v2420_v42 = vadd.f32 %v3616_v48, %v2409_v47  ;;  %v2421_v54 = vadd.f32 %v3616_v48, %v2410_v11  ;;  %v2422_v13 = vadd.f32 %v3616_v48, %v2411_v31  ;;  %v2423_v21 = vadd.f32 %v3616_v48, %v2412_v43  ;;  %v4221_v48 = vld [vmem:[#allocation8 + $0xc0] ss:$40 sps:$4 sm:$0xff]   ;;  %v4226_v47 = vld [vmem:[#allocation8 + $0x74] ss:$40 sps:$4 sm:$0xff]   ;;  %v4224_v11 = vld [vmem:[#allocation8 + $0x70] ss:$40 sps:$4 sm:$0xff]  }
 0x6bd   :  { %v4229_v31 = vld [vmem:[#allocation8 + $0x24] ss:$40 sps:$4 sm:$0xff]   ;;  %v4227_v43 = vld [vmem:[#allocation8 + $0x20] ss:$40 sps:$4 sm:$0xff]  }
 0x6be   :  { %vm2424_vm14 = vcmp.ge.f32.partialorder %v2420_v42, 0.0  ;;  %vm2425_vm15 = vcmp.ge.f32.partialorder %v2421_v54, 0.0  ;;  %v2428_v34 = vmul.f32 0.2, %v2420_v42  ;;  %v2429_v3 = vmul.f32 0.2, %v2421_v54 }
 0x6bf   :  { %v2430_v38 = vmul.f32 0.2, %v2422_v13  ;;  %v2431_v12 = vmul.f32 0.2, %v2423_v21  ;;  %vm2426_vm0 = vcmp.ge.f32.partialorder %v2422_v13, 0.0  ;;  %vm2427_vm2 = vcmp.ge.f32.partialorder %v2423_v21, 0.0 }
 0x6c0   :  { %v2432_v40 = vsel %vm2424_vm14, %v2420_v42, %v2428_v34  ;;  %v2433_v37 = vsel %vm2425_vm15, %v2421_v54, %v2429_v3  ;;  %v3248_v42 = vld [vmem:[#allocation11 + $0x8] sm:$0xff] }
 0x6c1   :  { %v5423_v52 = vpack.c.bf16 %v2433_v37, %v2432_v40  ;;  %v2434_v35 = vsel %vm2426_vm0, %v2422_v13, %v2430_v38  ;;  %v2435_v4 = vsel %vm2427_vm2, %v2423_v21, %v2431_v12 }
 0x6c2   :  { %v5429_v10 = vpack.c.bf16 %v2435_v4, %v2434_v35 }
 0x6c3   :  { %2951 = vmatmul.mubr.bf16.vlgmr.msra.gmra.mxu0 %v5423_v52  ;;  %3004 = vmatmul.mubr.bf16.vlgmr.msra.gmra.mxu1 %v5423_v52 }
 0x6c4   :  { %3025 = vmatpush1.bf16.msra.mxu0 %v4158_v41  ;;  %3078 = vmatpush1.bf16.msra.mxu1 %v4161_v62 }
 0x6c5   :  { %3026 = vmatprep.subr.bf16.mxu0 %v4166_v59  ;;  %3079 = vmatprep.subr.bf16.mxu1 %v4169_v8 }
 0x6c6   :  { %2960 = vmatprep.mubr.bf16.mxu0 %v4489_v2  ;;  %3013 = vmatprep.mubr.bf16.mxu1 %v4489_v2 }
 0x6c8   :  { %3027 = vmatpush1.bf16.msra.mxu0 %v4164_v14  ;;  %3080 = vmatpush1.bf16.msra.mxu1 %v4167_v53 }
 0x6c9   :  { %3028 = vmatprep.subr.bf16.mxu0 %v4172_v16  ;;  %3081 = vmatprep.subr.bf16.mxu1 %v4175_v17 }
 0x6cb   :  { %2961 = vmatmul.mubr.bf16.gmra.mxu0 %v5429_v10  ;;  %3014 = vmatmul.mubr.bf16.gmra.mxu1 %v5429_v10 }
 0x6cc   :  { %3029 = vmatpush1.bf16.msra.mxu0 %v4170_v61  ;;  %3082 = vmatpush1.bf16.msra.mxu1 %v4173_v5 }
 0x6cd   :  { %3030 = vmatprep.subr.bf16.mxu0 %v4178_v60  ;;  %3083 = vmatprep.subr.bf16.mxu1 %v4181_v51 }
 0x6ce   :  { %3056 = vmatprep.mubr.bf16.mxu0 %v4489_v2  ;;  %3109 = vmatprep.mubr.bf16.mxu1 %v4489_v2 }
 0x6d0   :  { %3031 = vmatpush1.bf16.msra.mxu0 %v4176_v19  ;;  %3084 = vmatpush1.bf16.msra.mxu1 %v4179_v0 }
 0x6d1   :  { %3032 = vmatprep.subr.bf16.mxu0 %v4184_v30  ;;  %3085 = vmatprep.subr.bf16.mxu1 %v4187_v24 }
 0x6d4   :  { %3033 = vmatpush1.bf16.msra.mxu0 %v4182_v15  ;;  %3086 = vmatpush1.bf16.msra.mxu1 %v4185_v25 }
 0x6d5   :  { %3034 = vmatprep.subr.bf16.mxu0 %v4190_v18  ;;  %3087 = vmatprep.subr.bf16.mxu1 %v4193_v1 }
 0x6d8   :  { %3035 = vmatpush1.bf16.msra.mxu0 %v4188_v7  ;;  %3088 = vmatpush1.bf16.msra.mxu1 %v4191_v57 }
 0x6d9   :  { %3036 = vmatprep.subr.bf16.mxu0 %v4196_v6  ;;  %3089 = vmatprep.subr.bf16.mxu1 %v4199_v22 }
 0x6dc   :  { %3037 = vmatpush1.bf16.msra.mxu0 %v4194_v56  ;;  %3090 = vmatpush1.bf16.msra.mxu1 %v4197_v55 }
 0x6dd   :  { %3038 = vmatprep.subr.bf16.mxu0 %v4202_v39  ;;  %3091 = vmatprep.subr.bf16.mxu1 %v4205_v32 }
 0x6e0   :  { %3039 = vmatpush1.bf16.msra.mxu0 %v4200_v23  ;;  %3092 = vmatpush1.bf16.msra.mxu1 %v4203_v20 }
 0x6e1   :  { %3130 = vmatprep.subr.bf16.mxu0 %v4208_v45 }
 0x6e3   :  { %3057 = vmatmul.mubr.bf16.vlgmr.msra.gmra.mxu0 %v5423_v52  ;;  %3110 = vmatmul.mubr.bf16.vlgmr.msra.gmra.mxu1 %v5423_v52 }
 0x6e4   :  { %3131 = vmatpush1.bf16.msra.mxu0 %v4206_v63  ;;  %3066 = vmatprep.mubr.bf16.mxu0 %v4489_v2 }
 0x6e5   :  { %3132 = vmatprep.subr.bf16.mxu0 %v4211_v26  ;;  %3119 = vmatprep.mubr.bf16.mxu1 %v4489_v2 }
 0x6e8   :  { %3133 = vmatpush1.bf16.msra.mxu0 %v4209_v29 }
 0x6e9   :  { %3134 = vmatprep.subr.bf16.mxu0 %v4214_v58 }
 0x6eb   :  { %3067 = vmatmul.mubr.bf16.gmra.mxu0 %v5429_v10  ;;  %3120 = vmatmul.mubr.bf16.gmra.mxu1 %v5429_v10 }
 0x6ec   :  { %3135 = vmatpush1.bf16.msra.mxu0 %v4212_v27  ;;  %3162 = vmatprep.mubr.bf16.mxu0 %v4489_v2 }
 0x6ed   :  { %3136 = vmatprep.subr.bf16.mxu0 %v4217_v33  ;;  %3699 = vmatprep.mubr.msk.f32.mxu1 %vm3251_vm3, %v3248_v42 }
 0x6f0   :  { %3137 = vmatpush1.bf16.msra.mxu0 %v4215_v28 }
 0x6f1   :  { %3138 = vmatprep.subr.bf16.mxu0 %v4220_v44 }
 0x6f4   :  { %3139 = vmatpush1.bf16.msra.mxu0 %v4218_v9 }
 0x6f5   :  { %3140 = vmatprep.subr.bf16.mxu0 %v4223_v36 }
 0x6f8   :  { %3141 = vmatpush1.bf16.msra.mxu0 %v4221_v48 }
 0x6f9   :  { %3142 = vmatprep.subr.bf16.mxu0 %v4226_v47 }
 0x6fc   :  { %3143 = vmatpush1.bf16.msra.mxu0 %v4224_v11 }
 0x6fd   :  { %3144 = vmatprep.subr.bf16.mxu0 %v4229_v31 }
 0x700   :  { %3145 = vmatpush1.bf16.msra.mxu0 %v4227_v43 }
 0x703   :  { %3163 = vmatmul.mubr.bf16.vlgmr.msra.gmra.mxu0 %v5423_v52 }
 0x704   :  { %3172 = vmatprep.mubr.bf16.mxu0 %v4489_v2 }
 0x70b   :  { %3173 = vmatmul.mubr.bf16.gmra.mxu0 %v5429_v10 }
 0x783   :  { %v5446_v54 = vpop.f32.mrf.mxu0  ;;  %v5450_v21 = vpop.f32.mrf.mxu1 }
 0x785   :  { %v5448_v13 = vpop.f32.mrf.mxu0  ;;  %v5454_v3 = vpop.f32.mrf.mxu1 }
 0x786   :  { %v3192_v42 = vrot.slane %v5454_v3, 4 }
 0x787   :  { %v5452_v34 = vpop.f32.mrf.mxu0  ;;  %v5458_v62 = vpop.f32.mrf.mxu1 }
 0x788   :  { %v3193_v31 = vrot.slane %v5458_v62, 4 }
 0x789   :  { %v5456_v41 = vpop.f32.mrf.mxu0  ;;  %v5462_v40 = vpop.f32.mrf.mxu1 }
 0x78a   :  { %v3195_v47 = vrot.slane %v5462_v40, 4 }
 0x78b   :  { %v5460_v2 = vpop.f32.mrf.mxu0  ;;  %v5466_v52 = vpop.f32.mrf.mxu1 }
 0x78c   :  { %v3197_v48 = vrot.slane %v5466_v52, 4  ;;  %v3196_v40 = vsel %vm1073_vm1, %v3192_v42, %v3195_v47 }
 0x78d   :  { %v5464_v37 = vpop.f32.mrf.mxu0  ;;  %v5470_v8 = vpop.f32.mrf.mxu1 }
 0x78e   :  { %v3199_v36 = vrot.slane %v5470_v8, 4  ;;  %v3198_v52 = vsel %vm1073_vm1, %v3193_v31, %v3197_v48 }
 0x78f   :  { %v5468_v59 = vpop.f32.mrf.mxu0  ;;  %v5474_v12 = vpop.f32.mrf.mxu1 }
 0x790   :  { %v3201_v9 = vrot.slane %v5474_v12, 4  ;;  %v3200_v8 = vsel %vm1073_vm1, %v3195_v47, %v3199_v36 }
 0x791   :  { %v5472_v38 = vpop.f32.mrf.mxu0  ;;  %v3021_v53 = vpop.f32.mrf.mxu1 }
 0x792   :  { %v3203_v44 = vrot.slane %v3021_v53, 4  ;;  %v3202_v43 = vsel %vm1073_vm1, %v3197_v48, %v3201_v9  ;;  %v3191_v53 = vrot.slane %v5450_v21, 4  ;;  %v3244_v3 = vsel %vm1073_vm1, %v5472_v38, %v3192_v42  ;;  %v3250_v38 = vld [vmem:[#allocation11 + $0x18] sm:$0xf] }
 0x794   :  { %v3204_v11 = vsel %vm1073_vm1, %v3199_v36, %v3203_v44  ;;  %v3194_v62 = vsel %vm1073_vm1, %v3191_v53, %v3193_v31 }
 0x7a3   :  { %v3058_v14 = vpop.f32.mrf.mxu0  ;;  %v3111_v17 = vpop.f32.mrf.mxu1 }
 0x7a4   :  { %v3221_v26 = vrot.slane %v3111_v17, 4 }
 0x7a5   :  { %v3060_v16 = vpop.f32.mrf.mxu0  ;;  %v3113_v4 = vpop.f32.mrf.mxu1 }
 0x7a6   :  { %v3222_v45 = vrot.slane %v3113_v4, 4 }
 0x7a7   :  { %v3062_v35 = vpop.f32.mrf.mxu0  ;;  %v3115_v5 = vpop.f32.mrf.mxu1 }
 0x7a8   :  { %v3223_v23 = vrot.slane %v3115_v5, 4 }
 0x7a9   :  { %v3064_v61 = vpop.f32.mrf.mxu0  ;;  %v3117_v60 = vpop.f32.mrf.mxu1 }
 0x7aa   :  { %v3225_v39 = vrot.slane %v3117_v60, 4  ;;  %v3224_v27 = vsel %vm1073_vm1, %v3221_v26, %v3223_v23 }
 0x7ab   :  { %v3068_v10 = vpop.f32.mrf.mxu0  ;;  %v3121_v19 = vpop.f32.mrf.mxu1 }
 0x7ac   :  { %v3227_v55 = vrot.slane %v3121_v19, 4  ;;  %v3226_v58 = vsel %vm1073_vm1, %v3222_v45, %v3225_v39 }
 0x7ad   :  { %v3070_v51 = vpop.f32.mrf.mxu0  ;;  %v3123_v30 = vpop.f32.mrf.mxu1 }
 0x7ae   :  { %v3229_v56 = vrot.slane %v3123_v30, 4  ;;  %v3228_v29 = vsel %vm1073_vm1, %v3223_v23, %v3227_v55 }
 0x7af   :  { %v3072_v0 = vpop.f32.mrf.mxu0  ;;  %v3125_v15 = vpop.f32.mrf.mxu1 }
 0x7b0   :  { %v3231_v22 = vrot.slane %v3125_v15, 4  ;;  %v3230_v63 = vsel %vm1073_vm1, %v3225_v39, %v3229_v56  ;;  %v3245_v28 = vsel %vm1073_vm1, %v3072_v0, %v3221_v26 }
 0x7b1   :  { %v3074_v24 = vpop.f32.mrf.mxu0  ;;  %v3127_v1 = vpop.f32.mrf.mxu1 }
 0x7b2   :  { %v3233_v57 = vrot.slane %v3127_v1, 4  ;;  %v3232_v20 = vsel %vm1073_vm1, %v3227_v55, %v3231_v22  ;;  %v3246_v33 = vsel %vm1073_vm1, %v3074_v24, %v3222_v45 }
 0x7b4   :  { %v3234_v32 = vsel %vm1073_vm1, %v3229_v56, %v3233_v57 }
 0x7c3   :  { %v3164_v25 = vpop.f32.mrf.mxu0 }
 0x7c5   :  { %v3166_v18 = vpop.f32.mrf.mxu0 }
 0x7c7   :  { %v3168_v7 = vpop.f32.mrf.mxu0 }
 0x7c9   :  { %v3170_v6 = vpop.f32.mrf.mxu0 }
 0x7ca   :  { %3264 = vmatprep.subr.mxu1 %v3170_v6 }
 0x7cb   :  { %3265 = vmatpush1.msra.mxu1 %v3168_v7  ;;  %v3174_v12 = vpop.f32.mrf.mxu0 }
 0x7cc   :  { %3266 = vmatprep.subr.mxu1 %v3166_v18 }
 0x7cd   :  { %3267 = vmatpush1.msra.mxu1 %v3164_v25 }
 0x7ce   :  { %3268 = vmatprep.subr.mxu1 %v3234_v32 }
 0x7cf   :  { %3269 = vmatpush1.msra.mxu1 %v3232_v20 }
 0x7d0   :  { %3270 = vmatprep.subr.mxu1 %v3230_v63 }
 0x7d1   :  { %3271 = vmatpush1.msra.mxu1 %v3228_v29 }
 0x7d2   :  { %3272 = vmatprep.subr.mxu1 %v3226_v58 }
 0x7d3   :  { %3273 = vmatpush1.msra.mxu1 %v3224_v27 }
 0x7d4   :  { %3274 = vmatprep.subr.mxu1 %v3246_v33 }
 0x7d5   :  { %3275 = vmatpush1.msra.mxu1 %v3245_v28 }
 0x7d6   :  { %3276 = vmatprep.subr.mxu1 %v3070_v51 }
 0x7d7   :  { %3277 = vmatpush1.msra.mxu1 %v3068_v10 }
 0x7d8   :  { %3278 = vmatprep.subr.mxu1 %v3064_v61 }
 0x7d9   :  { %3279 = vmatpush1.msra.mxu1 %v3062_v35 }
 0x7da   :  { %3280 = vmatprep.subr.mxu1 %v3060_v16  ;;  %v3243_v16 = vsel %vm1073_vm1, %v5468_v59, %v3191_v53  ;;  %v3247_v59 = vld [vmem:[#allocation11] sm:$0xff] }
 0x7db   :  { %3281 = vmatpush1.msra.mxu1 %v3058_v14  ;;  %v3176_v14 = vpop.f32.mrf.mxu0 }
 0x7dc   :  { %3282 = vmatprep.subr.mxu1 %v3204_v11 }
 0x7dd   :  { %3283 = vmatpush1.msra.mxu1 %v3202_v43  ;;  %v3178_v21 = vpop.f32.mrf.mxu0 }
 0x7de   :  { %3284 = vmatprep.subr.mxu1 %v3200_v8 }
 0x7df   :  { %3285 = vmatpush1.msra.mxu1 %v3198_v52  ;;  %v3180_v17 = vpop.f32.mrf.mxu0  ;;  %v4494_v52 = vmov 1966171168  }
 0x7e0   :  { %3286 = vmatprep.subr.mxu1 %v3196_v40  ;;  %v3394_v40 = vunpack.c.l.s4 %v4494_v52 }
 0x7e1   :  { %3287 = vmatpush1.msra.mxu1 %v3194_v62 }
 0x7e2   :  { %3288 = vmatprep.subr.mxu1 %v3244_v3  ;;  %v3395_v62 = vunpack.c.0.s8 %v3394_v40 }
 0x7e3   :  { %3289 = vmatpush1.msra.mxu1 %v3243_v16 }
 0x7e4   :  { %3290 = vmatprep.subr.mxu1 %v5464_v37  ;;  %v3398_v3 = vsub.s32 %v3395_v62, %v4796_v46 }
 0x7e5   :  { %3291 = vmatpush1.msra.mxu1 %v5460_v2  ;;  %v3249_v2 = vld [vmem:[#allocation11 + $0x10] sm:$0xf] }
 0x7e6   :  { %3292 = vmatprep.subr.mxu1 %v5456_v41 }
 0x7e7   :  { %3293 = vmatpush1.msra.mxu1 %v5452_v34 }
 0x7e8   :  { %3294 = vmatprep.subr.mxu1 %v5448_v13 }
 0x7e9   :  { %3295 = vmatpush1.msra.mxu1 %v5446_v54 }
 0x7ea   :  { %3697 = vmatprep.subr.msk.mxu1 %vm1073_vm1, %v3180_v17 }
 0x7eb   :  { %3698 = vmatpush2.msk.msra.mxu1 %vm1073_vm1, %v3178_v21 }
 0x7ec   :  { %3326 = vmatprep.subr.mxu1 %v3176_v14 }
 0x7ed   :  { %3327 = vmatpush2.msra.mxu1 %v3174_v12 }
 0x7ee   :  { %3329 = vmatmul.mubr.f32.vlgmr.msra.gmra.mxu1 %v3247_v59  ;;  %v3385_v59 = vld [vmem:[#allocation15] sm:$0x3] }
 0x7ef   :  { %3700 = vmatprep.mubr.msk.f32.mxu1 %vm3251_vm3, %v3250_v38 }
 0x7f2   :  { %3335 = vmatmul.mubr.f32.gmra.mxu1 %v3249_v2  ;;  %v3424_v2 = vld [vmem:[%s5559_s14] sm:$0x3]  ;;  %s4495_s14 = smov [#allocation20]  }
 0x8ae   :  { %v3330_v41 = vpop.f32.mrf.mxu1 }
 0x8b0   :  { %v3332_v34 = vpop.f32.mrf.mxu1 }
 0x8b2   :  { %v3336_v37 = vpop.f32.mrf.mxu1 }
 0x8b3   :  { %v3341_v13 = vsel %vm1073_vm1, %v3336_v37, 0.0 }
 0x8b4   :  { %v3342_v35 = vadd.f32 %v3341_v13, %v3330_v41  ;;  %v3338_v54 = vpop.f32.mrf.mxu1  ;;  %v3429_v13 = vrot.slane %v3424_v2, %v4805_v50 }
 0x8b5   :  { %v3349_v4 = vsel %vm1073_vm1, %v3338_v54, 0.0 }
 0x8b6   :  { %v3343_v61 = vrot.slane %v3342_v35, 4  ;;  %v3350_v5 = vadd.f32 %v3349_v4, %v3332_v34 }
 0x8b8   :  { %v3344_v10 = vadd.f32 %v3343_v61, %v3342_v35  ;;  %v3351_v60 = vrot.slane %v3350_v5, 4  ;;  %v3433_v35 = vrot.slane %v3424_v2, %v4802_v49 }
 0x8ba   :  { %v3345_v51 = vrot.slane %v3344_v10, 2  ;;  %v3352_v19 = vadd.f32 %v3351_v60, %v3350_v5  ;;  %v3456_v5 = vld [vmem:[%s5560_s15] sm:$0x3f] }
 0x8bc   :  { %v3346_v0 = vadd.f32 %v3345_v51, %v3344_v10  ;;  %v3353_v30 = vrot.slane %v3352_v19, 2  ;;  %v3457_v10 = vld [vmem:[%s5560_s15 + $0x8] sm:$0x3f]  ;;  %s3525_s15 = sshll.u32 %s4495_s14, 4  ;;  %s3526_s15 = int_to_ptr.vmem [resolvable:$true] %s3525_s15 }
 0x8bd   :  { %s4438_s25 = scalar_lea.vmem %s3526_s15, 512  ;;  %p4443_p9 = scmp.lt.s32.totalorder %s3526_s15, %s3526_s15 }
 0x8be   :  { %v3347_v24 = vrot.slane %v3346_v0, 1  ;;  %v3354_v15 = vadd.f32 %v3353_v30, %v3352_v19  ;;  %v3475_v30 = vrot.slane %v3456_v5, 2  ;;  %p4439_p8 = scmp.ne.s32.totalorder %s3526_s15, %s4438_s25  ;;  %p4444_p10 = scmp.lt.s32.totalorder %s4438_s25, %s4438_s25 }
 0x8c0   :  { %v3348_v25 = vadd.f32 %v3347_v24, %v3346_v0  ;;  %v3355_v18 = vrot.slane %v3354_v15, 1  ;;  %p4445_p11 = por %p4444_p10, %p4443_p9 }
 0x8c2   :  { %v3357_v1 = vmul.f32 0.083333336, %v3348_v25  ;;  %v3356_v7 = vadd.f32 %v3355_v18, %v3354_v15  ;;  %p4446_p12 = pnand %p4445_p11, %p4439_p8 }
 0x8c4   :  { %v3359_v57 = vsub.f32 %v3330_v41, %v3357_v1  ;;  %v3361_v6 = vsub.f32 %v3336_v37, %v3357_v1  ;;  %v3358_v22 = vmul.f32 0.083333336, %v3356_v7 }
 0x8c6   :  { %v3363_v56 = vmul.f32 %v3359_v57, %v3359_v57  ;;  %v3365_v55 = vmul.f32 %v3361_v6, %v3361_v6  ;;  %v3360_v39 = vsub.f32 %v3332_v34, %v3358_v22  ;;  %v3362_v32 = vsub.f32 %v3338_v54, %v3358_v22 }
 0x8c8   :  { %v3367_v23 = vsel %vm1073_vm1, %v3365_v55, 0.0  ;;  %v3364_v20 = vmul.f32 %v3360_v39, %v3360_v39  ;;  %v3366_v45 = vmul.f32 %v3362_v32, %v3362_v32 }
 0x8c9   :  { %v3368_v63 = vadd.f32 %v3367_v23, %v3363_v56 }
 0x8ca   :  { %v3375_v26 = vsel %vm1073_vm1, %v3366_v45, 0.0 }
 0x8cb   :  { %v3369_v29 = vrot.slane %v3368_v63, 4  ;;  %v3376_v58 = vadd.f32 %v3375_v26, %v3364_v20 }
 0x8cd   :  { %v3370_v27 = vadd.f32 %v3369_v29, %v3368_v63  ;;  %v3377_v33 = vrot.slane %v3376_v58, 4 }
 0x8cf   :  { %v3371_v28 = vrot.slane %v3370_v27, 2  ;;  %v3378_v44 = vadd.f32 %v3377_v33, %v3376_v58 }
 0x8d1   :  { %v3372_v9 = vadd.f32 %v3371_v28, %v3370_v27  ;;  %v3379_v36 = vrot.slane %v3378_v44, 2 }
 0x8d3   :  { %v3373_v48 = vrot.slane %v3372_v9, 1  ;;  %v3380_v47 = vadd.f32 %v3379_v36, %v3378_v44 }
 0x8d5   :  { %v3374_v11 = vadd.f32 %v3373_v48, %v3372_v9  ;;  %v3381_v31 = vrot.slane %v3380_v47, 1 }
 0x8d7   :  { %v3383_v43 = vmul.f32 0.083333336, %v3374_v11  ;;  %v3382_v42 = vadd.f32 %v3381_v31, %v3380_v47 }
 0x8d9   :  { %v3386_v12 = vadd.f32 1e-05, %v3383_v43  ;;  %v3384_v8 = vmul.f32 0.083333336, %v3382_v42 }
 0x8db   :  { %v3387_v53 = vadd.f32 1e-05, %v3384_v8  ;;  %4234 = vrsqrt.f32 %v3386_v12 }
 0x8dd   :  { %4236 = vrsqrt.f32 %v3387_v53 }
 0x8e8   :  { %v4235_v14 = vpop.eup %4234 }
 0x8ea   :  { %v4237_v16 = vpop.eup %4236 }
 0x8eb   :  { %v3392_v21 = vcombine.low %v4235_v14, %v4237_v16 }
 0x8ed   :  { %v3399_v17 = vrot.slane %v3392_v21, %v3398_v3 }
 0x8ef   :  { %v3406_v38 = vrot.slane %v3399_v17, %v3398_v3 }
 0x8f1   :  { %v3408_v41 = vmul.f32 %v3406_v38, %v3385_v59 }
 0x8f3   :  { %v3413_v34 = vrot.slane %v3408_v41, %v4805_v50  ;;  %v3417_v37 = vrot.slane %v3408_v41, %v4802_v49  ;;  %v3476_v50 = vrot.slane %v3457_v10, 2 }
 0x8f5   :  { %v3420_v54 = vmul.f32 %v3413_v34, %v3359_v57  ;;  %v3421_v46 = vmul.f32 %v3417_v37, %v3360_v39  ;;  %v3422_v4 = vmul.f32 %v3413_v34, %v3361_v6  ;;  %v3423_v61 = vmul.f32 %v3417_v37, %v3362_v32 }
 0x8f7   :  { %v3436_v60 = vadd.f32 %v3429_v13, %v3420_v54  ;;  %v3437_v51 = vadd.f32 %v3433_v35, %v3421_v46  ;;  %v3438_v19 = vadd.f32 %v3429_v13, %v3422_v4  ;;  %v3439_v0 = vadd.f32 %v3433_v35, %v3423_v61 }
 0x8f9   :  { %vm3443_vm4 = vcmp.ge.f32.partialorder %v3439_v0, 0.0  ;;  %v3447_v49 = vmul.f32 0.2, %v3439_v0  ;;  %vm3442_vm5 = vcmp.ge.f32.partialorder %v3438_v19, 0.0  ;;  %v3446_v24 = vmul.f32 0.2, %v3438_v19 }
 0x8fa   :  { %vm3440_vm6 = vcmp.ge.f32.partialorder %v3436_v60, 0.0  ;;  %vm3441_vm7 = vcmp.ge.f32.partialorder %v3437_v51, 0.0  ;;  %v3444_v15 = vmul.f32 0.2, %v3436_v60  ;;  %v3445_v25 = vmul.f32 0.2, %v3437_v51 }
 0x8fb   :  { %v3450_v18 = vsel %vm3442_vm5, %v3438_v19, %v3446_v24  ;;  %v3451_v1 = vsel %vm3443_vm4, %v3439_v0, %v3447_v49 }
 0x8fc   :  { %v3481_v7 = vmul.f32 %v3475_v30, %v3450_v18  ;;  %v3482_v57 = vmul.f32 %v3476_v50, %v3451_v1  ;;  %3454 = vst [vmem:[#allocation20 + $0x10] sm:$0xf] %v3450_v18  ;;  %3455 = vst [vmem:[#allocation20 + $0x18] sm:$0xf] %v3451_v1  ;;  %v3448_v6 = vsel %vm3440_vm6, %v3436_v60, %v3444_v15 }
 0x8fd   :  { %v3449_v22 = vsel %vm3441_vm7, %v3437_v51, %v3445_v25  ;;  %v3479_v56 = vmul.f32 %v3475_v30, %v3448_v6  ;;  %3452 = vst [vmem:[#allocation20] sm:$0xff] %v3448_v6  ;;  %v3458_v39 = vmul.f32 %v3456_v5, %v3448_v6 }
 0x8fe   :  { %v3480_v55 = vmul.f32 %v3476_v50, %v3449_v22  ;;  %3453 = vst [vmem:[#allocation20 + $0x8] sm:$0xff] %v3449_v22  ;;  %v3459_v32 = vmul.f32 %v3457_v10, %v3449_v22  ;;  %v3489_v23 = vsel %vm1073_vm1, %v3481_v7, 0.0  ;;  %v3490_v20 = vsel %vm1073_vm1, %v3482_v57, 0.0 }
 0x8ff   :  { %v3491_v45 = vadd.f32 %v3490_v20, %v3489_v23  ;;  %v3484_v63 = vsel %vm3483_vm8, %v3479_v56, 0.0  ;;  %v3461_v58 = vsel %vm3460_vm9, %v3458_v39, 0.0 }
 0x900   :  { %v3485_v26 = vsel %vm3483_vm8, %v3480_v55, 0.0  ;;  %v3462_v27 = vsel %vm3460_vm9, %v3459_v32, 0.0 }
 0x901   :  { %v3486_v29 = vadd.f32 %v3485_v26, %v3484_v63  ;;  %3492 = vadd.xlane.f32.xlu1 %v3491_v45  ;;  %v3463_v33 = vadd.f32 %v3462_v27, %v3461_v58 }
 0x903   :  { %3487 = vadd.xlane.f32.xlu0 %v3486_v29 }
 0x907   :  { %3464 = vadd.xlane.f32.xlu0 %v3463_v33 }
 0x908   :  { %4449 = shalt.err (!%p4446_p12)
}
 0x909   :  { %3531 = dma.vmem_to_hbm [thread:$0]  %s3526_s15, 512, %s5562_s17, [#allocation5], %s4483_s16, %s4483_s16, %s4484_s1   ;;  %vm3496_vm1 = vcmask 1041408   ;;  %vm3508_vm10 = vcmask 1040384   ;;  %v3701_v21 = vld [vmem:[#allocation2] ss:$0 sm:$0xff] }
 0x90a   :  { %vm3518_vm11 = vcmask 1024  }
 0x98a   :  { %v3493_v28 = vpop.xlane.xlu1 %3492 }
 0x98b   :  { %v3498_v44 = vrot.slane %v3493_v28, 6 }
 0x98c   :  { %v3488_v9 = vpop.xlane.xlu0 %3487 }
 0x98d   :  { %v3497_v36 = vrot.slane %v3488_v9, 6 }
 0x98f   :  { %v3499_v48 = vsel %vm3496_vm1, %v3497_v36, %v3498_v44 }
 0x990   :  { %v3501_v47 = vsel %vm3460_vm9, %v3499_v48, 0.0  ;;  %v3465_v11 = vpop.xlane.xlu0 %3464 }
 0x991   :  { %v3502_v31 = vrot.slane %v3501_v47, 4  ;;  %v3466_v43 = vsel %vm3460_vm9, %v3465_v11, 0.0 }
 0x992   :  { %v3467_v42 = vrot.slane %v3466_v43, 4 }
 0x993   :  { %v3503_v12 = vadd.f32 %v3502_v31, %v3501_v47 }
 0x994   :  { %v3468_v8 = vadd.f32 %v3467_v42, %v3466_v43 }
 0x995   :  { %v3504_v53 = vrot.slane %v3503_v12, 2 }
 0x996   :  { %v3469_v52 = vrot.slane %v3468_v8, 2 }
 0x997   :  { %v3505_v40 = vadd.f32 %v3504_v53, %v3503_v12 }
 0x998   :  { %v3470_v62 = vadd.f32 %v3469_v52, %v3468_v8 }
 0x999   :  { %v3506_v14 = vrot.slane %v3505_v40, 1 }
 0x99a   :  { %v3471_v3 = vrot.slane %v3470_v62, 1 }
 0x99b   :  { %v3507_v16 = vadd.f32 %v3506_v14, %v3505_v40 }
 0x99c   :  { %v3472_v17 = vadd.f32 %v3471_v3, %v3470_v62 }
 0x99e   :  { %v3509_v59 = vsel %vm3508_vm10, %v3472_v17, %v3507_v16 }
 0x99f   :  { %v3517_v38 = vadd.f32 %v3701_v21, %v3509_v59 }
 0x9a1   :  { %3519 = vst.msk [vmem:[%s5563_s18] sm:$0x3] %vm3518_vm11, %v3517_v38 }
 0x9a2   :  { %4470 = dma.done.wait [#allocation5], 512  }
 0x9a3   :  { %4471 = vsyncadd [#allocation5], 4294966784 }
 0x9a4   :  { %3539 = vsyncpa [#allocation4], 1 }
 0x9a5   :  { %3540 = vsyncpa [#allocation7], 1 }
 0x9a6   :  { %3541 = vsyncpa [#allocation10], 1 }
 0x9a7   :  { %3542 = vsyncpa [#allocation13], 1 }
 0x9a8   :  { %3543 = vsyncpa [#allocation16], 1 }
 0x9a9   :  { %3544 = vsyncpa [#allocation19], 1 }
 0x9aa   :  { %3545 = vsyncpa [#allocation5], 1 }

</bundles_post_ra>
